<compile_context>
chip_gen: v7x
topology: tpu7x:2x2x1
jax: 0.10.0
libtpu: 0.0.40
codegen_flags: <defaults>
</compile_context>

<pallas_src>
import math

import jax
import jax.numpy as jnp
from jax.experimental import pallas as pl
from jax.experimental.pallas import tpu as pltpu


CONV_CH = 128   # channels of both Conv1d layers (fixed by the module)
HIDDEN = 512    # hidden width of each FC branch (fixed by the module)
KSIZE = 5       # Conv1d kernel size (fixed by the module)


# ---------------------------------------------------------------------------
# Kernel
# ---------------------------------------------------------------------------
def _dqn_conv1d_kernel(x_ref,
                       wc1_ref, bc1_ref, wc2_ref, bc2_ref,
                       wfc1_ref, bfc1_ref,
                       wv2_ref, bv2_ref, wa2_ref, ba2_ref,
                       out_ref):
    f32 = jnp.float32
    TB, L, Cin = x_ref.shape
    K = wc1_ref.shape[0]
    C1 = wc1_ref.shape[2]
    L1 = L - (K - 1)
    L2 = L1 - (K - 1)
    H2 = bfc1_ref.shape[1]        # 2 * HIDDEN (fused value ++ advantage)
    H = H2 // 2

    x = x_ref[...]                                          # (TB, L, Cin) f32

    # ---- Conv1d #1 (valid, stride 1) as K shifted matmuls -------------------
    acc1 = jnp.zeros((TB * L1, C1), f32)
    for k in range(K):
        xs = x[:, k:k + L1, :].reshape(TB * L1, Cin)
        acc1 = acc1 + jnp.dot(xs, wc1_ref[k], preferred_element_type=f32)
    h1 = jnp.maximum(acc1 + bc1_ref[...], 0.0).reshape(TB, L1, C1)

    # ---- Conv1d #2 (bf16 weights, f32 accumulate) ---------------------------
    acc2 = jnp.zeros((TB * L2, C1), f32)
    for k in range(K):
        hs = h1[:, k:k + L2, :].reshape(TB * L2, C1)
        acc2 = acc2 + jnp.dot(hs, wc2_ref[k].astype(f32),
                              preferred_element_type=f32)
    h2 = jnp.maximum(acc2 + bc2_ref[...], 0.0).reshape(TB, L2, C1)

    # ---- Fused FC layer 1 (value ++ advantage) ------------------------------
    # conv_out is never materialised wide: contract per spatial tap to avoid a
    # lane-crossing reshape; bf16 weights upcast in VMEM (DMA already halved).
    accf = jnp.zeros((TB, H2), f32)
    for t in range(L2):
        accf = accf + jnp.dot(h2[:, t, :], wfc1_ref[t].astype(f32),
                              preferred_element_type=f32)
    h = jnp.maximum(accf + bfc1_ref[...], 0.0)               # (TB, 2*HIDDEN)

    hv = h[:, :H]
    ha = h[:, H:]
    val = jnp.dot(hv, wv2_ref[...], preferred_element_type=f32) + bv2_ref[...]   # (TB, 1)
    adv = jnp.dot(ha, wa2_ref[...], preferred_element_type=f32) + ba2_ref[...]   # (TB, A)

    # ---- Dueling combination ------------------------------------------------
    out_ref[...] = val + adv - jnp.mean(adv, axis=1, keepdims=True)


# ---------------------------------------------------------------------------
# Wrapper
# ---------------------------------------------------------------------------
def dqn_conv1d_forward(x, kp):
    """x: (B, C_in, L) float32 (PyTorch layout). kp: kernel-layout params (prepare_params)."""
    B, Cin, L = x.shape
    K = kp["wc1"].shape[0]
    C1 = kp["wc1"].shape[2]
    L2 = L - 2 * (K - 1)
    A = kp["wa2"].shape[1]

    # Lane-dense layout for the kernel: channels last.
    x_t = jnp.transpose(x, (0, 2, 1))                        # (B, L, Cin)

    # Batch tiling: single tile for small B, 256-row tiles (multiple of 8 sublanes,
    # MXU row size on v6e/v7x) for large B so weights stay resident across grid steps.
    TB = B if B <= 256 else 256
    assert B % TB == 0, "batch must be a multiple of the batch tile"
    nb = B // TB

    args = (x_t,
            kp["wc1"], kp["bc1"], kp["wc2"], kp["bc2"],
            kp["wfc1"], kp["bfc1"],
            kp["wv2"], kp["bv2"], kp["wa2"], kp["ba2"])

    in_specs = [
        pl.BlockSpec((TB, L, Cin), lambda i: (i, 0, 0)),         # x: blocked over batch
        pl.BlockSpec(kp["wc1"].shape, lambda i: (0, 0, 0)),      # weights: constant index
        pl.BlockSpec(kp["bc1"].shape, lambda i: (0, 0)),
        pl.BlockSpec(kp["wc2"].shape, lambda i: (0, 0, 0)),
        pl.BlockSpec(kp["bc2"].shape, lambda i: (0, 0)),
        pl.BlockSpec(kp["wfc1"].shape, lambda i: (0, 0, 0)),
        pl.BlockSpec(kp["bfc1"].shape, lambda i: (0, 0)),
        pl.BlockSpec(kp["wv2"].shape, lambda i: (0, 0)),
        pl.BlockSpec(kp["bv2"].shape, lambda i: (0, 0)),
        pl.BlockSpec(kp["wa2"].shape, lambda i: (0, 0)),
        pl.BlockSpec(kp["ba2"].shape, lambda i: (0, 0)),
    ]
    out_specs = pl.BlockSpec((TB, A), lambda i: (i, 0))

    # Advisory cost estimate: kernel is dominated by weight DMA, not FLOPs.
    L1 = L - (K - 1)
    flops = B * (2 * L1 * K * Cin * C1
                 + 2 * L2 * K * C1 * C1
                 + 2 * (L2 * C1) * (2 * HIDDEN)
                 + 2 * HIDDEN * (1 + A))
    bytes_accessed = sum(int(a.size) * a.dtype.itemsize for a in args) + B * A * 4
    cost = pl.CostEstimate(flops=flops, transcendentals=0,
                           bytes_accessed=bytes_accessed)

    return pl.pallas_call(
        _dqn_conv1d_kernel,
        out_shape=jax.ShapeDtypeStruct((B, A), jnp.float32),
        grid=(nb,),
        in_specs=in_specs,
        out_specs=out_specs,
        compiler_params=pltpu.CompilerParams(dimension_semantics=("parallel",)),
        cost_estimate=cost,
    )(*args)


# ---------------------------------------------------------------------------
# Parameters (PyTorch layout) and kernel-layout preparation
# ---------------------------------------------------------------------------
def init_params(key, shape, actions_n):
    """PyTorch-layout params; big matrices quantised to bf16 (weight-DMA reduction)."""
    cin, L = shape
    L2 = L - 2 * (KSIZE - 1)
    out_size = CONV_CH * L2

    def uni(k, shp, fan_in):
        bound = 1.0 / math.sqrt(fan_in)
        return jax.random.uniform(k, shp, jnp.float32, -bound, bound)

    ks = jax.random.split(key, 12)
    return dict(
        wc1=uni(ks[0], (CONV_CH, cin, KSIZE), cin * KSIZE),
        bc1=uni(ks[1], (CONV_CH,), cin * KSIZE),
        wc2=uni(ks[2], (CONV_CH, CONV_CH, KSIZE), CONV_CH * KSIZE).astype(jnp.bfloat16),
        bc2=uni(ks[3], (CONV_CH,), CONV_CH * KSIZE),
        wv1=uni(ks[4], (HIDDEN, out_size), out_size).astype(jnp.bfloat16),
        bv1=uni(ks[5], (HIDDEN,), out_size),
        wv2=uni(ks[6], (1, HIDDEN), HIDDEN),
        bv2=uni(ks[7], (1,), HIDDEN),
        wa1=uni(ks[8], (HIDDEN, out_size), out_size).astype(jnp.bfloat16),
        ba1=uni(ks[9], (HIDDEN,), out_size),
        wa2=uni(ks[10], (actions_n, HIDDEN), HIDDEN),
        ba2=uni(ks[11], (actions_n,), HIDDEN),
    )


def prepare_params(p, L):
    """One-time rearrangement of PyTorch-layout weights into the kernel layout."""
    K = p["wc1"].shape[2]
    C1 = p["wc1"].shape[0]
    L2 = L - 2 * (K - 1)
    H = p["wv1"].shape[0]

    def fc1_to_tap_layout(w):
        # PyTorch Linear weight (H, C1*L2), flattened channel-major (c*L2 + t)
        # -> (L2, C1, H) so the kernel can contract per spatial tap.
        return jnp.transpose(w.reshape(H, C1, L2), (2, 1, 0))

    return dict(
        wc1=jnp.transpose(p["wc1"], (2, 1, 0)).astype(jnp.float32),      # (K, Cin, C1)
        bc1=p["bc1"].reshape(1, -1).astype(jnp.float32),
        wc2=jnp.transpose(p["wc2"], (2, 1, 0)).astype(jnp.bfloat16),     # (K, C1, C1)
        bc2=p["bc2"].reshape(1, -1).astype(jnp.float32),
        wfc1=jnp.concatenate([fc1_to_tap_layout(p["wv1"]),
                              fc1_to_tap_layout(p["wa1"])],
                             axis=-1).astype(jnp.bfloat16),              # (L2, C1, 2H)
        bfc1=jnp.concatenate([p["bv1"], p["ba1"]]).reshape(1, -1).astype(jnp.float32),
        wv2=jnp.transpose(p["wv2"]).astype(jnp.float32),                 # (H, 1)
        bv2=p["bv2"].reshape(1, -1).astype(jnp.float32),
        wa2=jnp.transpose(p["wa2"]).astype(jnp.float32),                 # (H, A)
        ba2=p["ba2"].reshape(1, -1).astype(jnp.float32),
    )


# ---------------------------------------------------------------------------
# Pure-JAX reference (mimics the PyTorch module literally)
# ---------------------------------------------------------------------------
def reference_forward(x, p):
    def conv1d(z, w, b):
        y = jax.lax.conv_general_dilated(
            z, w.astype(jnp.float32), window_strides=(1,), padding="VALID",
            dimension_numbers=("NCH", "OIH", "NCH"))
        return y + b[None, :, None]

    h = jax.nn.relu(conv1d(x, p["wc1"], p["bc1"]))
    h = jax.nn.relu(conv1d(h, p["wc2"], p["bc2"]))
    conv_out = h.reshape(x.shape[0], -1)                      # channel-major flatten
    hv = jax.nn.relu(conv_out @ p["wv1"].astype(jnp.float32).T + p["bv1"])
    val = hv @ p["wv2"].T + p["bv2"]
    ha = jax.nn.relu(conv_out @ p["wa1"].astype(jnp.float32).T + p["ba1"])
    adv = ha @ p["wa2"].T + p["ba2"]
    return val + adv - jnp.mean(adv, axis=1, keepdims=True)


if __name__ == "__main__":
    batch = 2
    shape = (4, 16)          # (channels, length) -> conv out_size = 128 * 8 = 1024
    actions_n = 8

    key = jax.random.PRNGKey(0)
    kx, kparam = jax.random.split(key)
    x = jax.random.normal(kx, (batch,) + shape, jnp.float32)

    params = init_params(kparam, shape, actions_n)
    kernel_params = prepare_params(params, shape[1])

    out = dqn_conv1d_forward(x, kernel_params)
    out = jax.block_until_ready(out)

    ref = reference_forward(x, params)
    assert out.shape == (batch, actions_n)
    assert jnp.allclose(out, ref, atol=1e-3, rtol=1e-3), "mismatch vs reference"

    print("KERNEL_OK")
</pallas_src>

<mosaic_0001>
module attributes {stable_mosaic.version = 11 : i64} {
  func.func @_dqn_conv1d_kernel(%arg0: i32, %arg1: memref<2x16x4xf32, #tpu.memory_space<vmem>>, %arg2: memref<5x4x128xf32, #tpu.memory_space<vmem>>, %arg3: memref<1x128xf32, #tpu.memory_space<vmem>>, %arg4: memref<5x128x128xbf16, #tpu.memory_space<vmem>>, %arg5: memref<1x128xf32, #tpu.memory_space<vmem>>, %arg6: memref<8x128x1024xbf16, #tpu.memory_space<vmem>>, %arg7: memref<1x1024xf32, #tpu.memory_space<vmem>>, %arg8: memref<512x1xf32, #tpu.memory_space<vmem>>, %arg9: memref<1x1xf32, #tpu.memory_space<vmem>>, %arg10: memref<512x8xf32, #tpu.memory_space<vmem>>, %arg11: memref<1x8xf32, #tpu.memory_space<vmem>>, %arg12: memref<2x8xf32, #tpu.memory_space<vmem>>) attributes {dimension_semantics = [#tpu.dimension_semantics<parallel>], iteration_bounds = array<i64: 1>, scalar_prefetch = 0 : i64, scratch_operands = 0 : i64, tpu.core_type = #tpu.core_type<tc>, window_params = [{transform_indices = @transform_0, window_bounds = array<i64: 2, 16, 4>}, {pipeline_mode = #tpu.pipeline_mode<synchronous>, transform_indices = @transform_1, window_bounds = array<i64: 5, 4, 128>}, {pipeline_mode = #tpu.pipeline_mode<synchronous>, transform_indices = @transform_2, window_bounds = array<i64: 1, 128>}, {pipeline_mode = #tpu.pipeline_mode<synchronous>, transform_indices = @transform_3, window_bounds = array<i64: 5, 128, 128>}, {pipeline_mode = #tpu.pipeline_mode<synchronous>, transform_indices = @transform_4, window_bounds = array<i64: 1, 128>}, {pipeline_mode = #tpu.pipeline_mode<synchronous>, transform_indices = @transform_5, window_bounds = array<i64: 8, 128, 1024>}, {pipeline_mode = #tpu.pipeline_mode<synchronous>, transform_indices = @transform_6, window_bounds = array<i64: 1, 1024>}, {pipeline_mode = #tpu.pipeline_mode<synchronous>, transform_indices = @transform_7, window_bounds = array<i64: 512, 1>}, {pipeline_mode = #tpu.pipeline_mode<synchronous>, transform_indices = @transform_8, window_bounds = array<i64: 1, 1>}, {pipeline_mode = #tpu.pipeline_mode<synchronous>, transform_indices = @transform_9, window_bounds = array<i64: 512, 8>}, {pipeline_mode = #tpu.pipeline_mode<synchronous>, transform_indices = @transform_10, window_bounds = array<i64: 1, 8>}, {transform_indices = @transform_11, window_bounds = array<i64: 2, 8>}]} {
    %c0 = arith.constant 0 : index
    %c0_0 = arith.constant 0 : index
    %c0_1 = arith.constant 0 : index
    %0 = vector.load %arg1[%c0, %c0_0, %c0_1] : memref<2x16x4xf32, #tpu.memory_space<vmem>>, vector<2x16x4xf32>
    %cst = arith.constant 0.000000e+00 : f32
    %1 = vector.broadcast %cst : f32 to vector<24x128xf32>
    %2 = vector.extract_strided_slice %0 {offsets = [0, 0, 0], sizes = [2, 12, 4], strides = [1, 1, 1]} : vector<2x16x4xf32> to vector<2x12x4xf32>
    %3 = vector.shape_cast %2 : vector<2x12x4xf32> to vector<24x4xf32>
    %c0_2 = arith.constant 0 : index
    %c0_3 = arith.constant 0 : index
    %c0_4 = arith.constant 0 : index
    %4 = vector.load %arg2[%c0_2, %c0_3, %c0_4] : memref<5x4x128xf32, #tpu.memory_space<vmem>>, vector<1x4x128xf32>
    %5 = vector.shape_cast %4 : vector<1x4x128xf32> to vector<4x128xf32>
    %cst_5 = arith.constant dense<0.000000e+00> : vector<24x128xf32>
    %6 = tpu.matmul %3, %5, %cst_5 {dimension_numbers = #tpu.dot_dimension_numbers<[1], [0], [0], [1], [0, 0, 1, 1], [], []>} : vector<24x4xf32>, vector<4x128xf32>, vector<24x128xf32> -> vector<24x128xf32>
    %7 = arith.addf %1, %6 : vector<24x128xf32>
    %8 = vector.extract_strided_slice %0 {offsets = [0, 1, 0], sizes = [2, 12, 4], strides = [1, 1, 1]} : vector<2x16x4xf32> to vector<2x12x4xf32>
    %9 = vector.shape_cast %8 : vector<2x12x4xf32> to vector<24x4xf32>
    %c1 = arith.constant 1 : index
    %c0_6 = arith.constant 0 : index
    %c0_7 = arith.constant 0 : index
    %10 = vector.load %arg2[%c1, %c0_6, %c0_7] : memref<5x4x128xf32, #tpu.memory_space<vmem>>, vector<1x4x128xf32>
    %11 = vector.shape_cast %10 : vector<1x4x128xf32> to vector<4x128xf32>
    %cst_8 = arith.constant dense<0.000000e+00> : vector<24x128xf32>
    %12 = tpu.matmul %9, %11, %cst_8 {dimension_numbers = #tpu.dot_dimension_numbers<[1], [0], [0], [1], [0, 0, 1, 1], [], []>} : vector<24x4xf32>, vector<4x128xf32>, vector<24x128xf32> -> vector<24x128xf32>
    %13 = arith.addf %7, %12 : vector<24x128xf32>
    %14 = vector.extract_strided_slice %0 {offsets = [0, 2, 0], sizes = [2, 12, 4], strides = [1, 1, 1]} : vector<2x16x4xf32> to vector<2x12x4xf32>
    %15 = vector.shape_cast %14 : vector<2x12x4xf32> to vector<24x4xf32>
    %c2 = arith.constant 2 : index
    %c0_9 = arith.constant 0 : index
    %c0_10 = arith.constant 0 : index
    %16 = vector.load %arg2[%c2, %c0_9, %c0_10] : memref<5x4x128xf32, #tpu.memory_space<vmem>>, vector<1x4x128xf32>
    %17 = vector.shape_cast %16 : vector<1x4x128xf32> to vector<4x128xf32>
    %cst_11 = arith.constant dense<0.000000e+00> : vector<24x128xf32>
    %18 = tpu.matmul %15, %17, %cst_11 {dimension_numbers = #tpu.dot_dimension_numbers<[1], [0], [0], [1], [0, 0, 1, 1], [], []>} : vector<24x4xf32>, vector<4x128xf32>, vector<24x128xf32> -> vector<24x128xf32>
    %19 = arith.addf %13, %18 : vector<24x128xf32>
    %20 = vector.extract_strided_slice %0 {offsets = [0, 3, 0], sizes = [2, 12, 4], strides = [1, 1, 1]} : vector<2x16x4xf32> to vector<2x12x4xf32>
    %21 = vector.shape_cast %20 : vector<2x12x4xf32> to vector<24x4xf32>
    %c3 = arith.constant 3 : index
    %c0_12 = arith.constant 0 : index
    %c0_13 = arith.constant 0 : index
    %22 = vector.load %arg2[%c3, %c0_12, %c0_13] : memref<5x4x128xf32, #tpu.memory_space<vmem>>, vector<1x4x128xf32>
    %23 = vector.shape_cast %22 : vector<1x4x128xf32> to vector<4x128xf32>
    %cst_14 = arith.constant dense<0.000000e+00> : vector<24x128xf32>
    %24 = tpu.matmul %21, %23, %cst_14 {dimension_numbers = #tpu.dot_dimension_numbers<[1], [0], [0], [1], [0, 0, 1, 1], [], []>} : vector<24x4xf32>, vector<4x128xf32>, vector<24x128xf32> -> vector<24x128xf32>
    %25 = arith.addf %19, %24 : vector<24x128xf32>
    %26 = vector.extract_strided_slice %0 {offsets = [0, 4, 0], sizes = [2, 12, 4], strides = [1, 1, 1]} : vector<2x16x4xf32> to vector<2x12x4xf32>
    %27 = vector.shape_cast %26 : vector<2x12x4xf32> to vector<24x4xf32>
    %c4 = arith.constant 4 : index
    %c0_15 = arith.constant 0 : index
    %c0_16 = arith.constant 0 : index
    %28 = vector.load %arg2[%c4, %c0_15, %c0_16] : memref<5x4x128xf32, #tpu.memory_space<vmem>>, vector<1x4x128xf32>
    %29 = vector.shape_cast %28 : vector<1x4x128xf32> to vector<4x128xf32>
    %cst_17 = arith.constant dense<0.000000e+00> : vector<24x128xf32>
    %30 = tpu.matmul %27, %29, %cst_17 {dimension_numbers = #tpu.dot_dimension_numbers<[1], [0], [0], [1], [0, 0, 1, 1], [], []>} : vector<24x4xf32>, vector<4x128xf32>, vector<24x128xf32> -> vector<24x128xf32>
    %31 = arith.addf %25, %30 : vector<24x128xf32>
    %c0_18 = arith.constant 0 : index
    %c0_19 = arith.constant 0 : index
    %32 = vector.load %arg3[%c0_18, %c0_19] : memref<1x128xf32, #tpu.memory_space<vmem>>, vector<1x128xf32>
    %33 = vector.broadcast %32 : vector<1x128xf32> to vector<24x128xf32>
    %34 = arith.addf %31, %33 : vector<24x128xf32>
    %cst_20 = arith.constant 0.000000e+00 : f32
    %35 = vector.broadcast %cst_20 : f32 to vector<24x128xf32>
    %36 = arith.maximumf %34, %35 : vector<24x128xf32>
    %37 = vector.shape_cast %36 : vector<24x128xf32> to vector<2x12x128xf32>
    %cst_21 = arith.constant 0.000000e+00 : f32
    %38 = vector.broadcast %cst_21 : f32 to vector<16x128xf32>
    %39 = vector.extract_strided_slice %37 {offsets = [0, 0, 0], sizes = [2, 8, 128], strides = [1, 1, 1]} : vector<2x12x128xf32> to vector<2x8x128xf32>
    %40 = vector.shape_cast %39 : vector<2x8x128xf32> to vector<16x128xf32>
    %c0_22 = arith.constant 0 : index
    %c0_23 = arith.constant 0 : index
    %c0_24 = arith.constant 0 : index
    %41 = vector.load %arg4[%c0_22, %c0_23, %c0_24] : memref<5x128x128xbf16, #tpu.memory_space<vmem>>, vector<1x128x128xbf16>
    %42 = vector.shape_cast %41 : vector<1x128x128xbf16> to vector<128x128xbf16>
    %43 = arith.extf %42 : vector<128x128xbf16> to vector<128x128xf32>
    %cst_25 = arith.constant dense<0.000000e+00> : vector<16x128xf32>
    %44 = tpu.matmul %40, %43, %cst_25 {dimension_numbers = #tpu.dot_dimension_numbers<[1], [0], [0], [1], [0, 0, 1, 1], [], []>} : vector<16x128xf32>, vector<128x128xf32>, vector<16x128xf32> -> vector<16x128xf32>
    %45 = arith.addf %38, %44 : vector<16x128xf32>
    %46 = vector.extract_strided_slice %37 {offsets = [0, 1, 0], sizes = [2, 8, 128], strides = [1, 1, 1]} : vector<2x12x128xf32> to vector<2x8x128xf32>
    %47 = vector.shape_cast %46 : vector<2x8x128xf32> to vector<16x128xf32>
    %c1_26 = arith.constant 1 : index
    %c0_27 = arith.constant 0 : index
    %c0_28 = arith.constant 0 : index
    %48 = vector.load %arg4[%c1_26, %c0_27, %c0_28] : memref<5x128x128xbf16, #tpu.memory_space<vmem>>, vector<1x128x128xbf16>
    %49 = vector.shape_cast %48 : vector<1x128x128xbf16> to vector<128x128xbf16>
    %50 = arith.extf %49 : vector<128x128xbf16> to vector<128x128xf32>
    %cst_29 = arith.constant dense<0.000000e+00> : vector<16x128xf32>
    %51 = tpu.matmul %47, %50, %cst_29 {dimension_numbers = #tpu.dot_dimension_numbers<[1], [0], [0], [1], [0, 0, 1, 1], [], []>} : vector<16x128xf32>, vector<128x128xf32>, vector<16x128xf32> -> vector<16x128xf32>
    %52 = arith.addf %45, %51 : vector<16x128xf32>
    %53 = vector.extract_strided_slice %37 {offsets = [0, 2, 0], sizes = [2, 8, 128], strides = [1, 1, 1]} : vector<2x12x128xf32> to vector<2x8x128xf32>
    %54 = vector.shape_cast %53 : vector<2x8x128xf32> to vector<16x128xf32>
    %c2_30 = arith.constant 2 : index
    %c0_31 = arith.constant 0 : index
    %c0_32 = arith.constant 0 : index
    %55 = vector.load %arg4[%c2_30, %c0_31, %c0_32] : memref<5x128x128xbf16, #tpu.memory_space<vmem>>, vector<1x128x128xbf16>
    %56 = vector.shape_cast %55 : vector<1x128x128xbf16> to vector<128x128xbf16>
    %57 = arith.extf %56 : vector<128x128xbf16> to vector<128x128xf32>
    %cst_33 = arith.constant dense<0.000000e+00> : vector<16x128xf32>
    %58 = tpu.matmul %54, %57, %cst_33 {dimension_numbers = #tpu.dot_dimension_numbers<[1], [0], [0], [1], [0, 0, 1, 1], [], []>} : vector<16x128xf32>, vector<128x128xf32>, vector<16x128xf32> -> vector<16x128xf32>
    %59 = arith.addf %52, %58 : vector<16x128xf32>
    %60 = vector.extract_strided_slice %37 {offsets = [0, 3, 0], sizes = [2, 8, 128], strides = [1, 1, 1]} : vector<2x12x128xf32> to vector<2x8x128xf32>
    %61 = vector.shape_cast %60 : vector<2x8x128xf32> to vector<16x128xf32>
    %c3_34 = arith.constant 3 : index
    %c0_35 = arith.constant 0 : index
    %c0_36 = arith.constant 0 : index
    %62 = vector.load %arg4[%c3_34, %c0_35, %c0_36] : memref<5x128x128xbf16, #tpu.memory_space<vmem>>, vector<1x128x128xbf16>
    %63 = vector.shape_cast %62 : vector<1x128x128xbf16> to vector<128x128xbf16>
    %64 = arith.extf %63 : vector<128x128xbf16> to vector<128x128xf32>
    %cst_37 = arith.constant dense<0.000000e+00> : vector<16x128xf32>
    %65 = tpu.matmul %61, %64, %cst_37 {dimension_numbers = #tpu.dot_dimension_numbers<[1], [0], [0], [1], [0, 0, 1, 1], [], []>} : vector<16x128xf32>, vector<128x128xf32>, vector<16x128xf32> -> vector<16x128xf32>
    %66 = arith.addf %59, %65 : vector<16x128xf32>
    %67 = vector.extract_strided_slice %37 {offsets = [0, 4, 0], sizes = [2, 8, 128], strides = [1, 1, 1]} : vector<2x12x128xf32> to vector<2x8x128xf32>
    %68 = vector.shape_cast %67 : vector<2x8x128xf32> to vector<16x128xf32>
    %c4_38 = arith.constant 4 : index
    %c0_39 = arith.constant 0 : index
    %c0_40 = arith.constant 0 : index
    %69 = vector.load %arg4[%c4_38, %c0_39, %c0_40] : memref<5x128x128xbf16, #tpu.memory_space<vmem>>, vector<1x128x128xbf16>
    %70 = vector.shape_cast %69 : vector<1x128x128xbf16> to vector<128x128xbf16>
    %71 = arith.extf %70 : vector<128x128xbf16> to vector<128x128xf32>
    %cst_41 = arith.constant dense<0.000000e+00> : vector<16x128xf32>
    %72 = tpu.matmul %68, %71, %cst_41 {dimension_numbers = #tpu.dot_dimension_numbers<[1], [0], [0], [1], [0, 0, 1, 1], [], []>} : vector<16x128xf32>, vector<128x128xf32>, vector<16x128xf32> -> vector<16x128xf32>
    %73 = arith.addf %66, %72 : vector<16x128xf32>
    %c0_42 = arith.constant 0 : index
    %c0_43 = arith.constant 0 : index
    %74 = vector.load %arg5[%c0_42, %c0_43] : memref<1x128xf32, #tpu.memory_space<vmem>>, vector<1x128xf32>
    %75 = vector.broadcast %74 : vector<1x128xf32> to vector<16x128xf32>
    %76 = arith.addf %73, %75 : vector<16x128xf32>
    %cst_44 = arith.constant 0.000000e+00 : f32
    %77 = vector.broadcast %cst_44 : f32 to vector<16x128xf32>
    %78 = arith.maximumf %76, %77 : vector<16x128xf32>
    %79 = vector.shape_cast %78 : vector<16x128xf32> to vector<2x8x128xf32>
    %cst_45 = arith.constant 0.000000e+00 : f32
    %80 = vector.broadcast %cst_45 : f32 to vector<2x1024xf32>
    %81 = vector.extract_strided_slice %79 {offsets = [0, 0, 0], sizes = [2, 1, 128], strides = [1, 1, 1]} : vector<2x8x128xf32> to vector<2x1x128xf32>
    %82 = vector.shape_cast %81 : vector<2x1x128xf32> to vector<2x128xf32>
    %c0_46 = arith.constant 0 : index
    %c0_47 = arith.constant 0 : index
    %c0_48 = arith.constant 0 : index
    %83 = vector.load %arg6[%c0_46, %c0_47, %c0_48] : memref<8x128x1024xbf16, #tpu.memory_space<vmem>>, vector<1x128x1024xbf16>
    %84 = vector.shape_cast %83 : vector<1x128x1024xbf16> to vector<128x1024xbf16>
    %85 = arith.extf %84 : vector<128x1024xbf16> to vector<128x1024xf32>
    %cst_49 = arith.constant dense<0.000000e+00> : vector<2x1024xf32>
    %86 = tpu.matmul %82, %85, %cst_49 {dimension_numbers = #tpu.dot_dimension_numbers<[1], [0], [0], [1], [0, 0, 1, 1], [], []>} : vector<2x128xf32>, vector<128x1024xf32>, vector<2x1024xf32> -> vector<2x1024xf32>
    %87 = arith.addf %80, %86 : vector<2x1024xf32>
    %88 = vector.extract_strided_slice %79 {offsets = [0, 1, 0], sizes = [2, 1, 128], strides = [1, 1, 1]} : vector<2x8x128xf32> to vector<2x1x128xf32>
    %89 = vector.shape_cast %88 : vector<2x1x128xf32> to vector<2x128xf32>
    %c1_50 = arith.constant 1 : index
    %c0_51 = arith.constant 0 : index
    %c0_52 = arith.constant 0 : index
    %90 = vector.load %arg6[%c1_50, %c0_51, %c0_52] : memref<8x128x1024xbf16, #tpu.memory_space<vmem>>, vector<1x128x1024xbf16>
    %91 = vector.shape_cast %90 : vector<1x128x1024xbf16> to vector<128x1024xbf16>
    %92 = arith.extf %91 : vector<128x1024xbf16> to vector<128x1024xf32>
    %cst_53 = arith.constant dense<0.000000e+00> : vector<2x1024xf32>
    %93 = tpu.matmul %89, %92, %cst_53 {dimension_numbers = #tpu.dot_dimension_numbers<[1], [0], [0], [1], [0, 0, 1, 1], [], []>} : vector<2x128xf32>, vector<128x1024xf32>, vector<2x1024xf32> -> vector<2x1024xf32>
    %94 = arith.addf %87, %93 : vector<2x1024xf32>
    %95 = vector.extract_strided_slice %79 {offsets = [0, 2, 0], sizes = [2, 1, 128], strides = [1, 1, 1]} : vector<2x8x128xf32> to vector<2x1x128xf32>
    %96 = vector.shape_cast %95 : vector<2x1x128xf32> to vector<2x128xf32>
    %c2_54 = arith.constant 2 : index
    %c0_55 = arith.constant 0 : index
    %c0_56 = arith.constant 0 : index
    %97 = vector.load %arg6[%c2_54, %c0_55, %c0_56] : memref<8x128x1024xbf16, #tpu.memory_space<vmem>>, vector<1x128x1024xbf16>
    %98 = vector.shape_cast %97 : vector<1x128x1024xbf16> to vector<128x1024xbf16>
    %99 = arith.extf %98 : vector<128x1024xbf16> to vector<128x1024xf32>
    %cst_57 = arith.constant dense<0.000000e+00> : vector<2x1024xf32>
    %100 = tpu.matmul %96, %99, %cst_57 {dimension_numbers = #tpu.dot_dimension_numbers<[1], [0], [0], [1], [0, 0, 1, 1], [], []>} : vector<2x128xf32>, vector<128x1024xf32>, vector<2x1024xf32> -> vector<2x1024xf32>
    %101 = arith.addf %94, %100 : vector<2x1024xf32>
    %102 = vector.extract_strided_slice %79 {offsets = [0, 3, 0], sizes = [2, 1, 128], strides = [1, 1, 1]} : vector<2x8x128xf32> to vector<2x1x128xf32>
    %103 = vector.shape_cast %102 : vector<2x1x128xf32> to vector<2x128xf32>
    %c3_58 = arith.constant 3 : index
    %c0_59 = arith.constant 0 : index
    %c0_60 = arith.constant 0 : index
    %104 = vector.load %arg6[%c3_58, %c0_59, %c0_60] : memref<8x128x1024xbf16, #tpu.memory_space<vmem>>, vector<1x128x1024xbf16>
    %105 = vector.shape_cast %104 : vector<1x128x1024xbf16> to vector<128x1024xbf16>
    %106 = arith.extf %105 : vector<128x1024xbf16> to vector<128x1024xf32>
    %cst_61 = arith.constant dense<0.000000e+00> : vector<2x1024xf32>
    %107 = tpu.matmul %103, %106, %cst_61 {dimension_numbers = #tpu.dot_dimension_numbers<[1], [0], [0], [1], [0, 0, 1, 1], [], []>} : vector<2x128xf32>, vector<128x1024xf32>, vector<2x1024xf32> -> vector<2x1024xf32>
    %108 = arith.addf %101, %107 : vector<2x1024xf32>
    %109 = vector.extract_strided_slice %79 {offsets = [0, 4, 0], sizes = [2, 1, 128], strides = [1, 1, 1]} : vector<2x8x128xf32> to vector<2x1x128xf32>
    %110 = vector.shape_cast %109 : vector<2x1x128xf32> to vector<2x128xf32>
    %c4_62 = arith.constant 4 : index
    %c0_63 = arith.constant 0 : index
    %c0_64 = arith.constant 0 : index
    %111 = vector.load %arg6[%c4_62, %c0_63, %c0_64] : memref<8x128x1024xbf16, #tpu.memory_space<vmem>>, vector<1x128x1024xbf16>
    %112 = vector.shape_cast %111 : vector<1x128x1024xbf16> to vector<128x1024xbf16>
    %113 = arith.extf %112 : vector<128x1024xbf16> to vector<128x1024xf32>
    %cst_65 = arith.constant dense<0.000000e+00> : vector<2x1024xf32>
    %114 = tpu.matmul %110, %113, %cst_65 {dimension_numbers = #tpu.dot_dimension_numbers<[1], [0], [0], [1], [0, 0, 1, 1], [], []>} : vector<2x128xf32>, vector<128x1024xf32>, vector<2x1024xf32> -> vector<2x1024xf32>
    %115 = arith.addf %108, %114 : vector<2x1024xf32>
    %116 = vector.extract_strided_slice %79 {offsets = [0, 5, 0], sizes = [2, 1, 128], strides = [1, 1, 1]} : vector<2x8x128xf32> to vector<2x1x128xf32>
    %117 = vector.shape_cast %116 : vector<2x1x128xf32> to vector<2x128xf32>
    %c5 = arith.constant 5 : index
    %c0_66 = arith.constant 0 : index
    %c0_67 = arith.constant 0 : index
    %118 = vector.load %arg6[%c5, %c0_66, %c0_67] : memref<8x128x1024xbf16, #tpu.memory_space<vmem>>, vector<1x128x1024xbf16>
    %119 = vector.shape_cast %118 : vector<1x128x1024xbf16> to vector<128x1024xbf16>
    %120 = arith.extf %119 : vector<128x1024xbf16> to vector<128x1024xf32>
    %cst_68 = arith.constant dense<0.000000e+00> : vector<2x1024xf32>
    %121 = tpu.matmul %117, %120, %cst_68 {dimension_numbers = #tpu.dot_dimension_numbers<[1], [0], [0], [1], [0, 0, 1, 1], [], []>} : vector<2x128xf32>, vector<128x1024xf32>, vector<2x1024xf32> -> vector<2x1024xf32>
    %122 = arith.addf %115, %121 : vector<2x1024xf32>
    %123 = vector.extract_strided_slice %79 {offsets = [0, 6, 0], sizes = [2, 1, 128], strides = [1, 1, 1]} : vector<2x8x128xf32> to vector<2x1x128xf32>
    %124 = vector.shape_cast %123 : vector<2x1x128xf32> to vector<2x128xf32>
    %c6 = arith.constant 6 : index
    %c0_69 = arith.constant 0 : index
    %c0_70 = arith.constant 0 : index
    %125 = vector.load %arg6[%c6, %c0_69, %c0_70] : memref<8x128x1024xbf16, #tpu.memory_space<vmem>>, vector<1x128x1024xbf16>
    %126 = vector.shape_cast %125 : vector<1x128x1024xbf16> to vector<128x1024xbf16>
    %127 = arith.extf %126 : vector<128x1024xbf16> to vector<128x1024xf32>
    %cst_71 = arith.constant dense<0.000000e+00> : vector<2x1024xf32>
    %128 = tpu.matmul %124, %127, %cst_71 {dimension_numbers = #tpu.dot_dimension_numbers<[1], [0], [0], [1], [0, 0, 1, 1], [], []>} : vector<2x128xf32>, vector<128x1024xf32>, vector<2x1024xf32> -> vector<2x1024xf32>
    %129 = arith.addf %122, %128 : vector<2x1024xf32>
    %130 = vector.extract_strided_slice %79 {offsets = [0, 7, 0], sizes = [2, 1, 128], strides = [1, 1, 1]} : vector<2x8x128xf32> to vector<2x1x128xf32>
    %131 = vector.shape_cast %130 : vector<2x1x128xf32> to vector<2x128xf32>
    %c7 = arith.constant 7 : index
    %c0_72 = arith.constant 0 : index
    %c0_73 = arith.constant 0 : index
    %132 = vector.load %arg6[%c7, %c0_72, %c0_73] : memref<8x128x1024xbf16, #tpu.memory_space<vmem>>, vector<1x128x1024xbf16>
    %133 = vector.shape_cast %132 : vector<1x128x1024xbf16> to vector<128x1024xbf16>
    %134 = arith.extf %133 : vector<128x1024xbf16> to vector<128x1024xf32>
    %cst_74 = arith.constant dense<0.000000e+00> : vector<2x1024xf32>
    %135 = tpu.matmul %131, %134, %cst_74 {dimension_numbers = #tpu.dot_dimension_numbers<[1], [0], [0], [1], [0, 0, 1, 1], [], []>} : vector<2x128xf32>, vector<128x1024xf32>, vector<2x1024xf32> -> vector<2x1024xf32>
    %136 = arith.addf %129, %135 : vector<2x1024xf32>
    %c0_75 = arith.constant 0 : index
    %c0_76 = arith.constant 0 : index
    %137 = vector.load %arg7[%c0_75, %c0_76] : memref<1x1024xf32, #tpu.memory_space<vmem>>, vector<1x1024xf32>
    %138 = vector.broadcast %137 : vector<1x1024xf32> to vector<2x1024xf32>
    %139 = arith.addf %136, %138 : vector<2x1024xf32>
    %cst_77 = arith.constant 0.000000e+00 : f32
    %140 = vector.broadcast %cst_77 : f32 to vector<2x1024xf32>
    %141 = arith.maximumf %139, %140 : vector<2x1024xf32>
    %142 = vector.extract_strided_slice %141 {offsets = [0, 0], sizes = [2, 512], strides = [1, 1]} : vector<2x1024xf32> to vector<2x512xf32>
    %143 = vector.extract_strided_slice %141 {offsets = [0, 512], sizes = [2, 512], strides = [1, 1]} : vector<2x1024xf32> to vector<2x512xf32>
    %c0_78 = arith.constant 0 : index
    %c0_79 = arith.constant 0 : index
    %144 = vector.load %arg8[%c0_78, %c0_79] : memref<512x1xf32, #tpu.memory_space<vmem>>, vector<512x1xf32>
    %cst_80 = arith.constant dense<0.000000e+00> : vector<2x1xf32>
    %145 = tpu.matmul %142, %144, %cst_80 {dimension_numbers = #tpu.dot_dimension_numbers<[1], [0], [0], [1], [0, 0, 1, 1], [], []>} : vector<2x512xf32>, vector<512x1xf32>, vector<2x1xf32> -> vector<2x1xf32>
    %c0_81 = arith.constant 0 : index
    %c0_82 = arith.constant 0 : index
    %146 = vector.load %arg9[%c0_81, %c0_82] : memref<1x1xf32, #tpu.memory_space<vmem>>, vector<1x1xf32>
    %147 = vector.broadcast %146 : vector<1x1xf32> to vector<2x1xf32>
    %148 = arith.addf %145, %147 : vector<2x1xf32>
    %c0_83 = arith.constant 0 : index
    %c0_84 = arith.constant 0 : index
    %149 = vector.load %arg10[%c0_83, %c0_84] : memref<512x8xf32, #tpu.memory_space<vmem>>, vector<512x8xf32>
    %cst_85 = arith.constant dense<0.000000e+00> : vector<2x8xf32>
    %150 = tpu.matmul %143, %149, %cst_85 {dimension_numbers = #tpu.dot_dimension_numbers<[1], [0], [0], [1], [0, 0, 1, 1], [], []>} : vector<2x512xf32>, vector<512x8xf32>, vector<2x8xf32> -> vector<2x8xf32>
    %c0_86 = arith.constant 0 : index
    %c0_87 = arith.constant 0 : index
    %151 = vector.load %arg11[%c0_86, %c0_87] : memref<1x8xf32, #tpu.memory_space<vmem>>, vector<1x8xf32>
    %152 = vector.broadcast %151 : vector<1x8xf32> to vector<2x8xf32>
    %153 = arith.addf %150, %152 : vector<2x8xf32>
    %154 = vector.broadcast %148 : vector<2x1xf32> to vector<2x8xf32>
    %155 = arith.addf %154, %153 : vector<2x8xf32>
    %cst_88 = arith.constant dense<0.000000e+00> : vector<2xf32>
    %156 = vector.multi_reduction <add>, %153, %cst_88 [1] : vector<2x8xf32> to vector<2xf32>
    %157 = vector.shape_cast %156 : vector<2xf32> to vector<2x1xf32>
    %cst_89 = arith.constant 8.000000e+00 : f32
    %158 = vector.broadcast %cst_89 : f32 to vector<2x1xf32>
    %159 = arith.divf %157, %158 : vector<2x1xf32>
    %160 = vector.broadcast %159 : vector<2x1xf32> to vector<2x8xf32>
    %161 = arith.subf %155, %160 : vector<2x8xf32>
    %c0_90 = arith.constant 0 : index
    %c0_91 = arith.constant 0 : index
    %162 = vector.load %arg12[%c0_90, %c0_91] : memref<2x8xf32, #tpu.memory_space<vmem>>, vector<2x8xf32>
    tpu.vector_store %arg12[%c0_90, %c0_91], %161 {strides = array<i32>} : memref<2x8xf32, #tpu.memory_space<vmem>>, vector<2x8xf32>,
    return
  }
  func.func @transform_0(%arg0: i32) -> (i32, i32, i32) {
    %c0_i32 = arith.constant 0 : i32
    %c0_i32_0 = arith.constant 0 : i32
    %c0_i32_1 = arith.constant 0 : i32
    return %arg0, %c0_i32, %c0_i32_0 : i32, i32, i32
  }
  func.func @transform_1(%arg0: i32) -> (i32, i32, i32) {
    %c0_i32 = arith.constant 0 : i32
    %c0_i32_0 = arith.constant 0 : i32
    %c0_i32_1 = arith.constant 0 : i32
    %c0_i32_2 = arith.constant 0 : i32
    return %c0_i32, %c0_i32_0, %c0_i32_1 : i32, i32, i32
  }
  func.func @transform_2(%arg0: i32) -> (i32, i32) {
    %c0_i32 = arith.constant 0 : i32
    %c0_i32_0 = arith.constant 0 : i32
    %c0_i32_1 = arith.constant 0 : i32
    return %c0_i32, %c0_i32_0 : i32, i32
  }
  func.func @transform_3(%arg0: i32) -> (i32, i32, i32) {
    %c0_i32 = arith.constant 0 : i32
    %c0_i32_0 = arith.constant 0 : i32
    %c0_i32_1 = arith.constant 0 : i32
    %c0_i32_2 = arith.constant 0 : i32
    return %c0_i32, %c0_i32_0, %c0_i32_1 : i32, i32, i32
  }
  func.func @transform_4(%arg0: i32) -> (i32, i32) {
    %c0_i32 = arith.constant 0 : i32
    %c0_i32_0 = arith.constant 0 : i32
    %c0_i32_1 = arith.constant 0 : i32
    return %c0_i32, %c0_i32_0 : i32, i32
  }
  func.func @transform_5(%arg0: i32) -> (i32, i32, i32) {
    %c0_i32 = arith.constant 0 : i32
    %c0_i32_0 = arith.constant 0 : i32
    %c0_i32_1 = arith.constant 0 : i32
    %c0_i32_2 = arith.constant 0 : i32
    return %c0_i32, %c0_i32_0, %c0_i32_1 : i32, i32, i32
  }
  func.func @transform_6(%arg0: i32) -> (i32, i32) {
    %c0_i32 = arith.constant 0 : i32
    %c0_i32_0 = arith.constant 0 : i32
    %c0_i32_1 = arith.constant 0 : i32
    return %c0_i32, %c0_i32_0 : i32, i32
  }
  func.func @transform_7(%arg0: i32) -> (i32, i32) {
    %c0_i32 = arith.constant 0 : i32
    %c0_i32_0 = arith.constant 0 : i32
    %c0_i32_1 = arith.constant 0 : i32
    return %c0_i32, %c0_i32_0 : i32, i32
  }
  func.func @transform_8(%arg0: i32) -> (i32, i32) {
    %c0_i32 = arith.constant 0 : i32
    %c0_i32_0 = arith.constant 0 : i32
    %c0_i32_1 = arith.constant 0 : i32
    return %c0_i32, %c0_i32_0 : i32, i32
  }
  func.func @transform_9(%arg0: i32) -> (i32, i32) {
    %c0_i32 = arith.constant 0 : i32
    %c0_i32_0 = arith.constant 0 : i32
    %c0_i32_1 = arith.constant 0 : i32
    return %c0_i32, %c0_i32_0 : i32, i32
  }
  func.func @transform_10(%arg0: i32) -> (i32, i32) {
    %c0_i32 = arith.constant 0 : i32
    %c0_i32_0 = arith.constant 0 : i32
    %c0_i32_1 = arith.constant 0 : i32
    return %c0_i32, %c0_i32_0 : i32, i32
  }
  func.func @transform_11(%arg0: i32) -> (i32, i32) {
    %c0_i32 = arith.constant 0 : i32
    %c0_i32_0 = arith.constant 0 : i32
    return %arg0, %c0_i32 : i32, i32
  }
}

</mosaic_0001>

<bundles_post_ra>
// kernel: tpu_custom_call.1
= control target key start
LH: loop header
LB: loop body
LE: loop exit
PB: predicated region body
PF: predicated region fallthrough
CT: control target
= control target key end

     0   :  { %s9538_s0 = inlined_call_operand.vmem [shape: f32[2,16,4], index: 0, kind: input, shape index: {}]   ;;  %s9539_s1 = inlined_call_operand.hbm [shape: f32[5,4,128], index: 1, kind: input, shape index: {}]   ;;  %s9540_s2 = inlined_call_operand.hbm [shape: f32[1,128], index: 2, kind: input, shape index: {}]   ;;  %s9541_s3 = inlined_call_operand.hbm [shape: bf16[5,128,128], index: 3, kind: input, shape index: {}]   ;;  %s9542_s4 = inlined_call_operand.hbm [shape: f32[1,128], index: 4, kind: input, shape index: {}]   ;;  %s9543_s5 = inlined_call_operand.hbm [shape: bf16[8,128,1024], index: 5, kind: input, shape index: {}]   ;;  %s9544_s6 = inlined_call_operand.hbm [shape: f32[1,1024], index: 6, kind: input, shape index: {}]   ;;  %s9545_s7 = inlined_call_operand.vmem [shape: f32[512,1], index: 7, kind: input, shape index: {}]   ;;  %s9546_s8 = inlined_call_operand.<no memory space> [shape: f32[1,1], index: 8, kind: input, shape index: {}]   ;;  %s9547_s9 = inlined_call_operand.vmem [shape: f32[512,8], index: 9, kind: input, shape index: {}]   ;;  %s9548_s10 = inlined_call_operand.hbm [shape: f32[1,8], index: 10, kind: input, shape index: {}]   ;;  %s9549_s11 = inlined_call_operand.hbm [shape: f32[2,8], index: 11, kind: output, shape index: {}]  }
   0x1   :  { %v16_v0 = vstv %s9546_s8 }
   0x2   :  { %17 = vst [vmem:[#allocation2] sm:$0x1] %v16_v0 }
   0x3   :  { %18 = vsyncpa [#allocation4], 0 }
   0x4   :  { %19 = vsyncpa [#allocation7], 0 }
   0x5   :  { %20 = vsyncpa [#allocation10], 0 }
   0x6   :  { %21 = vsyncpa [#allocation13], 0 }
   0x7   :  { %22 = vsyncpa [#allocation5], 0  ;;  %s8542_s19 = smov [#allocation6]   ;;  %s8543_s21 = smov [#allocation9]  }
   0x8   :  { %s43_s20 = sshll.u32 %s8542_s19, 4  ;;  %s65_s22 = sshll.u32 %s8543_s21, 4  ;;  %s44_s20 = int_to_ptr.vmem [resolvable:$true] %s43_s20  ;;  %s66_s22 = int_to_ptr.vmem [resolvable:$true] %s65_s22 }
   0x9   :  { %s8356_s25 = scalar_lea.hbm %s9540_s2, 16 }
   0xa   :  { %p8357_p0 = scmp.ne.s32.totalorder %s9540_s2, %s8356_s25  ;;  %p8360_p1 = scmp.lt.u32.totalorder %s8356_s25, %s9540_s2 }
   0xc   :  { %p8362_p2 = pnand %p8360_p1, %p8357_p0 }
   0xe   :  { %8365 = shalt.err (!%p8362_p2)
}
   0xf   :  { %s8366_s29 = scalar_lea.vmem %s44_s20, 16  ;;  %s8370_s30 = scalar_lea.vmem %s44_s20, 32 }
  0x10   :  { %p8367_p3 = scmp.ne.s32.totalorder %s44_s20, %s8366_s29  ;;  %p8371_p4 = scmp.lt.s32.totalorder %s44_s20, %s44_s20 }
  0x11   :  { %p8372_p5 = scmp.lt.s32.totalorder %s8370_s30, %s8366_s29 }
  0x13   :  { %p8373_p6 = por %p8372_p5, %p8371_p4 }
  0x15   :  { %p8374_p7 = pnand %p8373_p6, %p8367_p3 }
  0x17   :  { %8377 = shalt.err (!%p8374_p7)
}
  0x18   :  { %46 = dma.hbm_to_vmem [thread:$0]  %s9540_s2, 16, %s44_s20, [#allocation7]  }
  0x19   :  { %s8378_s16 = scalar_lea.hbm %s9542_s4, 16 }
  0x1a   :  { %p8379_p8 = scmp.ne.s32.totalorder %s9542_s4, %s8378_s16  ;;  %p8382_p9 = scmp.lt.u32.totalorder %s8378_s16, %s9542_s4 }
  0x1c   :  { %p8384_p10 = pnand %p8382_p9, %p8379_p8 }
  0x1e   :  { %8387 = shalt.err (!%p8384_p10)
}
  0x1f   :  { %s8388_s23 = scalar_lea.vmem %s66_s22, 16  ;;  %s8392_s24 = scalar_lea.vmem %s66_s22, 32 }
  0x20   :  { %p8389_p11 = scmp.ne.s32.totalorder %s66_s22, %s8388_s23  ;;  %p8393_p12 = scmp.lt.s32.totalorder %s66_s22, %s66_s22 }
  0x21   :  { %p8394_p13 = scmp.lt.s32.totalorder %s8392_s24, %s8388_s23 }
  0x23   :  { %p8395_p0 = por %p8394_p13, %p8393_p12 }
  0x25   :  { %p8396_p1 = pnand %p8395_p0, %p8389_p11 }
  0x27   :  { %8399 = shalt.err (!%p8396_p1)
}
  0x28   :  { %68 = dma.hbm_to_vmem [thread:$0]  %s9542_s4, 16, %s66_s22, [#allocation10]  }
  0x29   :  { %s8544_s25 = smov [#allocation12]   ;;  %s8545_s27 = smov [#allocation3]  }
  0x2a   :  { %s87_s26 = sshll.u32 %s8544_s25, 4  ;;  %s30_s8 = sshll.u32 %s8545_s27, 4  ;;  %s88_s26 = int_to_ptr.vmem [resolvable:$true] %s87_s26  ;;  %s8644_s8 = int_to_ptr.vmem [resolvable:$true] %s30_s8 }
  0x2b   :  { %s8400_s30 = scalar_lea.hbm %s9544_s6, 128 }
  0x2c   :  { %p8401_p2 = scmp.ne.s32.totalorder %s9544_s6, %s8400_s30  ;;  %p8404_p3 = scmp.lt.u32.totalorder %s8400_s30, %s9544_s6 }
  0x2e   :  { %p8406_p4 = pnand %p8404_p3, %p8401_p2 }
  0x30   :  { %8409 = shalt.err (!%p8406_p4)
}
  0x31   :  { %s8410_s4 = scalar_lea.vmem %s88_s26, 128  ;;  %p8415_p6 = scmp.lt.s32.totalorder %s88_s26, %s88_s26 }
  0x32   :  { %p8411_p5 = scmp.ne.s32.totalorder %s88_s26, %s8410_s4  ;;  %p8416_p7 = scmp.lt.s32.totalorder %s8410_s4, %s8410_s4 }
  0x34   :  { %p8417_p8 = por %p8416_p7, %p8415_p6 }
  0x36   :  { %p8418_p9 = pnand %p8417_p8, %p8411_p5 }
  0x38   :  { %8421 = shalt.err (!%p8418_p9)
}
  0x39   :  { %90 = dma.hbm_to_vmem [thread:$0]  %s9544_s6, 128, %s88_s26, [#allocation13]  }
  0x3a   :  { %s8422_s19 = scalar_lea.hbm %s9539_s1, 320 }
  0x3b   :  { %p8423_p10 = scmp.ne.s32.totalorder %s9539_s1, %s8422_s19  ;;  %p8426_p11 = scmp.lt.u32.totalorder %s8422_s19, %s9539_s1 }
  0x3d   :  { %p8428_p12 = pnand %p8426_p11, %p8423_p10 }
  0x3f   :  { %8431 = shalt.err (!%p8428_p12)
}
  0x40   :  { %s8432_s20 = scalar_lea.vmem %s8644_s8, 320  ;;  %p8437_p0 = scmp.lt.s32.totalorder %s8644_s8, %s8644_s8 }
  0x41   :  { %p8433_p13 = scmp.ne.s32.totalorder %s8644_s8, %s8432_s20  ;;  %p8438_p1 = scmp.lt.s32.totalorder %s8432_s20, %s8432_s20 }
  0x43   :  { %p8439_p2 = por %p8438_p1, %p8437_p0 }
  0x45   :  { %p8440_p3 = pnand %p8439_p2, %p8433_p13 }
  0x47   :  { %8443 = shalt.err (!%p8440_p3)
}
  0x48   :  { %s8546_s6 = smov 64   ;;  %s8547_s25 = smov 4  }
  0x49   :  { %36 = dma.hbm_to_vmem [thread:$0]  %s9539_s1, 320, %s8644_s8, [#allocation4], %s8546_s6, %s8546_s6, %s8547_s25  }
  0x4a   :  { %s8548_s28 = smov [#allocation8]   ;;  %s8549_s30 = smov [#allocation11]  }
  0x4b   :  { %s52_s29 = sshll.u32 %s8548_s28, 4  ;;  %s74_s12 = sshll.u32 %s8549_s30, 4  ;;  %s53_s29 = int_to_ptr.vmem [resolvable:$true] %s52_s29  ;;  %s8675_s12 = int_to_ptr.vmem [resolvable:$true] %s74_s12 }
  0x4c   :  { %s8444_s15 = scalar_lea.hbm %s9541_s3, 5120 }
  0x4d   :  { %p8445_p4 = scmp.ne.s32.totalorder %s9541_s3, %s8444_s15  ;;  %p8448_p5 = scmp.lt.u32.totalorder %s8444_s15, %s9541_s3 }
  0x4f   :  { %p8450_p6 = pnand %p8448_p5, %p8445_p4 }
  0x51   :  { %8453 = shalt.err (!%p8450_p6)
}
  0x52   :  { %s8454_s1 = scalar_lea.vmem %s53_s29, 5120  ;;  %p8459_p8 = scmp.lt.s32.totalorder %s53_s29, %s53_s29 }
  0x53   :  { %p8455_p7 = scmp.ne.s32.totalorder %s53_s29, %s8454_s1  ;;  %p8460_p9 = scmp.lt.s32.totalorder %s8454_s1, %s8454_s1 }
  0x55   :  { %p8461_p10 = por %p8460_p9, %p8459_p8 }
  0x57   :  { %p8462_p11 = pnand %p8461_p10, %p8455_p7 }
  0x59   :  { %8465 = shalt.err (!%p8462_p11)
}
  0x5a   :  { %58 = dma.hbm_to_vmem [thread:$0]  %s9541_s3, 5120, %s53_s29, [#allocation7], %s8546_s6, %s8546_s6, %s8547_s25  }
  0x5b   :  { %s8466_s23 = scalar_lea.hbm %s9543_s5, 65536 }
  0x5c   :  { %p8467_p12 = scmp.ne.s32.totalorder %s9543_s5, %s8466_s23  ;;  %p8470_p13 = scmp.lt.u32.totalorder %s8466_s23, %s9543_s5 }
  0x5e   :  { %p8472_p0 = pnand %p8470_p13, %p8467_p12 }
  0x60   :  { %8475 = shalt.err (!%p8472_p0)
}
  0x61   :  { %s8476_s27 = scalar_lea.vmem %s8675_s12, 65536  ;;  %p8481_p2 = scmp.lt.s32.totalorder %s8675_s12, %s8675_s12 }
  0x62   :  { %p8477_p1 = scmp.ne.s32.totalorder %s8675_s12, %s8476_s27  ;;  %p8482_p3 = scmp.lt.s32.totalorder %s8476_s27, %s8476_s27 }
  0x64   :  { %p8483_p4 = por %p8482_p3, %p8481_p2 }
  0x66   :  { %p8484_p5 = pnand %p8483_p4, %p8477_p1 }
  0x68   :  { %8487 = shalt.err (!%p8484_p5)
}
  0x69   :  { %s8550_s3 = smov 512   ;;  %s8551_s6 = smov 32  }
  0x6a   :  { %80 = dma.hbm_to_vmem [thread:$0]  %s9543_s5, 65536, %s8675_s12, [#allocation10], %s8550_s3, %s8550_s3, %s8551_s6  }
  0x6b   :  { %s8552_s29 = smov [#allocation14]   ;;  %s8488_s15 = scalar_lea.hbm %s9548_s10, 16 }
  0x6c   :  { %s103_s30 = sshll.u32 %s8552_s29, 4  ;;  %p8489_p6 = scmp.ne.s32.totalorder %s9548_s10, %s8488_s15  ;;  %s104_s30 = int_to_ptr.vmem [resolvable:$true] %s103_s30 }
  0x6d   :  { %p8492_p7 = scmp.lt.u32.totalorder %s8488_s15, %s9548_s10 }
  0x6f   :  { %p8494_p8 = pnand %p8492_p7, %p8489_p6 }
  0x71   :  { %8497 = shalt.err (!%p8494_p8)
}
  0x72   :  { %s8498_s1 = scalar_lea.vmem %s104_s30, 16  ;;  %s8502_s5 = scalar_lea.vmem %s104_s30, 32 }
  0x73   :  { %p8499_p9 = scmp.ne.s32.totalorder %s104_s30, %s8498_s1  ;;  %p8503_p10 = scmp.lt.s32.totalorder %s104_s30, %s104_s30 }
  0x74   :  { %p8504_p11 = scmp.lt.s32.totalorder %s8502_s5, %s8498_s1 }
  0x76   :  { %p8505_p12 = por %p8504_p11, %p8503_p10 }
  0x78   :  { %p8506_p13 = pnand %p8505_p12, %p8499_p9 }
  0x7a   :  { %8509 = shalt.err (!%p8506_p13)
}
  0x7b   :  { %106 = dma.hbm_to_vmem [thread:$0]  %s9548_s10, 16, %s104_s30, [#allocation13]  }
  0x7c   :  { %8532 = dma.done.wait [#allocation4], 320  }
  0x7d   :  { %8533 = vsyncadd [#allocation4], 4294966976 }
  0x7e   :  { %8534 = dma.done.wait [#allocation7], 5136  }
  0x7f   :  { %8535 = vsyncadd [#allocation7], 4294962160 }
  0x80   :  { %8536 = dma.done.wait [#allocation10], 65552  }
  0x81   :  { %8537 = vsyncadd [#allocation10], 4294901744 }
  0x82   :  { %8538 = dma.done.wait [#allocation13], 144  }
  0x83   :  { %8539 = vsyncadd [#allocation13], 4294967152  ;;  %v8553_v1 = vmov 0.0   ;;  %vm8554_vm0 = vmmov 0   ;;  %vm176_vm1 = vcmask 1043456   ;;  %vm141_vm2 = vcmask 1042432  }
  0x84   :  { %6216 = vmatprep.subr.mxu1 %v8553_v1  ;;  %6218 = vmatprep.mubr.msk.f32.mxu1 %vm8554_vm0, %v8553_v1  ;;  %vm142_vm3 = vcmask 1046532   ;;  %v165_v2 = vld [vmem:[#allocation3 + $0x4] sm:$0xf]  ;;  %v8744_v8 = vld [vmem:[%s9538_s0 + $0x10] sm:$0xff]  ;;  %v8753_v10 = vld [vmem:[%s9538_s0 + $0x18] sm:$0xff]  ;;  %vm169_vm5 = vcmask 31744  }
  0x85   :  { %6260 = vmatprep.subr.mxu0 %v8553_v1  ;;  %6262 = vmatprep.mubr.msk.f32.mxu0 %vm8554_vm0, %v8553_v1  ;;  %v8727_v3 = vld [vmem:[%s9538_s0] sm:$0xff]  ;;  %v8732_v4 = vld [vmem:[%s9538_s0 + $0x8] sm:$0xff]  ;;  %vm8756_vm4 = vmor %vm141_vm2, %vm142_vm3  ;;  %v8762_v12 = vcombine.high %v8744_v8, %v8744_v8  ;;  %v8766_v13 = vcombine.high %v8753_v10, %v8753_v10  ;;  %v159_v14 = vrot.slane %v8753_v10, 5  ;;  %v5735_v18 = vrot.slane %v8744_v8, 9 }
  0x86   :  { %6217 = vmatpush3.msk.msra.mxu1 %vm176_vm1, %v165_v2  ;;  %v8737_v5 = vcombine.high %v8727_v3, %v8727_v3  ;;  %v5734_v6 = vrot.slane %v8727_v3, 9  ;;  %v149_v7 = vrot.slane %v8732_v4, 5  ;;  %v8748_v9 = vcombine.high %v8732_v4, %v8732_v4  ;;  %v593_v19 = vld [vmem:[#allocation3 + $0x10] sm:$0xf]  ;;  %v138_v30 = vld [vmem:[#allocation3] sm:$0xf] }
  0x87   :  { %6227 = vmatprep.subr.mxu1 %v8553_v1  ;;  %v156_v20 = vrot.slane %v8762_v12, 5  ;;  %6261 = vmatpush3.msk.msra.mxu0 %vm176_vm1, %v593_v19  ;;  %v161_v23 = vrot.slane %v159_v14, 4  ;;  %v162_v24 = vrot.slane %v8766_v13, 5  ;;  %v5756_v36 = vcombine.high %v8732_v4, %v8744_v8  ;;  %v376_v39 = vld [vmem:[#allocation3 + $0x8] sm:$0xf]  ;;  %v2292_v45 = vld [vmem:[#allocation11 + $0x418] sm:$0xff] }
  0x88   :  { %v146_v15 = vrot.slane %v8737_v5, 5  ;;  %v151_v16 = vrot.slane %v149_v7, 4  ;;  %v152_v17 = vrot.slane %v8748_v9, 5  ;;  %v594_v34 = vcombine.low %v8737_v5, %v8732_v4  ;;  %v496_v61 = vld [vmem:[#allocation3 + $0xc] sm:$0xf] }
  0x89   :  { %v157_v27 = vsel %vm8756_vm4, %v5735_v18, %v156_v20  ;;  %v158_v28 = vrot.slane %v156_v20, 4  ;;  %v163_v33 = vsel %vm8756_vm4, %v161_v23, %v162_v24  ;;  %v260_v37 = vcombine.low %v8727_v3, %v8737_v5 }
  0x8a   :  { %v147_v21 = vsel %vm8756_vm4, %v5734_v6, %v146_v15  ;;  %v148_v22 = vrot.slane %v146_v15, 4  ;;  %v153_v26 = vsel %vm8756_vm4, %v151_v16, %v152_v17  ;;  %6263 = vmatmul.mubr.msk.f32.vlgmr.msra.gmra.mrb[0].mxu0 %vm169_vm5, %v594_v34  ;;  %v357_v38 = vrot.slane %v8737_v5, 6 }
  0x8b   :  { %v167_v31 = vcombine.low %v153_v26, %v157_v27  ;;  %v160_v32 = vsel %vm8756_vm4, %v158_v28, %v159_v14  ;;  %6265 = vmatprep.mubr.msk.f32.mxu0 %vm8554_vm0, %v8553_v1  ;;  %v596_v40 = vcombine.low %v8753_v10, %v8766_v13  ;;  %vm352_vm6 = vcmask 1041408   ;;  %v5938_v26 = vld [vmem:[#allocation8 + $0x48] sm:$0xff]   ;;  %v5939_v27 = vld [vmem:[#allocation8 + $0x50] sm:$0xff]   ;;  %v5940_v28 = vld [vmem:[#allocation8 + $0x58] sm:$0xff]  }
  0x8c   :  { %v150_v25 = vsel %vm8756_vm4, %v148_v22, %v149_v7  ;;  %v168_v35 = vcombine.low %v160_v32, %v163_v33  ;;  %vm353_vm7 = vcmask 1045508   ;;  %v261_v41 = vcombine.low %v8732_v4, %v8744_v8  ;;  %v5944_v32 = vld [vmem:[#allocation8 + $0x78] sm:$0xff]   ;;  %v8894_v33 = vld [vmem:[#allocation8] sm:$0xff]  }
  0x8d   :  { %v166_v29 = vcombine.low %v147_v21, %v150_v25  ;;  %v5744_v42 = vrot.slane %v8727_v3, 10  ;;  %v359_v43 = vrot.slane %v357_v38, 4  ;;  %v360_v44 = vrot.slane %v8732_v4, 6  ;;  %vm8822_vm8 = vmor %vm352_vm6, %vm353_vm7 }
  0x8e   :  { %6266 = vmatmul.mubr.msk.f32.gmra.mrb[2].mxu0 %vm169_vm5, %v5756_v36  ;;  %v262_v46 = vcombine.low %v8762_v12, %v8753_v10  ;;  %v363_v48 = vrot.slane %v8748_v9, 6  ;;  %v5745_v49 = vrot.slane %v8744_v8, 10  ;;  %v367_v52 = vrot.slane %v8762_v12, 6 }
  0x8f   :  { %6219 = vmatmul.mubr.msk.f32.vlgmr.msra.gmra.mrb[0].mxu1 %vm169_vm5, %v166_v29  ;;  %6268 = vmatprep.mubr.msk.f32.mxu0 %vm8554_vm0, %v8553_v1  ;;  %v362_v47 = vrot.slane %v360_v44, 4  ;;  %v358_v50 = vsel %vm8822_vm8, %v5744_v42, %v357_v38  ;;  %v361_v51 = vsel %vm8822_vm8, %v359_v43, %v360_v44  ;;  %v370_v53 = vrot.slane %v8753_v10, 6  ;;  %v5941_v29 = vld [vmem:[#allocation8 + $0x60] sm:$0xff]  }
  0x90   :  { %6228 = vmatpush3.msk.msra.mxu1 %vm176_vm1, %v138_v30  ;;  %6221 = vmatprep.mubr.msk.f32.mxu1 %vm8554_vm0, %v8553_v1  ;;  %v377_v54 = vcombine.low %v358_v50, %v361_v51  ;;  %v373_v56 = vrot.slane %v8766_v13, 6  ;;  %v368_v57 = vsel %vm8822_vm8, %v5745_v49, %v367_v52  ;;  %v369_v58 = vrot.slane %v367_v52, 4  ;;  %v5942_v30 = vld [vmem:[#allocation8 + $0x68] sm:$0xff]  }
  0x91   :  { %6238 = vmatprep.subr.mxu1 %v8553_v1  ;;  %v364_v55 = vsel %vm8822_vm8, %v362_v47, %v363_v48  ;;  %v372_v59 = vrot.slane %v370_v53, 4  ;;  %v477_v60 = vrot.slane %v8737_v5, 7  ;;  %vm472_vm9 = vcmask 1040384  }
  0x92   :  { %6269 = vmatmul.mubr.msk.f32.gmra.mrb[4].mxu0 %vm169_vm5, %v596_v40  ;;  %vm473_vm10 = vcmask 1044484   ;;  %v378_v62 = vcombine.low %v364_v55, %v368_v57  ;;  %v5750_v63 = vrot.slane %v8727_v3, 11  ;;  %v371_v0 = vsel %vm8822_vm8, %v369_v58, %v370_v53 }
  0x93   :  { %6222 = vmatmul.mubr.msk.f32.gmra.mrb[2].mxu1 %vm169_vm5, %v167_v31  ;;  %2762 = vmatprep.mubr.f32.mxu0 %v8553_v1  ;;  %v374_v2 = vsel %vm8822_vm8, %v372_v59, %v373_v56  ;;  %vm8859_vm11 = vmor %vm472_vm9, %vm473_vm10  ;;  %v479_v6 = vrot.slane %v477_v60, 4  ;;  %v480_v7 = vrot.slane %v8732_v4, 7  ;;  %v483_v16 = vrot.slane %v8748_v9, 7  ;;  %v5943_v31 = vld [vmem:[#allocation8 + $0x70] sm:$0xff]  }
  0x94   :  { %6224 = vmatprep.mubr.msk.f32.mxu1 %vm8554_vm0, %v8553_v1  ;;  %v379_v3 = vcombine.low %v371_v0, %v374_v2  ;;  %v478_v14 = vsel %vm8859_vm11, %v5750_v63, %v477_v60  ;;  %v5751_v18 = vrot.slane %v8744_v8, 11  ;;  %v487_v19 = vrot.slane %v8762_v12, 7 }
  0x95   :  { %v482_v15 = vrot.slane %v480_v7, 4  ;;  %v481_v17 = vsel %vm8859_vm11, %v479_v6, %v480_v7  ;;  %v490_v4 = vrot.slane %v8753_v10, 7  ;;  %v493_v8 = vrot.slane %v8766_v13, 7  ;;  %v5804_v13 = vld [vmem:[#allocation8 + $0x40] sm:$0xff]  }
  0x96   :  { %v497_v20 = vcombine.low %v478_v14, %v481_v17  ;;  %v488_v9 = vsel %vm8859_vm11, %v5751_v18, %v487_v19  ;;  %v489_v22 = vrot.slane %v487_v19, 4  ;;  %vm1714_vm12 = vcmask 1041409  }
  0x97   :  { %6225 = vmatmul.mubr.msk.f32.gmra.mrb[4].mxu1 %vm169_vm5, %v168_v35  ;;  %v484_v21 = vsel %vm8859_vm11, %v482_v15, %v483_v16  ;;  %v492_v23 = vrot.slane %v490_v4, 4  ;;  %vm5708_vm13 = vcmask 58368  }
  0x98   :  { %6229 = vmatprep.mubr.msk.f32.mxu1 %vm8554_vm0, %v8553_v1  ;;  %v498_v12 = vcombine.low %v484_v21, %v488_v9  ;;  %v491_v10 = vsel %vm8859_vm11, %v489_v22, %v490_v4 }
  0x99   :  { %v494_v24 = vsel %vm8859_vm11, %v492_v23, %v493_v8 }
  0x9a   :  { %v499_v25 = vcombine.low %v491_v10, %v494_v24 }
  0x9b   :  { %6230 = vmatmul.mubr.msk.f32.vlgmr.msra.gmra.mrb[6].mxu1 %vm169_vm5, %v260_v37 }
  0x9c   :  { %6239 = vmatpush3.msk.msra.mxu1 %vm176_vm1, %v376_v39  ;;  %6232 = vmatprep.mubr.msk.f32.mxu1 %vm8554_vm0, %v8553_v1 }
  0x9d   :  { %6249 = vmatprep.subr.mxu1 %v8553_v1 }
  0x9f   :  { %6233 = vmatmul.mubr.msk.f32.gmra.mrb[8].mxu1 %vm169_vm5, %v261_v41 }
  0xa0   :  { %6235 = vmatprep.mubr.msk.f32.mxu1 %vm8554_vm0, %v8553_v1 }
  0xa3   :  { %6236 = vmatmul.mubr.msk.f32.gmra.mrb[10].mxu1 %vm169_vm5, %v262_v46 }
  0xa4   :  { %6240 = vmatprep.mubr.msk.f32.mxu1 %vm8554_vm0, %v8553_v1 }
  0xa7   :  { %6241 = vmatmul.mubr.msk.f32.vlgmr.msra.gmra.mrb[12].mxu1 %vm169_vm5, %v377_v54 }
  0xa8   :  { %6250 = vmatpush3.msk.msra.mxu1 %vm176_vm1, %v496_v61  ;;  %6243 = vmatprep.mubr.msk.f32.mxu1 %vm8554_vm0, %v8553_v1 }
  0xa9   :  { %6447 = vmatprep.subr.bf16.mxu1 %v5804_v13 }
  0xab   :  { %6244 = vmatmul.mubr.msk.f32.gmra.mrb[14].mxu1 %vm169_vm5, %v378_v62 }
  0xac   :  { %6246 = vmatprep.mubr.msk.f32.mxu1 %vm8554_vm0, %v8553_v1 }
  0xaf   :  { %6247 = vmatmul.mubr.msk.f32.gmra.mrb[16].mxu1 %vm169_vm5, %v379_v3  ;;  %v5761_v3 = vld [vmem:[#allocation6] ss:$0 sm:$0xff] }
  0xb0   :  { %6251 = vmatprep.mubr.msk.f32.mxu1 %vm8554_vm0, %v8553_v1 }
  0xb3   :  { %6252 = vmatmul.mubr.msk.f32.vlgmr.msra.gmra.mrb[18].mxu1 %vm169_vm5, %v497_v20 }
  0xb4   :  { %6254 = vmatprep.mubr.msk.f32.mxu1 %vm8554_vm0, %v8553_v1  ;;  %6449 = vmatpush3.bf16.msra.mxu1 %v5804_v13 }
  0xb5   :  { %6451 = vmatprep.subr.bf16.mxu1 %v5938_v26 }
  0xb7   :  { %6255 = vmatmul.mubr.msk.f32.gmra.mrb[20].mxu1 %vm169_vm5, %v498_v12 }
  0xb8   :  { %6257 = vmatprep.mubr.msk.f32.mxu1 %vm8554_vm0, %v8553_v1  ;;  %6453 = vmatpush3.bf16.msra.mxu1 %v5938_v26 }
  0xb9   :  { %6455 = vmatprep.subr.bf16.mxu1 %v5939_v27 }
  0xbb   :  { %6258 = vmatmul.mubr.msk.f32.gmra.mrb[22].mxu1 %vm169_vm5, %v499_v25 }
  0xbc   :  { %6457 = vmatpush3.bf16.msra.mxu1 %v5939_v27 }
  0xbd   :  { %6459 = vmatprep.subr.bf16.mxu1 %v5940_v28 }
  0xc0   :  { %6461 = vmatpush3.bf16.msra.mxu1 %v5940_v28 }
  0xc1   :  { %6463 = vmatprep.subr.bf16.mxu1 %v5941_v29 }
  0xc4   :  { %6465 = vmatpush3.bf16.msra.mxu1 %v5941_v29 }
  0xc5   :  { %6467 = vmatprep.subr.bf16.mxu1 %v5942_v30 }
  0xc8   :  { %6469 = vmatpush3.bf16.msra.mxu1 %v5942_v30 }
  0xc9   :  { %6471 = vmatprep.subr.bf16.mxu1 %v5943_v31 }
  0xcc   :  { %6473 = vmatpush3.bf16.msra.mxu1 %v5943_v31 }
  0xcd   :  { %6475 = vmatprep.subr.bf16.mxu1 %v5944_v32 }
  0xd0   :  { %6477 = vmatpush3.bf16.msra.mxu1 %v5944_v32 }
  0xd1   :  { %6479 = vmatprep.subr.bf16.mxu1 %v8894_v33 }
 0x15d   :  { %v672_v38 = vpop.f32.mrb[0].mxu0 }
 0x15e   :  { %v6264_v39 = vpop.f32.mrb[1].mxu0 }
 0x161   :  { %v677_v42 = vpop.f32.mrb[2].mxu0 }
 0x162   :  { %v246_v34 = vpop.f32.mrb[0].mxu1  ;;  %v6267_v43 = vpop.f32.mrb[3].mxu0 }
 0x163   :  { %v6220_v35 = vpop.f32.mrb[1].mxu1 }
 0x165   :  { %v682_v48 = vpop.f32.mrb[4].mxu0 }
 0x166   :  { %v251_v36 = vpop.f32.mrb[2].mxu1  ;;  %v6270_v49 = vpop.f32.mrb[5].mxu0 }
 0x167   :  { %v6223_v37 = vpop.f32.mrb[3].mxu1 }
 0x16a   :  { %v256_v40 = vpop.f32.mrb[4].mxu1 }
 0x16b   :  { %v6226_v41 = vpop.f32.mrb[5].mxu1 }
 0x16e   :  { %v338_v44 = vpop.f32.mrb[6].mxu1 }
 0x16f   :  { %v339_v46 = vadd.f32 %v338_v44, %v246_v34  ;;  %v6231_v47 = vpop.f32.mrb[7].mxu1 }
 0x172   :  { %v343_v50 = vpop.f32.mrb[8].mxu1 }
 0x173   :  { %v344_v51 = vadd.f32 %v343_v50, %v251_v36  ;;  %v6234_v52 = vpop.f32.mrb[9].mxu1 }
 0x176   :  { %v348_v53 = vpop.f32.mrb[10].mxu1 }
 0x177   :  { %v349_v54 = vadd.f32 %v348_v53, %v256_v40  ;;  %v6237_v55 = vpop.f32.mrb[11].mxu1 }
 0x17a   :  { %v455_v56 = vpop.f32.mrb[12].mxu1 }
 0x17b   :  { %v469_v57 = vadd.f32 %v455_v56, %v339_v46  ;;  %v6242_v58 = vpop.f32.mrb[13].mxu1 }
 0x17e   :  { %v460_v59 = vpop.f32.mrb[14].mxu1 }
 0x17f   :  { %v470_v60 = vadd.f32 %v460_v59, %v344_v51  ;;  %v6245_v61 = vpop.f32.mrb[15].mxu1 }
 0x182   :  { %v465_v62 = vpop.f32.mrb[16].mxu1 }
 0x183   :  { %v471_v63 = vadd.f32 %v465_v62, %v349_v54  ;;  %v6248_v0 = vpop.f32.mrb[17].mxu1 }
 0x186   :  { %v575_v2 = vpop.f32.mrb[18].mxu1 }
 0x187   :  { %v589_v6 = vadd.f32 %v575_v2, %v469_v57  ;;  %v6253_v7 = vpop.f32.mrb[19].mxu1 }
 0x189   :  { %v686_v14 = vadd.f32 %v672_v38, %v589_v6 }
 0x18a   :  { %v580_v15 = vpop.f32.mrb[20].mxu1 }
 0x18b   :  { %v696_v16 = vadd.f32 %v5761_v3, %v686_v14  ;;  %v590_v17 = vadd.f32 %v580_v15, %v470_v60  ;;  %v6256_v18 = vpop.f32.mrb[21].mxu1  ;;  %v5931_v15 = vld [vmem:[#allocation8 + $0x8] sm:$0xff]  }
 0x18d   :  { %v8897_v19 = vmax.f32 %v696_v16, 0.0  ;;  %v687_v4 = vadd.f32 %v677_v42, %v590_v17 }
 0x18e   :  { %v585_v20 = vpop.f32.mrb[22].mxu1 }
 0x18f   :  { %v8901_v21 = vcombine.high %v8897_v19, %v8897_v19  ;;  %v697_v9 = vadd.f32 %v5761_v3, %v687_v4  ;;  %v591_v22 = vadd.f32 %v585_v20, %v471_v63  ;;  %v6259_v23 = vpop.f32.mrb[23].mxu1  ;;  %v5762_v10 = vrot.slane %v8897_v19, 9  ;;  %v2296_v4 = vld [vmem:[#allocation11 + $0x438] sm:$0xff] }
 0x190   :  { %v5764_v25 = vrot.slane %v8897_v19, 10  ;;  %v5766_v26 = vrot.slane %v8897_v19, 11  ;;  %v7998_v20 = vcombine.high %v2292_v45, %v2296_v4  ;;  %v5932_v23 = vld [vmem:[#allocation8 + $0x10] sm:$0xff]  }
 0x191   :  { %v8903_v8 = vmax.f32 %v697_v9, 0.0  ;;  %v688_v12 = vadd.f32 %v682_v48, %v591_v22  ;;  %v742_v24 = vrot.slane %v8901_v21, 5  ;;  %v947_v13 = vrot.slane %v8901_v21, 6  ;;  %v2300_v9 = vld [vmem:[#allocation11 + $0x458] sm:$0xff] }
 0x192   :  { %v1075_v27 = vrot.slane %v8901_v21, 7  ;;  %v866_v11 = vcombine.low %v8897_v19, %v8901_v21  ;;  %v7999_v19 = vcombine.low %v2292_v45, %v2296_v4  ;;  %v2304_v22 = vld [vmem:[#allocation11 + $0x478] sm:$0xff]  ;;  %6959 = vmatprep.subr.bf16.mxu0 %v7998_v20  ;;  %v1535_v4 = vld [vmem:[#allocation11 + $0x280] sm:$0xff] }
 0x193   :  { %v8913_v28 = vcombine.high %v8903_v8, %v8903_v8  ;;  %v698_v29 = vadd.f32 %v5761_v3, %v688_v12  ;;  %v743_v30 = vsel %vm8756_vm4, %v5762_v10, %v742_v24  ;;  %v744_v31 = vrot.slane %v742_v24, 4  ;;  %v2308_v10 = vld [vmem:[#allocation11 + $0x498] sm:$0xff]  ;;  %v1539_v20 = vld [vmem:[#allocation11 + $0x2a0] sm:$0xff] }
 0x194   :  { %v745_v32 = vrot.slane %v8903_v8, 5  ;;  %v8920_v34 = vsel %vm8822_vm8, %v5764_v25, %v947_v13  ;;  %v949_v35 = vrot.slane %v947_v13, 4  ;;  %v950_v36 = vrot.slane %v8903_v8, 6  ;;  %6961 = vmatpush1.bf16.msra.mxu0 %v7999_v19  ;;  %v5933_v24 = vld [vmem:[#allocation8 + $0x18] sm:$0xff]  }
 0x195   :  { %v8923_v37 = vmax.f32 %v698_v29, 0.0  ;;  %v5763_v38 = vrot.slane %v8913_v28, 9  ;;  %v5765_v39 = vrot.slane %v8913_v28, 10  ;;  %v8929_v40 = vsel %vm8859_vm11, %v5766_v26, %v1075_v27  ;;  %v2316_v26 = vld [vmem:[#allocation11 + $0x4d8] sm:$0xff] }
 0x196   :  { %v746_v41 = vsel %vm8756_vm4, %v744_v31, %v745_v32  ;;  %v8935_v42 = vsel %vm8822_vm8, %v949_v35, %v950_v36  ;;  %v1077_v43 = vrot.slane %v1075_v27, 4  ;;  %v1078_v44 = vrot.slane %v8903_v8, 7  ;;  %v2320_v27 = vld [vmem:[#allocation11 + $0x4f8] sm:$0xff]  ;;  %v5935_v36 = vld [vmem:[#allocation8 + $0x28] sm:$0xff]  }
 0x197   :  { %v8940_v46 = vcombine.high %v8923_v37, %v8923_v37  ;;  %v787_v47 = vcombine.low %v743_v30, %v746_v41  ;;  %v749_v48 = vrot.slane %v8923_v37, 5  ;;  %v867_v49 = vcombine.low %v8913_v28, %v8923_v37  ;;  %v5934_v29 = vld [vmem:[#allocation8 + $0x20] sm:$0xff]  }
 0x198   :  { %v992_v50 = vcombine.low %v8920_v34, %v8935_v42  ;;  %v954_v51 = vrot.slane %v8923_v37, 6  ;;  %v8950_v52 = vsel %vm8859_vm11, %v1077_v43, %v1078_v44  ;;  %v5767_v53 = vrot.slane %v8913_v28, 11  ;;  %v2324_v32 = vld [vmem:[#allocation11 + $0x518] sm:$0xff]  ;;  %v5936_v44 = vld [vmem:[#allocation8 + $0x30] sm:$0xff]   ;;  %v5952_v42 = vld [vmem:[#allocation8 + $0xc8] sm:$0xff]  }
 0x199   :  { %6303 = vmatprep.mubr.f32.mxu1 %v787_v47  ;;  %v750_v54 = vsel %vm8756_vm4, %v5763_v38, %v749_v48  ;;  %v751_v55 = vrot.slane %v749_v48, 4  ;;  %v752_v56 = vrot.slane %v8940_v46, 5  ;;  %v957_v57 = vrot.slane %v8940_v46, 6  ;;  %v2328_v35 = vld [vmem:[#allocation11 + $0x538] sm:$0xff]  ;;  %v5950_v28 = vld [vmem:[#allocation8 + $0xb0] sm:$0xff]  }
 0x19a   :  { %v8959_v58 = vsel %vm8822_vm8, %v5765_v39, %v954_v51  ;;  %v956_v59 = vrot.slane %v954_v51, 4  ;;  %v1120_v60 = vcombine.low %v8929_v40, %v8950_v52  ;;  %v1082_v61 = vrot.slane %v8923_v37, 7  ;;  %v2332_v41 = vld [vmem:[#allocation11 + $0x558] sm:$0xff]  ;;  %v5959_v52 = vld [vmem:[#allocation8 + $0x108] sm:$0xff]  }
 0x19b   :  { %v753_v62 = vsel %vm8756_vm4, %v751_v55, %v752_v56  ;;  %v1085_v63 = vrot.slane %v8940_v46, 7  ;;  %v1234_v0 = vcombine.low %v8901_v21, %v8903_v8  ;;  %v1235_v2 = vcombine.low %v8923_v37, %v8940_v46  ;;  %v2336_v43 = vld [vmem:[#allocation11 + $0x578] sm:$0xff]  ;;  %v5946_v55 = vld [vmem:[#allocation8 + $0x90] sm:$0xff]   ;;  %v1523_v21 = vld [vmem:[#allocation11 + $0x220] sm:$0xff] }
 0x19c   :  { %v788_v6 = vcombine.low %v750_v54, %v753_v62  ;;  %v8973_v7 = vsel %vm8822_vm8, %v956_v59, %v957_v57  ;;  %v8977_v3 = vsel %vm8859_vm11, %v5767_v53, %v1082_v61  ;;  %v1084_v14 = vrot.slane %v1082_v61, 4  ;;  %v5937_v51 = vld [vmem:[#allocation8 + $0x38] sm:$0xff]   ;;  %v5836_v53 = vld [vmem:[#allocation8 + $0x80] sm:$0xff]   ;;  %v5945_v54 = vld [vmem:[#allocation8 + $0x88] sm:$0xff]  }
 0x19d   :  { %v993_v16 = vcombine.low %v8959_v58, %v8973_v7  ;;  %v8000_v12 = vcombine.high %v2300_v9, %v2304_v22  ;;  %v8001_v5 = vcombine.low %v2300_v9, %v2304_v22  ;;  %v8004_v30 = vcombine.high %v2316_v26, %v2320_v27  ;;  %v5947_v56 = vld [vmem:[#allocation8 + $0x98] sm:$0xff]   ;;  %v5948_v57 = vld [vmem:[#allocation8 + $0xa0] sm:$0xff]   ;;  %v5949_v59 = vld [vmem:[#allocation8 + $0xa8] sm:$0xff]  }
 0x19e   :  { %6304 = vmatmul.mubr.f32.vlgmr.msra.gmra.mrb[24].mxu1 %v788_v6  ;;  %v8985_v17 = vsel %vm8859_vm11, %v1084_v14, %v1085_v63  ;;  %v8005_v31 = vcombine.low %v2316_v26, %v2320_v27  ;;  %v8006_v38 = vcombine.high %v2324_v32, %v2328_v35  ;;  %v8007_v39 = vcombine.low %v2324_v32, %v2328_v35  ;;  %v5868_v34 = vld [vmem:[#allocation8 + $0xc0] sm:$0xff]   ;;  %v5954_v61 = vld [vmem:[#allocation8 + $0xd8] sm:$0xff]   ;;  %v5956_v63 = vld [vmem:[#allocation8 + $0xe8] sm:$0xff]  }
 0x19f   :  { %6481 = vmatpush3.bf16.msra.mxu1 %v8894_v33  ;;  %6338 = vmatprep.mubr.f32.mxu1 %v866_v11  ;;  %v1121_v18 = vcombine.low %v8977_v3, %v8985_v17  ;;  %v2312_v33 = vld [vmem:[#allocation11 + $0x4b8] sm:$0xff]  ;;  %v8008_v47 = vcombine.high %v2332_v41, %v2336_v43  ;;  %v8009_v48 = vcombine.low %v2332_v41, %v2336_v43  ;;  %v5957_v58 = vld [vmem:[#allocation8 + $0xf0] sm:$0xff]   ;;  %v5963_v11 = vld [vmem:[#allocation8 + $0x128] sm:$0xff]  }
 0x1a0   :  { %6483 = vmatprep.subr.bf16.mxu1 %v5931_v15  ;;  %6963 = vmatprep.subr.bf16.mxu0 %v8000_v12  ;;  %v8002_v25 = vcombine.high %v2308_v10, %v2312_v33  ;;  %v8003_v13 = vcombine.low %v2308_v10, %v2312_v33  ;;  %v5955_v62 = vld [vmem:[#allocation8 + $0xe0] sm:$0xff]   ;;  %v5958_v6 = vld [vmem:[#allocation8 + $0xf8] sm:$0xff]   ;;  %v5964_v3 = vld [vmem:[#allocation8 + $0x130] sm:$0xff]   ;;  %v7826_v9 = vcombine.high %v1535_v4, %v1539_v20 }
 0x1a1   :  { %6965 = vmatpush1.bf16.msra.mxu0 %v8001_v5  ;;  %v5900_v40 = vld [vmem:[#allocation8 + $0x100] sm:$0xff]   ;;  %v5961_v7 = vld [vmem:[#allocation8 + $0x118] sm:$0xff]   ;;  %v7827_v12 = vcombine.low %v1535_v4, %v1539_v20 }
 0x1a2   :  { %6967 = vmatprep.subr.bf16.mxu0 %v8002_v25  ;;  %v5962_v14 = vld [vmem:[#allocation8 + $0x120] sm:$0xff]  }
 0x1a3   :  { %6485 = vmatpush3.bf16.msra.mxu1 %v5931_v15  ;;  %v5965_v15 = vld [vmem:[#allocation8 + $0x138] sm:$0xff]   ;;  %v1531_v17 = vld [vmem:[#allocation11 + $0x260] sm:$0xff] }
 0x1a4   :  { %6487 = vmatprep.subr.bf16.mxu1 %v5932_v23  ;;  %v1543_v22 = vld [vmem:[#allocation11 + $0x2c0] sm:$0xff]  ;;  %v2344_v35 = vld [vmem:[#allocation11 + $0x5b8] sm:$0xff] }
 0x1a5   :  { %6969 = vmatpush1.bf16.msra.mxu0 %v8003_v13  ;;  %v1551_v10 = vld [vmem:[#allocation11 + $0x300] sm:$0xff] }
 0x1a6   :  { %6971 = vmatprep.subr.bf16.mxu0 %v8004_v30  ;;  %v1555_v33 = vld [vmem:[#allocation11 + $0x320] sm:$0xff]  ;;  %v2340_v30 = vld [vmem:[#allocation11 + $0x598] sm:$0xff] }
 0x1a7   :  { %6489 = vmatpush3.bf16.msra.mxu1 %v5932_v23  ;;  %v1547_v23 = vld [vmem:[#allocation11 + $0x2e0] sm:$0xff]  ;;  %v7830_v25 = vcombine.high %v1551_v10, %v1555_v33  ;;  %v8011_v41 = vcombine.low %v2340_v30, %v2344_v35 }
 0x1a8   :  { %6491 = vmatprep.subr.bf16.mxu1 %v5933_v24  ;;  %v7828_v5 = vcombine.high %v1543_v22, %v1547_v23  ;;  %v1559_v37 = vld [vmem:[#allocation11 + $0x340] sm:$0xff] }
 0x1a9   :  { %6973 = vmatpush1.bf16.msra.mxu0 %v8005_v31  ;;  %v1563_v46 = vld [vmem:[#allocation11 + $0x360] sm:$0xff] }
 0x1aa   :  { %6975 = vmatprep.subr.bf16.mxu0 %v8006_v38  ;;  %v7832_v13 = vcombine.high %v1559_v37, %v1563_v46  ;;  %v7833_v26 = vcombine.low %v1559_v37, %v1563_v46  ;;  %v1567_v27 = vld [vmem:[#allocation11 + $0x380] sm:$0xff] }
 0x1ab   :  { %6493 = vmatpush3.bf16.msra.mxu1 %v5933_v24  ;;  %v7829_v24 = vcombine.low %v1543_v22, %v1547_v23  ;;  %v1579_v38 = vld [vmem:[#allocation11 + $0x3e0] sm:$0xff] }
 0x1ac   :  { %6495 = vmatprep.subr.bf16.mxu1 %v5934_v29 }
 0x1ad   :  { %6977 = vmatpush1.bf16.msra.mxu0 %v8007_v39  ;;  %v8010_v39 = vcombine.high %v2340_v30, %v2344_v35  ;;  %v1544_v30 = vld [vmem:[#allocation11 + $0x2c8] sm:$0xff]  ;;  %v2806_v35 = vld [vmem:[#allocation11 + $0x6e0] sm:$0xff] }
 0x1ae   :  { %6979 = vmatprep.subr.bf16.mxu0 %v8008_v47  ;;  %v2352_v47 = vld [vmem:[#allocation11 + $0x5f8] sm:$0xff] }
 0x1af   :  { %6497 = vmatpush3.bf16.msra.mxu1 %v5934_v29  ;;  %v1571_v29 = vld [vmem:[#allocation11 + $0x3a0] sm:$0xff] }
 0x1b0   :  { %6499 = vmatprep.subr.bf16.mxu1 %v5935_v36  ;;  %v7834_v31 = vcombine.high %v1567_v27, %v1571_v29  ;;  %v7835_v32 = vcombine.low %v1567_v27, %v1571_v29 }
 0x1b1   :  { %6981 = vmatpush1.bf16.msra.mxu0 %v8009_v48  ;;  %v1520_v48 = vld [vmem:[#allocation11 + $0x208] sm:$0xff] }
 0x1b2   :  { %6983 = vmatprep.subr.bf16.mxu0 %v8010_v39 }
 0x1b3   :  { %6501 = vmatpush3.bf16.msra.mxu1 %v5935_v36  ;;  %v1575_v36 = vld [vmem:[#allocation11 + $0x3c0] sm:$0xff] }
 0x1b4   :  { %6503 = vmatprep.subr.bf16.mxu1 %v5936_v44  ;;  %v7836_v43 = vcombine.high %v1575_v36, %v1579_v38 }
 0x1b5   :  { %6985 = vmatpush1.bf16.msra.mxu0 %v8011_v41 }
 0x1b7   :  { %6505 = vmatpush3.bf16.msra.mxu1 %v5936_v44  ;;  %v2348_v44 = vld [vmem:[#allocation11 + $0x5d8] sm:$0xff] }
 0x1b8   :  { %6507 = vmatprep.subr.bf16.mxu1 %v5937_v51 }
 0x1bb   :  { %6509 = vmatpush3.bf16.msra.mxu1 %v5937_v51  ;;  %v8012_v51 = vcombine.high %v2348_v44, %v2352_v47 }
 0x1bc   :  { %6511 = vmatprep.subr.bf16.mxu1 %v5836_v53 }
 0x1bd   :  { %6987 = vmatprep.subr.bf16.mxu0 %v8012_v51  ;;  %v2810_v51 = vld [vmem:[#allocation11 + $0x700] sm:$0xff] }
 0x1be   :  { %6339 = vmatmul.mubr.f32.vlgmr.msra.gmra.mrb[24].mxu1 %v867_v49  ;;  %v5951_v49 = vld [vmem:[#allocation8 + $0xb8] sm:$0xff]  }
 0x1bf   :  { %6513 = vmatpush3.bf16.msra.mxu1 %v5836_v53  ;;  %6373 = vmatprep.mubr.f32.mxu1 %v992_v50  ;;  %v5953_v50 = vld [vmem:[#allocation8 + $0xd0] sm:$0xff]  }
 0x1c0   :  { %6515 = vmatprep.subr.bf16.mxu1 %v5945_v54  ;;  %v1524_v53 = vld [vmem:[#allocation11 + $0x228] sm:$0xff] }
 0x1c3   :  { %6517 = vmatpush3.bf16.msra.mxu1 %v5945_v54  ;;  %v2778_v54 = vld [vmem:[#allocation11 + $0x600] sm:$0xff] }
 0x1c4   :  { %6519 = vmatprep.subr.bf16.mxu1 %v5946_v55 }
 0x1c7   :  { %6521 = vmatpush3.bf16.msra.mxu1 %v5946_v55  ;;  %v2782_v55 = vld [vmem:[#allocation11 + $0x620] sm:$0xff] }
 0x1c8   :  { %6523 = vmatprep.subr.bf16.mxu1 %v5947_v56 }
 0x1cb   :  { %6525 = vmatpush3.bf16.msra.mxu1 %v5947_v56  ;;  %v7837_v56 = vcombine.low %v1575_v36, %v1579_v38 }
 0x1cc   :  { %6527 = vmatprep.subr.bf16.mxu1 %v5948_v57 }
 0x1cf   :  { %6529 = vmatpush3.bf16.msra.mxu1 %v5948_v57  ;;  %v7839_v57 = vcombine.low %v1520_v48, %v1524_v53 }
 0x1d0   :  { %6531 = vmatprep.subr.bf16.mxu1 %v5949_v59 }
 0x1d3   :  { %6533 = vmatpush3.bf16.msra.mxu1 %v5949_v59  ;;  %v8013_v59 = vcombine.low %v2348_v44, %v2352_v47  ;;  %v1552_v47 = vld [vmem:[#allocation11 + $0x308] sm:$0xff] }
 0x1d4   :  { %6535 = vmatprep.subr.bf16.mxu1 %v5950_v28 }
 0x1d5   :  { %6989 = vmatpush1.bf16.msra.mxu0 %v8013_v59  ;;  %v1560_v59 = vld [vmem:[#allocation11 + $0x348] sm:$0xff] }
 0x1d7   :  { %6537 = vmatpush3.bf16.msra.mxu1 %v5950_v28  ;;  %v7838_v28 = vcombine.high %v1520_v48, %v1524_v53  ;;  %v1556_v48 = vld [vmem:[#allocation11 + $0x328] sm:$0xff]  ;;  %v2814_v53 = vld [vmem:[#allocation11 + $0x720] sm:$0xff] }
 0x1d8   :  { %6539 = vmatprep.subr.bf16.mxu1 %v5951_v49 }
 0x1db   :  { %6541 = vmatpush3.bf16.msra.mxu1 %v5951_v49  ;;  %v8015_v49 = vcombine.low %v2778_v54, %v2782_v55 }
 0x1dc   :  { %6543 = vmatprep.subr.bf16.mxu1 %v5868_v34 }
 0x1de   :  { %6374 = vmatmul.mubr.f32.vlgmr.msra.gmra.mrb[24].mxu1 %v993_v16  ;;  %v1519_v16 = vld [vmem:[#allocation11 + $0x200] sm:$0xff] }
 0x1df   :  { %6545 = vmatpush3.bf16.msra.mxu1 %v5868_v34  ;;  %6408 = vmatprep.mubr.f32.mxu1 %v1120_v60  ;;  %v5960_v60 = vld [vmem:[#allocation8 + $0x110] sm:$0xff]   ;;  %v7822_v8 = vcombine.high %v1519_v16, %v1523_v21  ;;  %v7823_v45 = vcombine.low %v1519_v16, %v1523_v21  ;;  %v8014_v34 = vcombine.high %v2778_v54, %v2782_v55 }
 0x1e0   :  { %6547 = vmatprep.subr.bf16.mxu1 %v5952_v42 }
 0x1e1   :  { %6991 = vmatprep.subr.bf16.mxu0 %v8014_v34  ;;  %v2822_v34 = vld [vmem:[#allocation11 + $0x760] sm:$0xff] }
 0x1e3   :  { %6549 = vmatpush3.bf16.msra.mxu1 %v5952_v42  ;;  %v5768_v42 = vld [vmem:[#allocation9] ss:$0 sm:$0xff] }
 0x1e4   :  { %6551 = vmatprep.subr.bf16.mxu1 %v5953_v50 }
 0x1e7   :  { %6553 = vmatpush3.bf16.msra.mxu1 %v5953_v50 }
 0x1e8   :  { %6555 = vmatprep.subr.bf16.mxu1 %v5954_v61 }
 0x1eb   :  { %6557 = vmatpush3.bf16.msra.mxu1 %v5954_v61  ;;  %v1528_v61 = vld [vmem:[#allocation11 + $0x248] sm:$0xff] }
 0x1ec   :  { %6559 = vmatprep.subr.bf16.mxu1 %v5955_v62 }
 0x1ef   :  { %6561 = vmatpush3.bf16.msra.mxu1 %v5955_v62 }
 0x1f0   :  { %6563 = vmatprep.subr.bf16.mxu1 %v5956_v63 }
 0x1f3   :  { %6565 = vmatpush3.bf16.msra.mxu1 %v5956_v63 }
 0x1f4   :  { %6567 = vmatprep.subr.bf16.mxu1 %v5957_v58 }
 0x1f7   :  { %6569 = vmatpush3.bf16.msra.mxu1 %v5957_v58  ;;  %v1532_v58 = vld [vmem:[#allocation11 + $0x268] sm:$0xff] }
 0x1f8   :  { %6571 = vmatprep.subr.bf16.mxu1 %v5958_v6 }
 0x1fb   :  { %6573 = vmatpush3.bf16.msra.mxu1 %v5958_v6  ;;  %v2786_v6 = vld [vmem:[#allocation11 + $0x640] sm:$0xff] }
 0x1fc   :  { %6575 = vmatprep.subr.bf16.mxu1 %v5900_v40 }
 0x1fe   :  { %6409 = vmatmul.mubr.f32.vlgmr.msra.gmra.mrb[24].mxu1 %v1121_v18 }
 0x1ff   :  { %6577 = vmatpush3.bf16.msra.mxu1 %v5900_v40  ;;  %6443 = vmatprep.mubr.f32.mxu1 %v1234_v0  ;;  %v1527_v0 = vld [vmem:[#allocation11 + $0x240] sm:$0xff] }
 0x200   :  { %6579 = vmatprep.subr.bf16.mxu1 %v5959_v52  ;;  %v7824_v18 = vcombine.high %v1527_v0, %v1531_v17  ;;  %v7825_v19 = vcombine.low %v1527_v0, %v1531_v17  ;;  %v2790_v40 = vld [vmem:[#allocation11 + $0x660] sm:$0xff] }
 0x203   :  { %6581 = vmatpush3.bf16.msra.mxu1 %v5959_v52 }
 0x204   :  { %6583 = vmatprep.subr.bf16.mxu1 %v5960_v60 }
 0x207   :  { %6585 = vmatpush3.bf16.msra.mxu1 %v5960_v60 }
 0x208   :  { %6587 = vmatprep.subr.bf16.mxu1 %v5961_v7 }
 0x20b   :  { %6589 = vmatpush3.bf16.msra.mxu1 %v5961_v7 }
 0x20c   :  { %6591 = vmatprep.subr.bf16.mxu1 %v5962_v14 }
 0x20f   :  { %6593 = vmatpush3.bf16.msra.mxu1 %v5962_v14  ;;  %v7840_v14 = vcombine.high %v1528_v61, %v1532_v58 }
 0x210   :  { %6595 = vmatprep.subr.bf16.mxu1 %v5963_v11 }
 0x213   :  { %6597 = vmatpush3.bf16.msra.mxu1 %v5963_v11  ;;  %v8016_v11 = vcombine.high %v2786_v6, %v2790_v40 }
 0x214   :  { %6599 = vmatprep.subr.bf16.mxu1 %v5964_v3 }
 0x217   :  { %6601 = vmatpush3.bf16.msra.mxu1 %v5964_v3 }
 0x218   :  { %6603 = vmatprep.subr.bf16.mxu1 %v5965_v15 }
 0x21b   :  { %6605 = vmatpush3.bf16.msra.mxu1 %v5965_v15 }
 0x21c   :  { %6607 = vmatprep.subr.bf16.mxu1 %v7822_v8 }
 0x21e   :  { %6444 = vmatmul.mubr.f32.vlgmr.msra.gmra.mrb[24].mxu1 %v1235_v2  ;;  %v7831_v2 = vcombine.low %v1551_v10, %v1555_v33  ;;  %v2798_v10 = vld [vmem:[#allocation11 + $0x6a0] sm:$0xff] }
 0x21f   :  { %6609 = vmatpush1.bf16.msra.mxu1 %v7823_v45  ;;  %1781 = vmatprep.mubr.f32.mxu1 %v8553_v1 }
 0x220   :  { %6611 = vmatprep.subr.bf16.mxu1 %v7824_v18  ;;  %v1536_v18 = vld [vmem:[#allocation11 + $0x288] sm:$0xff] }
 0x223   :  { %6613 = vmatpush1.bf16.msra.mxu1 %v7825_v19 }
 0x224   :  { %6615 = vmatprep.subr.bf16.mxu1 %v7826_v9 }
 0x227   :  { %6617 = vmatpush1.bf16.msra.mxu1 %v7827_v12  ;;  %v1540_v12 = vld [vmem:[#allocation11 + $0x2a8] sm:$0xff] }
 0x228   :  { %6619 = vmatprep.subr.bf16.mxu1 %v7828_v5  ;;  %v2794_v5 = vld [vmem:[#allocation11 + $0x680] sm:$0xff]  ;;  %v7842_v27 = vcombine.high %v1536_v18, %v1540_v12  ;;  %v7843_v39 = vcombine.low %v1536_v18, %v1540_v12  ;;  %v1525_v18 = vld [vmem:[#allocation11 + $0x230] sm:$0xff] }
 0x229   :  { %v8018_v29 = vcombine.high %v2794_v5, %v2798_v10  ;;  %v8019_v41 = vcombine.low %v2794_v5, %v2798_v10 }
 0x22b   :  { %6621 = vmatpush1.bf16.msra.mxu1 %v7829_v24 }
 0x22c   :  { %6623 = vmatprep.subr.bf16.mxu1 %v7830_v25 }
 0x22f   :  { %6625 = vmatpush1.bf16.msra.mxu1 %v7831_v2 }
 0x230   :  { %6627 = vmatprep.subr.bf16.mxu1 %v7832_v13  ;;  %v7841_v13 = vcombine.low %v1528_v61, %v1532_v58  ;;  %v1572_v58 = vld [vmem:[#allocation11 + $0x3a8] sm:$0xff] }
 0x233   :  { %6629 = vmatpush1.bf16.msra.mxu1 %v7833_v26  ;;  %v8017_v26 = vcombine.low %v2786_v6, %v2790_v40  ;;  %v2826_v6 = vld [vmem:[#allocation11 + $0x780] sm:$0xff] }
 0x234   :  { %6631 = vmatprep.subr.bf16.mxu1 %v7834_v31  ;;  %v1548_v31 = vld [vmem:[#allocation11 + $0x2e8] sm:$0xff]  ;;  %v2830_v40 = vld [vmem:[#allocation11 + $0x7a0] sm:$0xff] }
 0x235   :  { %v7845_v54 = vcombine.low %v1544_v30, %v1548_v31 }
 0x237   :  { %6633 = vmatpush1.bf16.msra.mxu1 %v7835_v32  ;;  %v2802_v32 = vld [vmem:[#allocation11 + $0x6c0] sm:$0xff] }
 0x238   :  { %6635 = vmatprep.subr.bf16.mxu1 %v7836_v43  ;;  %v7844_v43 = vcombine.high %v1544_v30, %v1548_v31  ;;  %v8020_v44 = vcombine.high %v2802_v32, %v2806_v35  ;;  %v8021_v55 = vcombine.low %v2802_v32, %v2806_v35  ;;  %v1537_v31 = vld [vmem:[#allocation11 + $0x290] sm:$0xff]  ;;  %v2795_v35 = vld [vmem:[#allocation11 + $0x688] sm:$0xff] }
 0x239   :  { %v1541_v32 = vld [vmem:[#allocation11 + $0x2b0] sm:$0xff] }
 0x23b   :  { %6637 = vmatpush1.bf16.msra.mxu1 %v7837_v56  ;;  %v7846_v56 = vcombine.high %v1552_v47, %v1556_v48 }
 0x23c   :  { %6639 = vmatprep.subr.bf16.mxu1 %v7838_v28  ;;  %v1564_v28 = vld [vmem:[#allocation11 + $0x368] sm:$0xff] }
 0x23d   :  { %v7848_v61 = vcombine.high %v1560_v59, %v1564_v28 }
 0x2f1   :  { %v6445_v50 = vpop.f32.mrb[24].mxu1 }
 0x2f2   :  { %v1323_v62 = vadd.f32 %v6445_v50, %v5768_v42  ;;  %v1304_v63 = vpop.f32.mrb[25].mxu1  ;;  %v8023_v50 = vcombine.low %v2810_v51, %v2814_v53 }
 0x2f3   :  { %v1322_v52 = vadd.f32 %v5768_v42, %v1304_v63  ;;  %v7847_v42 = vcombine.low %v1552_v47, %v1556_v48  ;;  %v1568_v63 = vld [vmem:[#allocation11 + $0x388] sm:$0xff]  ;;  %v1545_v48 = vld [vmem:[#allocation11 + $0x2d0] sm:$0xff] }
 0x2f4   :  { %v1325_v60 = vmax.f32 %v1323_v62, 0.0 }
 0x2f5   :  { %v1324_v7 = vmax.f32 %v1322_v52, 0.0  ;;  %v7849_v52 = vcombine.low %v1560_v59, %v1564_v28  ;;  %v1553_v28 = vld [vmem:[#allocation11 + $0x310] sm:$0xff] }
 0x2f6   :  { %v2482_v3 = vrot.slane %v1325_v60, 1  ;;  %v2971_v15 = vrot.slane %v1325_v60, 2  ;;  %v2001_v16 = vrot.slane %v1325_v60, 7  ;;  %v3460_v21 = vrot.slane %v1325_v60, 3 }
 0x2f7   :  { %v1713_v8 = vrot.slane %v1324_v7, 1  ;;  %v2481_v0 = vrot.slane %v1324_v7, 2  ;;  %v2970_v17 = vrot.slane %v1324_v7, 3  ;;  %v3459_v45 = vrot.slane %v1324_v7, 4 }
 0x2f8   :  { %v9013_v4 = vsel %vm1714_vm12, %v2001_v16, %v1324_v7  ;;  %v3948_v20 = vrot.slane %v1324_v7, 5  ;;  %v3949_v19 = vrot.slane %v1325_v60, 4  ;;  %v4437_v9 = vrot.slane %v1324_v7, 6  ;;  %v2838_v16 = vld [vmem:[#allocation11 + $0x7e0] sm:$0xff] }
 0x2f9   :  { %v9016_v22 = vsel %vm1714_vm12, %v1325_v60, %v1713_v8  ;;  %v9019_v23 = vsel %vm1714_vm12, %v2482_v3, %v2481_v0  ;;  %v9022_v33 = vsel %vm1714_vm12, %v2971_v15, %v2970_v17  ;;  %v9025_v24 = vsel %vm1714_vm12, %v3460_v21, %v3459_v45  ;;  %v1580_v3 = vld [vmem:[#allocation11 + $0x3e8] sm:$0xff]  ;;  %v2834_v15 = vld [vmem:[#allocation11 + $0x7c0] sm:$0xff]  ;;  %v1521_v45 = vld [vmem:[#allocation11 + $0x210] sm:$0xff] }
 0x2fa   :  { %1782 = vmatmul.mubr.f32.vlgmr.msra.gmra.mrb[26].mxu1 %v9016_v22  ;;  %2763 = vmatmul.mubr.f32.vlgmr.msra.gmra.mrb[6].mxu0 %v9019_v23  ;;  %v9030_v25 = vsel %vm1714_vm12, %v3949_v19, %v3948_v20  ;;  %v4438_v37 = vrot.slane %v1325_v60, 5  ;;  %v4926_v46 = vrot.slane %v1324_v7, 7  ;;  %v4927_v2 = vrot.slane %v1325_v60, 6  ;;  %v2779_v20 = vld [vmem:[#allocation11 + $0x608] sm:$0xff] }
 0x2fb   :  { %6641 = vmatpush1.bf16.msra.mxu1 %v7839_v57  ;;  %6993 = vmatpush1.bf16.msra.mxu0 %v8015_v49  ;;  %v8022_v57 = vcombine.high %v2810_v51, %v2814_v53  ;;  %v2818_v49 = vld [vmem:[#allocation11 + $0x740] sm:$0xff]  ;;  %v7850_v7 = vcombine.high %v1568_v63, %v1572_v58  ;;  %v7851_v21 = vcombine.low %v1568_v63, %v1572_v58  ;;  %v2783_v19 = vld [vmem:[#allocation11 + $0x628] sm:$0xff]  ;;  %v1549_v51 = vld [vmem:[#allocation11 + $0x2f0] sm:$0xff] }
 0x2fc   :  { %6643 = vmatprep.subr.bf16.mxu1 %v7840_v14  ;;  %6995 = vmatprep.subr.bf16.mxu0 %v8016_v11  ;;  %v9035_v36 = vsel %vm1714_vm12, %v4438_v37, %v4437_v9  ;;  %v9038_v38 = vsel %vm1714_vm12, %v4927_v2, %v4926_v46  ;;  %v8024_v62 = vcombine.high %v2818_v49, %v2822_v34  ;;  %v1576_v11 = vld [vmem:[#allocation11 + $0x3c8] sm:$0xff]  ;;  %v1529_v37 = vld [vmem:[#allocation11 + $0x250] sm:$0xff] }
 0x2fd   :  { %1852 = vmatprep.mubr.f32.mxu1 %v8553_v1  ;;  %3038 = vmatprep.mubr.f32.mxu0 %v8553_v1  ;;  %v8025_v60 = vcombine.low %v2818_v49, %v2822_v34  ;;  %v8026_v14 = vcombine.high %v2826_v6, %v2830_v40  ;;  %v8027_v8 = vcombine.low %v2826_v6, %v2830_v40  ;;  %v1533_v46 = vld [vmem:[#allocation11 + $0x270] sm:$0xff]  ;;  %v2787_v2 = vld [vmem:[#allocation11 + $0x648] sm:$0xff] }
 0x2fe   :  { %v7852_v0 = vcombine.high %v1576_v11, %v1580_v3  ;;  %v8028_v17 = vcombine.high %v2834_v15, %v2838_v16  ;;  %v7853_v9 = vcombine.low %v1576_v11, %v1580_v3  ;;  %v8029_v12 = vcombine.low %v2834_v15, %v2838_v16  ;;  %v2803_v53 = vld [vmem:[#allocation11 + $0x6c8] sm:$0xff]  ;;  %v1557_v49 = vld [vmem:[#allocation11 + $0x330] sm:$0xff] }
 0x2ff   :  { %6645 = vmatpush1.bf16.msra.mxu1 %v7841_v13  ;;  %6997 = vmatpush1.bf16.msra.mxu0 %v8017_v26  ;;  %v7854_v5 = vcombine.high %v1521_v45, %v1525_v18  ;;  %v8030_v10 = vcombine.high %v2779_v20, %v2783_v19  ;;  %v2791_v13 = vld [vmem:[#allocation11 + $0x668] sm:$0xff]  ;;  %v7855_v26 = vcombine.low %v1521_v45, %v1525_v18  ;;  %v1561_v58 = vld [vmem:[#allocation11 + $0x350] sm:$0xff] }
 0x300   :  { %6647 = vmatprep.subr.bf16.mxu1 %v7842_v27  ;;  %6999 = vmatprep.subr.bf16.mxu0 %v8018_v29  ;;  %v8031_v27 = vcombine.low %v2779_v20, %v2783_v19  ;;  %v7856_v29 = vcombine.high %v1529_v37, %v1533_v46  ;;  %v8032_v30 = vcombine.high %v2787_v2, %v2791_v13  ;;  %v2811_v34 = vld [vmem:[#allocation11 + $0x708] sm:$0xff]  ;;  %v1565_v6 = vld [vmem:[#allocation11 + $0x370] sm:$0xff] }
 0x301   :  { %v2819_v40 = vld [vmem:[#allocation11 + $0x748] sm:$0xff]  ;;  %v1569_v3 = vld [vmem:[#allocation11 + $0x390] sm:$0xff] }
 0x302   :  { %v1573_v15 = vld [vmem:[#allocation11 + $0x3b0] sm:$0xff]  ;;  %v2827_v16 = vld [vmem:[#allocation11 + $0x788] sm:$0xff] }
 0x303   :  { %6649 = vmatpush1.bf16.msra.mxu1 %v7843_v39  ;;  %7001 = vmatpush1.bf16.msra.mxu0 %v8019_v41  ;;  %v2799_v39 = vld [vmem:[#allocation11 + $0x6a8] sm:$0xff]  ;;  %v7857_v41 = vcombine.low %v1529_v37, %v1533_v46  ;;  %v1577_v18 = vld [vmem:[#allocation11 + $0x3d0] sm:$0xff]  ;;  %v1522_v46 = vld [vmem:[#allocation11 + $0x218] sm:$0xff] }
 0x304   :  { %6651 = vmatprep.subr.bf16.mxu1 %v7844_v43  ;;  %7003 = vmatprep.subr.bf16.mxu0 %v8020_v44  ;;  %v8033_v43 = vcombine.low %v2787_v2, %v2791_v13  ;;  %v7858_v44 = vcombine.high %v1537_v31, %v1541_v32  ;;  %v8034_v47 = vcombine.high %v2795_v35, %v2799_v39  ;;  %v1581_v20 = vld [vmem:[#allocation11 + $0x3f0] sm:$0xff]  ;;  %v2835_v19 = vld [vmem:[#allocation11 + $0x7c8] sm:$0xff]  ;;  %v1526_v2 = vld [vmem:[#allocation11 + $0x238] sm:$0xff] }
 0x305   :  { %v2780_v13 = vld [vmem:[#allocation11 + $0x610] sm:$0xff] }
 0x307   :  { %6653 = vmatpush1.bf16.msra.mxu1 %v7845_v54  ;;  %7005 = vmatpush1.bf16.msra.mxu0 %v8021_v55  ;;  %v2807_v54 = vld [vmem:[#allocation11 + $0x6e8] sm:$0xff]  ;;  %v7859_v55 = vcombine.low %v1537_v31, %v1541_v32  ;;  %v1530_v32 = vld [vmem:[#allocation11 + $0x258] sm:$0xff] }
 0x308   :  { %6655 = vmatprep.subr.bf16.mxu1 %v7846_v56  ;;  %7007 = vmatprep.subr.bf16.mxu0 %v8022_v57  ;;  %v8035_v56 = vcombine.low %v2795_v35, %v2799_v39  ;;  %v7860_v57 = vcombine.high %v1545_v48, %v1549_v51  ;;  %v8036_v59 = vcombine.high %v2803_v53, %v2807_v54  ;;  %v1534_v35 = vld [vmem:[#allocation11 + $0x278] sm:$0xff]  ;;  %v2788_v39 = vld [vmem:[#allocation11 + $0x650] sm:$0xff] }
 0x30b   :  { %6657 = vmatpush1.bf16.msra.mxu1 %v7847_v42  ;;  %7009 = vmatpush1.bf16.msra.mxu0 %v8023_v50  ;;  %v2815_v42 = vld [vmem:[#allocation11 + $0x728] sm:$0xff]  ;;  %v7861_v50 = vcombine.low %v1545_v48, %v1549_v51  ;;  %v1538_v51 = vld [vmem:[#allocation11 + $0x298] sm:$0xff] }
 0x30c   :  { %6659 = vmatprep.subr.bf16.mxu1 %v7848_v61  ;;  %7011 = vmatprep.subr.bf16.mxu0 %v8024_v62  ;;  %v8037_v61 = vcombine.low %v2803_v53, %v2807_v54  ;;  %v7862_v62 = vcombine.high %v1553_v28, %v1557_v49  ;;  %v8038_v63 = vcombine.high %v2811_v34, %v2815_v42  ;;  %v1542_v53 = vld [vmem:[#allocation11 + $0x2b8] sm:$0xff]  ;;  %v2796_v54 = vld [vmem:[#allocation11 + $0x690] sm:$0xff] }
 0x30f   :  { %6661 = vmatpush1.bf16.msra.mxu1 %v7849_v52  ;;  %7013 = vmatpush1.bf16.msra.mxu0 %v8025_v60  ;;  %v2823_v52 = vld [vmem:[#allocation11 + $0x768] sm:$0xff]  ;;  %v7863_v60 = vcombine.low %v1553_v28, %v1557_v49  ;;  %v1546_v49 = vld [vmem:[#allocation11 + $0x2d8] sm:$0xff] }
 0x310   :  { %6663 = vmatprep.subr.bf16.mxu1 %v7850_v7  ;;  %7015 = vmatprep.subr.bf16.mxu0 %v8026_v14  ;;  %v8039_v7 = vcombine.low %v2811_v34, %v2815_v42  ;;  %v7864_v14 = vcombine.high %v1561_v58, %v1565_v6  ;;  %v8040_v11 = vcombine.high %v2819_v40, %v2823_v52  ;;  %v1550_v34 = vld [vmem:[#allocation11 + $0x2f8] sm:$0xff]  ;;  %v2804_v42 = vld [vmem:[#allocation11 + $0x6d0] sm:$0xff] }
 0x313   :  { %6665 = vmatpush1.bf16.msra.mxu1 %v7851_v21  ;;  %7017 = vmatpush1.bf16.msra.mxu0 %v8027_v8  ;;  %v2831_v21 = vld [vmem:[#allocation11 + $0x7a8] sm:$0xff]  ;;  %v7865_v8 = vcombine.low %v1561_v58, %v1565_v6  ;;  %v1554_v6 = vld [vmem:[#allocation11 + $0x318] sm:$0xff] }
 0x314   :  { %6667 = vmatprep.subr.bf16.mxu1 %v7852_v0  ;;  %7019 = vmatprep.subr.bf16.mxu0 %v8028_v17  ;;  %v8041_v0 = vcombine.low %v2819_v40, %v2823_v52  ;;  %v7866_v17 = vcombine.high %v1569_v3, %v1573_v15  ;;  %v8042_v45 = vcombine.high %v2827_v16, %v2831_v21  ;;  %v1558_v40 = vld [vmem:[#allocation11 + $0x338] sm:$0xff]  ;;  %v2812_v52 = vld [vmem:[#allocation11 + $0x710] sm:$0xff] }
 0x317   :  { %6669 = vmatpush1.bf16.msra.mxu1 %v7853_v9  ;;  %7021 = vmatpush1.bf16.msra.mxu0 %v8029_v12  ;;  %v2839_v9 = vld [vmem:[#allocation11 + $0x7e8] sm:$0xff]  ;;  %v7867_v12 = vcombine.low %v1569_v3, %v1573_v15  ;;  %v1562_v15 = vld [vmem:[#allocation11 + $0x358] sm:$0xff] }
 0x318   :  { %6671 = vmatprep.subr.bf16.mxu1 %v7854_v5  ;;  %7023 = vmatprep.subr.bf16.mxu0 %v8030_v10  ;;  %v8043_v5 = vcombine.low %v2827_v16, %v2831_v21  ;;  %v7868_v10 = vcombine.high %v1577_v18, %v1581_v20  ;;  %v8044_v37 = vcombine.high %v2835_v19, %v2839_v9  ;;  %v1566_v16 = vld [vmem:[#allocation11 + $0x378] sm:$0xff]  ;;  %v2820_v21 = vld [vmem:[#allocation11 + $0x750] sm:$0xff] }
 0x31a   :  { %1853 = vmatmul.mubr.f32.vlgmr.msra.gmra.mrb[28].mxu1 %v9016_v22  ;;  %3039 = vmatmul.mubr.f32.vlgmr.msra.gmra.mrb[8].mxu0 %v9022_v33 }
 0x31b   :  { %6673 = vmatpush1.bf16.msra.mxu1 %v7855_v26  ;;  %7025 = vmatpush1.bf16.msra.mxu0 %v8031_v27  ;;  %v2784_v26 = vld [vmem:[#allocation11 + $0x630] sm:$0xff]  ;;  %v7869_v27 = vcombine.low %v1577_v18, %v1581_v20  ;;  %v1570_v20 = vld [vmem:[#allocation11 + $0x398] sm:$0xff] }
 0x31c   :  { %6675 = vmatprep.subr.bf16.mxu1 %v7856_v29  ;;  %7027 = vmatprep.subr.bf16.mxu0 %v8032_v30  ;;  %v8045_v29 = vcombine.low %v2835_v19, %v2839_v9  ;;  %v7870_v30 = vcombine.high %v1522_v46, %v1526_v2  ;;  %v8046_v31 = vcombine.high %v2780_v13, %v2784_v26  ;;  %v1574_v19 = vld [vmem:[#allocation11 + $0x3b8] sm:$0xff]  ;;  %v2828_v9 = vld [vmem:[#allocation11 + $0x790] sm:$0xff] }
 0x31d   :  { %1923 = vmatprep.mubr.f32.mxu1 %v8553_v1  ;;  %3109 = vmatprep.mubr.f32.mxu0 %v8553_v1 }
 0x31f   :  { %6677 = vmatpush1.bf16.msra.mxu1 %v7857_v41  ;;  %7029 = vmatpush1.bf16.msra.mxu0 %v8033_v43  ;;  %v2792_v41 = vld [vmem:[#allocation11 + $0x670] sm:$0xff]  ;;  %v7871_v43 = vcombine.low %v1522_v46, %v1526_v2  ;;  %v1578_v2 = vld [vmem:[#allocation11 + $0x3d8] sm:$0xff] }
 0x320   :  { %6679 = vmatprep.subr.bf16.mxu1 %v7858_v44  ;;  %7031 = vmatprep.subr.bf16.mxu0 %v8034_v47  ;;  %v8047_v44 = vcombine.low %v2780_v13, %v2784_v26  ;;  %v7872_v47 = vcombine.high %v1530_v32, %v1534_v35  ;;  %v8048_v48 = vcombine.high %v2788_v39, %v2792_v41  ;;  %v1582_v13 = vld [vmem:[#allocation11 + $0x3f8] sm:$0xff]  ;;  %v2836_v26 = vld [vmem:[#allocation11 + $0x7d0] sm:$0xff] }
 0x323   :  { %6681 = vmatpush1.bf16.msra.mxu1 %v7859_v55  ;;  %7033 = vmatpush1.bf16.msra.mxu0 %v8035_v56  ;;  %v2800_v55 = vld [vmem:[#allocation11 + $0x6b0] sm:$0xff]  ;;  %v7873_v56 = vcombine.low %v1530_v32, %v1534_v35  ;;  %v1326_v35 = vld [vmem:[#allocation11] sm:$0xff] }
 0x324   :  { %6683 = vmatprep.subr.bf16.mxu1 %v7860_v57  ;;  %7035 = vmatprep.subr.bf16.mxu0 %v8036_v59  ;;  %v8049_v57 = vcombine.low %v2788_v39, %v2792_v41  ;;  %v7874_v59 = vcombine.high %v1538_v51, %v1542_v53  ;;  %v8050_v28 = vcombine.high %v2796_v54, %v2800_v55  ;;  %v1330_v39 = vld [vmem:[#allocation11 + $0x20] sm:$0xff]  ;;  %v2781_v41 = vld [vmem:[#allocation11 + $0x618] sm:$0xff] }
 0x327   :  { %6685 = vmatpush1.bf16.msra.mxu1 %v7861_v50  ;;  %7037 = vmatpush1.bf16.msra.mxu0 %v8037_v61  ;;  %v2808_v50 = vld [vmem:[#allocation11 + $0x6f0] sm:$0xff]  ;;  %v7875_v61 = vcombine.low %v1538_v51, %v1542_v53  ;;  %v1334_v53 = vld [vmem:[#allocation11 + $0x40] sm:$0xff] }
 0x328   :  { %6687 = vmatprep.subr.bf16.mxu1 %v7862_v62  ;;  %7039 = vmatprep.subr.bf16.mxu0 %v8038_v63  ;;  %v8051_v62 = vcombine.low %v2796_v54, %v2800_v55  ;;  %v7876_v63 = vcombine.high %v1546_v49, %v1550_v34  ;;  %v8052_v58 = vcombine.high %v2804_v42, %v2808_v50  ;;  %v1338_v54 = vld [vmem:[#allocation11 + $0x60] sm:$0xff]  ;;  %v2789_v55 = vld [vmem:[#allocation11 + $0x658] sm:$0xff] }
 0x32b   :  { %6689 = vmatpush1.bf16.msra.mxu1 %v7863_v60  ;;  %7041 = vmatpush1.bf16.msra.mxu0 %v8039_v7  ;;  %v2816_v60 = vld [vmem:[#allocation11 + $0x730] sm:$0xff]  ;;  %v7877_v7 = vcombine.low %v1546_v49, %v1550_v34  ;;  %v1342_v34 = vld [vmem:[#allocation11 + $0x80] sm:$0xff] }
 0x32c   :  { %6691 = vmatprep.subr.bf16.mxu1 %v7864_v14  ;;  %7043 = vmatprep.subr.bf16.mxu0 %v8040_v11  ;;  %v8053_v14 = vcombine.low %v2804_v42, %v2808_v50  ;;  %v7878_v11 = vcombine.high %v1554_v6, %v1558_v40  ;;  %v8054_v3 = vcombine.high %v2812_v52, %v2816_v60  ;;  %v1346_v42 = vld [vmem:[#allocation11 + $0xa0] sm:$0xff]  ;;  %v2797_v50 = vld [vmem:[#allocation11 + $0x698] sm:$0xff] }
 0x32f   :  { %6693 = vmatpush1.bf16.msra.mxu1 %v7865_v8  ;;  %7045 = vmatpush1.bf16.msra.mxu0 %v8041_v0  ;;  %v2824_v8 = vld [vmem:[#allocation11 + $0x770] sm:$0xff]  ;;  %v7879_v0 = vcombine.low %v1554_v6, %v1558_v40  ;;  %v1350_v40 = vld [vmem:[#allocation11 + $0xc0] sm:$0xff] }
 0x330   :  { %6695 = vmatprep.subr.bf16.mxu1 %v7866_v17  ;;  %7047 = vmatprep.subr.bf16.mxu0 %v8042_v45  ;;  %v8055_v17 = vcombine.low %v2812_v52, %v2816_v60  ;;  %v7880_v45 = vcombine.high %v1562_v15, %v1566_v16  ;;  %v8056_v18 = vcombine.high %v2820_v21, %v2824_v8  ;;  %v1354_v52 = vld [vmem:[#allocation11 + $0xe0] sm:$0xff]  ;;  %v2805_v60 = vld [vmem:[#allocation11 + $0x6d8] sm:$0xff] }
 0x333   :  { %6697 = vmatpush1.bf16.msra.mxu1 %v7867_v12  ;;  %7049 = vmatpush1.bf16.msra.mxu0 %v8043_v5  ;;  %v2832_v12 = vld [vmem:[#allocation11 + $0x7b0] sm:$0xff]  ;;  %v7881_v5 = vcombine.low %v1562_v15, %v1566_v16  ;;  %v1358_v15 = vld [vmem:[#allocation11 + $0x100] sm:$0xff] }
 0x334   :  { %6699 = vmatprep.subr.bf16.mxu1 %v7868_v10  ;;  %7051 = vmatprep.subr.bf16.mxu0 %v8044_v37  ;;  %v8057_v10 = vcombine.low %v2820_v21, %v2824_v8  ;;  %v7882_v37 = vcombine.high %v1570_v20, %v1574_v19  ;;  %v8058_v46 = vcombine.high %v2828_v9, %v2832_v12  ;;  %v1362_v16 = vld [vmem:[#allocation11 + $0x120] sm:$0xff]  ;;  %v2813_v21 = vld [vmem:[#allocation11 + $0x718] sm:$0xff] }
 0x335   :  { %v2817_v8 = vld [vmem:[#allocation11 + $0x738] sm:$0xff] }
 0x337   :  { %6701 = vmatpush1.bf16.msra.mxu1 %v7869_v27  ;;  %7053 = vmatpush1.bf16.msra.mxu0 %v8045_v29  ;;  %v2840_v27 = vld [vmem:[#allocation11 + $0x7f0] sm:$0xff]  ;;  %v7883_v29 = vcombine.low %v1570_v20, %v1574_v19  ;;  %v1366_v20 = vld [vmem:[#allocation11 + $0x140] sm:$0xff] }
 0x338   :  { %6703 = vmatprep.subr.bf16.mxu1 %v7870_v30  ;;  %7055 = vmatprep.subr.bf16.mxu0 %v8046_v31  ;;  %v8059_v30 = vcombine.low %v2828_v9, %v2832_v12  ;;  %v7884_v31 = vcombine.high %v1578_v2, %v1582_v13  ;;  %v8060_v32 = vcombine.high %v2836_v26, %v2840_v27  ;;  %v1370_v19 = vld [vmem:[#allocation11 + $0x160] sm:$0xff]  ;;  %v2821_v9 = vld [vmem:[#allocation11 + $0x758] sm:$0xff] }
 0x339   :  { %v2825_v12 = vld [vmem:[#allocation11 + $0x778] sm:$0xff] }
 0x33a   :  { %1924 = vmatmul.mubr.f32.vlgmr.msra.gmra.mrb[30].mxu1 %v9016_v22  ;;  %3110 = vmatmul.mubr.f32.vlgmr.msra.gmra.mrb[10].mxu0 %v9022_v33 }
 0x33b   :  { %6705 = vmatpush1.bf16.msra.mxu1 %v7871_v43  ;;  %7057 = vmatpush1.bf16.msra.mxu0 %v8047_v44  ;;  %v2785_v43 = vld [vmem:[#allocation11 + $0x638] sm:$0xff]  ;;  %v7885_v44 = vcombine.low %v1578_v2, %v1582_v13  ;;  %v1374_v2 = vld [vmem:[#allocation11 + $0x180] sm:$0xff] }
 0x33c   :  { %6707 = vmatprep.subr.bf16.mxu1 %v7872_v47  ;;  %7059 = vmatprep.subr.bf16.mxu0 %v8048_v48  ;;  %v8061_v47 = vcombine.low %v2836_v26, %v2840_v27  ;;  %v7886_v48 = vcombine.high %v1326_v35, %v1330_v39  ;;  %v8062_v51 = vcombine.high %v2781_v41, %v2785_v43  ;;  %v1378_v13 = vld [vmem:[#allocation11 + $0x1a0] sm:$0xff]  ;;  %v2829_v26 = vld [vmem:[#allocation11 + $0x798] sm:$0xff] }
 0x33d   :  { %1994 = vmatprep.mubr.f32.mxu1 %v8553_v1  ;;  %3180 = vmatprep.mubr.f32.mxu0 %v8553_v1  ;;  %v2833_v27 = vld [vmem:[#allocation11 + $0x7b8] sm:$0xff] }
 0x33f   :  { %6709 = vmatpush1.bf16.msra.mxu1 %v7873_v56  ;;  %7061 = vmatpush1.bf16.msra.mxu0 %v8049_v57  ;;  %v2793_v56 = vld [vmem:[#allocation11 + $0x678] sm:$0xff]  ;;  %v7887_v57 = vcombine.low %v1326_v35, %v1330_v39  ;;  %v1382_v35 = vld [vmem:[#allocation11 + $0x1c0] sm:$0xff] }
 0x340   :  { %6711 = vmatprep.subr.bf16.mxu1 %v7874_v59  ;;  %7063 = vmatprep.subr.bf16.mxu0 %v8050_v28  ;;  %v8063_v59 = vcombine.low %v2781_v41, %v2785_v43  ;;  %v7888_v28 = vcombine.high %v1334_v53, %v1338_v54  ;;  %v8064_v49 = vcombine.high %v2789_v55, %v2793_v56  ;;  %v1386_v39 = vld [vmem:[#allocation11 + $0x1e0] sm:$0xff]  ;;  %v2837_v41 = vld [vmem:[#allocation11 + $0x7d8] sm:$0xff] }
 0x341   :  { %v2841_v43 = vld [vmem:[#allocation11 + $0x7f8] sm:$0xff] }
 0x343   :  { %6713 = vmatpush1.bf16.msra.mxu1 %v7875_v61  ;;  %7065 = vmatpush1.bf16.msra.mxu0 %v8051_v62  ;;  %v2801_v61 = vld [vmem:[#allocation11 + $0x6b8] sm:$0xff]  ;;  %v7889_v62 = vcombine.low %v1334_v53, %v1338_v54  ;;  %v1327_v53 = vld [vmem:[#allocation11 + $0x8] sm:$0xff] }
 0x344   :  { %6715 = vmatprep.subr.bf16.mxu1 %v7876_v63  ;;  %7067 = vmatprep.subr.bf16.mxu0 %v8052_v58  ;;  %v8065_v63 = vcombine.low %v2789_v55, %v2793_v56  ;;  %v7890_v58 = vcombine.high %v1342_v34, %v1346_v42  ;;  %v8066_v6 = vcombine.high %v2797_v50, %v2801_v61  ;;  %v1331_v54 = vld [vmem:[#allocation11 + $0x28] sm:$0xff]  ;;  %v3267_v55 = vld [vmem:[#allocation11 + $0x800] sm:$0xff] }
 0x345   :  { %v3271_v56 = vld [vmem:[#allocation11 + $0x820] sm:$0xff] }
 0x347   :  { %6717 = vmatpush1.bf16.msra.mxu1 %v7877_v7  ;;  %7069 = vmatpush1.bf16.msra.mxu0 %v8053_v14  ;;  %v2809_v7 = vld [vmem:[#allocation11 + $0x6f8] sm:$0xff]  ;;  %v8067_v14 = vcombine.low %v2797_v50, %v2801_v61  ;;  %v3275_v50 = vld [vmem:[#allocation11 + $0x840] sm:$0xff] }
 0x348   :  { %6719 = vmatprep.subr.bf16.mxu1 %v7878_v11  ;;  %7071 = vmatprep.subr.bf16.mxu0 %v8054_v3  ;;  %v7892_v11 = vcombine.high %v1350_v40, %v1354_v52  ;;  %v8068_v3 = vcombine.high %v2805_v60, %v2809_v7  ;;  %v3279_v61 = vld [vmem:[#allocation11 + $0x860] sm:$0xff] }
 0x34b   :  { %6721 = vmatpush1.bf16.msra.mxu1 %v7879_v0  ;;  %7073 = vmatpush1.bf16.msra.mxu0 %v8055_v17  ;;  %v7893_v0 = vcombine.low %v1350_v40, %v1354_v52  ;;  %v8069_v17 = vcombine.low %v2805_v60, %v2809_v7  ;;  %v1343_v40 = vld [vmem:[#allocation11 + $0x88] sm:$0xff]  ;;  %v3283_v60 = vld [vmem:[#allocation11 + $0x880] sm:$0xff] }
 0x34c   :  { %6723 = vmatprep.subr.bf16.mxu1 %v7880_v45  ;;  %7075 = vmatprep.subr.bf16.mxu0 %v8056_v18  ;;  %v7894_v45 = vcombine.high %v1358_v15, %v1362_v16  ;;  %v8070_v18 = vcombine.high %v2813_v21, %v2817_v8  ;;  %v1347_v52 = vld [vmem:[#allocation11 + $0xa8] sm:$0xff]  ;;  %v3287_v7 = vld [vmem:[#allocation11 + $0x8a0] sm:$0xff] }
 0x34f   :  { %6725 = vmatpush1.bf16.msra.mxu1 %v7881_v5  ;;  %7077 = vmatpush1.bf16.msra.mxu0 %v8057_v10  ;;  %v7895_v5 = vcombine.low %v1358_v15, %v1362_v16  ;;  %v8071_v10 = vcombine.low %v2813_v21, %v2817_v8  ;;  %v1351_v15 = vld [vmem:[#allocation11 + $0xc8] sm:$0xff]  ;;  %v3291_v21 = vld [vmem:[#allocation11 + $0x8c0] sm:$0xff] }
 0x350   :  { %6727 = vmatprep.subr.bf16.mxu1 %v7882_v37  ;;  %7079 = vmatprep.subr.bf16.mxu0 %v8058_v46  ;;  %v7896_v37 = vcombine.high %v1366_v20, %v1370_v19  ;;  %v8072_v46 = vcombine.high %v2821_v9, %v2825_v12  ;;  %v1355_v16 = vld [vmem:[#allocation11 + $0xe8] sm:$0xff]  ;;  %v3295_v8 = vld [vmem:[#allocation11 + $0x8e0] sm:$0xff] }
 0x353   :  { %6729 = vmatpush1.bf16.msra.mxu1 %v7883_v29  ;;  %7081 = vmatpush1.bf16.msra.mxu0 %v8059_v30  ;;  %v7897_v29 = vcombine.low %v1366_v20, %v1370_v19  ;;  %v8073_v30 = vcombine.low %v2821_v9, %v2825_v12  ;;  %v1363_v20 = vld [vmem:[#allocation11 + $0x128] sm:$0xff]  ;;  %v3299_v19 = vld [vmem:[#allocation11 + $0x900] sm:$0xff]  ;;  %v7909_v12 = vcombine.low %v1351_v15, %v1355_v16 }
 0x354   :  { %6731 = vmatprep.subr.bf16.mxu1 %v7884_v31  ;;  %7083 = vmatprep.subr.bf16.mxu0 %v8060_v32  ;;  %v7898_v31 = vcombine.high %v1374_v2, %v1378_v13  ;;  %v8074_v32 = vcombine.high %v2829_v26, %v2833_v27  ;;  %v3303_v9 = vld [vmem:[#allocation11 + $0x920] sm:$0xff] }
 0x357   :  { %6733 = vmatpush1.bf16.msra.mxu1 %v7885_v44  ;;  %7085 = vmatpush1.bf16.msra.mxu0 %v8061_v47  ;;  %v7899_v44 = vcombine.low %v1374_v2, %v1378_v13  ;;  %v8075_v47 = vcombine.low %v2829_v26, %v2833_v27  ;;  %v1371_v2 = vld [vmem:[#allocation11 + $0x168] sm:$0xff]  ;;  %v3307_v13 = vld [vmem:[#allocation11 + $0x940] sm:$0xff] }
 0x358   :  { %6735 = vmatprep.subr.bf16.mxu1 %v7886_v48  ;;  %7087 = vmatprep.subr.bf16.mxu0 %v8062_v51  ;;  %v7900_v48 = vcombine.high %v1382_v35, %v1386_v39  ;;  %v8076_v51 = vcombine.high %v2837_v41, %v2841_v43  ;;  %v3311_v26 = vld [vmem:[#allocation11 + $0x960] sm:$0xff] }
 0x35a   :  { %1995 = vmatmul.mubr.f32.vlgmr.msra.gmra.mrb[32].mxu1 %v9016_v22  ;;  %3181 = vmatmul.mubr.f32.vlgmr.msra.gmra.mrb[12].mxu0 %v9022_v33  ;;  %v7891_v22 = vcombine.low %v1342_v34, %v1346_v42  ;;  %v1335_v34 = vld [vmem:[#allocation11 + $0x48] sm:$0xff] }
 0x35b   :  { %6737 = vmatpush1.bf16.msra.mxu1 %v7887_v57  ;;  %7089 = vmatpush1.bf16.msra.mxu0 %v8063_v59  ;;  %v7901_v57 = vcombine.low %v1382_v35, %v1386_v39  ;;  %v8077_v59 = vcombine.low %v2837_v41, %v2841_v43  ;;  %v1339_v42 = vld [vmem:[#allocation11 + $0x68] sm:$0xff]  ;;  %v3315_v39 = vld [vmem:[#allocation11 + $0x980] sm:$0xff] }
 0x35c   :  { %6739 = vmatprep.subr.bf16.mxu1 %v7888_v28  ;;  %7091 = vmatprep.subr.bf16.mxu0 %v8064_v49  ;;  %v7902_v28 = vcombine.high %v1327_v53, %v1331_v54  ;;  %v8078_v49 = vcombine.high %v3267_v55, %v3271_v56  ;;  %v1379_v35 = vld [vmem:[#allocation11 + $0x1a8] sm:$0xff]  ;;  %v3319_v41 = vld [vmem:[#allocation11 + $0x9a0] sm:$0xff] }
 0x35d   :  { %2068 = vmatprep.mubr.f32.mxu1 %v8553_v1  ;;  %3251 = vmatprep.mubr.f32.mxu0 %v8553_v1 }
 0x35f   :  { %6741 = vmatpush1.bf16.msra.mxu1 %v7889_v62  ;;  %7093 = vmatpush1.bf16.msra.mxu0 %v8065_v63  ;;  %v7903_v62 = vcombine.low %v1327_v53, %v1331_v54  ;;  %v8079_v63 = vcombine.low %v3267_v55, %v3271_v56  ;;  %v1387_v53 = vld [vmem:[#allocation11 + $0x1e8] sm:$0xff]  ;;  %v3323_v54 = vld [vmem:[#allocation11 + $0x9c0] sm:$0xff] }
 0x360   :  { %6743 = vmatprep.subr.bf16.mxu1 %v7890_v58  ;;  %7095 = vmatprep.subr.bf16.mxu0 %v8066_v6  ;;  %v7904_v58 = vcombine.high %v1335_v34, %v1339_v42  ;;  %v8080_v6 = vcombine.high %v3275_v50, %v3279_v61  ;;  %v3327_v55 = vld [vmem:[#allocation11 + $0x9e0] sm:$0xff] }
 0x363   :  { %6745 = vmatpush1.bf16.msra.mxu1 %v7891_v22  ;;  %7097 = vmatpush1.bf16.msra.mxu0 %v8067_v14  ;;  %v7905_v22 = vcombine.low %v1335_v34, %v1339_v42  ;;  %v8081_v14 = vcombine.low %v3275_v50, %v3279_v61  ;;  %v1332_v34 = vld [vmem:[#allocation11 + $0x30] sm:$0xff]  ;;  %v3268_v42 = vld [vmem:[#allocation11 + $0x808] sm:$0xff] }
 0x364   :  { %6747 = vmatprep.subr.bf16.mxu1 %v7892_v11  ;;  %7099 = vmatprep.subr.bf16.mxu0 %v8068_v3  ;;  %v7906_v11 = vcombine.high %v1343_v40, %v1347_v52  ;;  %v8082_v3 = vcombine.high %v3283_v60, %v3287_v7  ;;  %v3272_v50 = vld [vmem:[#allocation11 + $0x828] sm:$0xff] }
 0x367   :  { %6749 = vmatpush1.bf16.msra.mxu1 %v7893_v0  ;;  %7101 = vmatpush1.bf16.msra.mxu0 %v8069_v17  ;;  %v7907_v0 = vcombine.low %v1343_v40, %v1347_v52  ;;  %v7908_v17 = vcombine.high %v1351_v15, %v1355_v16  ;;  %v1340_v40 = vld [vmem:[#allocation11 + $0x70] sm:$0xff]  ;;  %v3276_v52 = vld [vmem:[#allocation11 + $0x848] sm:$0xff] }
 0x368   :  { %6751 = vmatprep.subr.bf16.mxu1 %v7894_v45  ;;  %7103 = vmatprep.subr.bf16.mxu0 %v8070_v18  ;;  %v8084_v45 = vcombine.high %v3291_v21, %v3295_v8  ;;  %v1359_v18 = vld [vmem:[#allocation11 + $0x108] sm:$0xff]  ;;  %v1348_v15 = vld [vmem:[#allocation11 + $0xb0] sm:$0xff] }
 0x369   :  { %v7911_v27 = vcombine.low %v1359_v18, %v1363_v20  ;;  %v3284_v16 = vld [vmem:[#allocation11 + $0x888] sm:$0xff] }
 0x36b   :  { %6753 = vmatpush1.bf16.msra.mxu1 %v7895_v5  ;;  %7105 = vmatpush1.bf16.msra.mxu0 %v8071_v10  ;;  %v8085_v5 = vcombine.low %v3291_v21, %v3295_v8  ;;  %v7910_v10 = vcombine.high %v1359_v18, %v1363_v20  ;;  %v3288_v21 = vld [vmem:[#allocation11 + $0x8a8] sm:$0xff]  ;;  %v1356_v18 = vld [vmem:[#allocation11 + $0xf0] sm:$0xff] }
 0x36c   :  { %6755 = vmatprep.subr.bf16.mxu1 %v7896_v37  ;;  %7107 = vmatprep.subr.bf16.mxu0 %v8072_v46  ;;  %v8086_v37 = vcombine.high %v3299_v19, %v3303_v9  ;;  %v1367_v46 = vld [vmem:[#allocation11 + $0x148] sm:$0xff] }
 0x36d   :  { %v7913_v43 = vcombine.low %v1367_v46, %v1371_v2  ;;  %v3292_v20 = vld [vmem:[#allocation11 + $0x8c8] sm:$0xff] }
 0x36f   :  { %6757 = vmatpush1.bf16.msra.mxu1 %v7897_v29  ;;  %7109 = vmatpush1.bf16.msra.mxu0 %v8073_v30  ;;  %v8087_v29 = vcombine.low %v3299_v19, %v3303_v9  ;;  %v7912_v30 = vcombine.high %v1367_v46, %v1371_v2  ;;  %v3296_v19 = vld [vmem:[#allocation11 + $0x8e8] sm:$0xff]  ;;  %v1364_v46 = vld [vmem:[#allocation11 + $0x130] sm:$0xff] }
 0x370   :  { %6759 = vmatprep.subr.bf16.mxu1 %v7898_v31  ;;  %7111 = vmatprep.subr.bf16.mxu0 %v8074_v32  ;;  %v8088_v31 = vcombine.high %v3307_v13, %v3311_v26  ;;  %v1375_v32 = vld [vmem:[#allocation11 + $0x188] sm:$0xff] }
 0x371   :  { %v7915_v56 = vcombine.low %v1375_v32, %v1379_v35  ;;  %v3300_v2 = vld [vmem:[#allocation11 + $0x908] sm:$0xff] }
 0x373   :  { %6761 = vmatpush1.bf16.msra.mxu1 %v7899_v44  ;;  %7113 = vmatpush1.bf16.msra.mxu0 %v8075_v47  ;;  %v8089_v44 = vcombine.low %v3307_v13, %v3311_v26  ;;  %v7914_v47 = vcombine.high %v1375_v32, %v1379_v35  ;;  %v3304_v13 = vld [vmem:[#allocation11 + $0x928] sm:$0xff]  ;;  %v1372_v32 = vld [vmem:[#allocation11 + $0x170] sm:$0xff] }
 0x374   :  { %6763 = vmatprep.subr.bf16.mxu1 %v7900_v48  ;;  %7115 = vmatprep.subr.bf16.mxu0 %v8076_v51  ;;  %v8090_v48 = vcombine.high %v3315_v39, %v3319_v41  ;;  %v1383_v51 = vld [vmem:[#allocation11 + $0x1c8] sm:$0xff] }
 0x375   :  { %v7917_v61 = vcombine.low %v1383_v51, %v1387_v53  ;;  %v3308_v35 = vld [vmem:[#allocation11 + $0x948] sm:$0xff] }
 0x377   :  { %6765 = vmatpush1.bf16.msra.mxu1 %v7901_v57  ;;  %7117 = vmatpush1.bf16.msra.mxu0 %v8077_v59  ;;  %v8091_v57 = vcombine.low %v3315_v39, %v3319_v41  ;;  %v7916_v59 = vcombine.high %v1383_v51, %v1387_v53  ;;  %v3312_v39 = vld [vmem:[#allocation11 + $0x968] sm:$0xff]  ;;  %v1380_v51 = vld [vmem:[#allocation11 + $0x1b0] sm:$0xff] }
 0x378   :  { %6767 = vmatprep.subr.bf16.mxu1 %v7902_v28  ;;  %7119 = vmatprep.subr.bf16.mxu0 %v8078_v49  ;;  %v8092_v28 = vcombine.high %v3323_v54, %v3327_v55  ;;  %v1328_v49 = vld [vmem:[#allocation11 + $0x10] sm:$0xff]  ;;  %v3316_v53 = vld [vmem:[#allocation11 + $0x988] sm:$0xff] }
 0x37a   :  { %2069 = vmatmul.mubr.f32.vlgmr.msra.gmra.mrb[26].mxu1 %v9013_v4  ;;  %3252 = vmatmul.mubr.f32.vlgmr.msra.gmra.mrb[6].mxu0 %v9022_v33  ;;  %v8083_v33 = vcombine.low %v3283_v60, %v3287_v7  ;;  %v3280_v60 = vld [vmem:[#allocation11 + $0x868] sm:$0xff]  ;;  %v7919_v7 = vcombine.low %v1328_v49, %v1332_v34 }
 0x37b   :  { %6769 = vmatpush1.bf16.msra.mxu1 %v7903_v62  ;;  %7121 = vmatpush1.bf16.msra.mxu0 %v8079_v63  ;;  %v8093_v62 = vcombine.low %v3323_v54, %v3327_v55  ;;  %v7918_v63 = vcombine.high %v1328_v49, %v1332_v34  ;;  %v3320_v54 = vld [vmem:[#allocation11 + $0x9a8] sm:$0xff]  ;;  %v1388_v49 = vld [vmem:[#allocation11 + $0x1f0] sm:$0xff] }
 0x37c   :  { %6771 = vmatprep.subr.bf16.mxu1 %v7904_v58  ;;  %7123 = vmatprep.subr.bf16.mxu0 %v8080_v6  ;;  %v8094_v58 = vcombine.high %v3268_v42, %v3272_v50  ;;  %v1336_v6 = vld [vmem:[#allocation11 + $0x50] sm:$0xff]  ;;  %v3324_v34 = vld [vmem:[#allocation11 + $0x9c8] sm:$0xff] }
 0x37d   :  { %2139 = vmatprep.mubr.f32.mxu1 %v8553_v1  ;;  %3527 = vmatprep.mubr.f32.mxu0 %v8553_v1  ;;  %v7921_v8 = vcombine.low %v1336_v6, %v1340_v40 }
 0x37f   :  { %6773 = vmatpush1.bf16.msra.mxu1 %v7905_v22  ;;  %7125 = vmatpush1.bf16.msra.mxu0 %v8081_v14  ;;  %v8095_v22 = vcombine.low %v3268_v42, %v3272_v50  ;;  %v7920_v14 = vcombine.high %v1336_v6, %v1340_v40  ;;  %v3328_v42 = vld [vmem:[#allocation11 + $0x9e8] sm:$0xff]  ;;  %v1333_v6 = vld [vmem:[#allocation11 + $0x38] sm:$0xff]  ;;  %v3269_v40 = vld [vmem:[#allocation11 + $0x810] sm:$0xff] }
 0x380   :  { %6775 = vmatprep.subr.bf16.mxu1 %v7906_v11  ;;  %7127 = vmatprep.subr.bf16.mxu0 %v8082_v3  ;;  %v8096_v11 = vcombine.high %v3276_v52, %v3280_v60  ;;  %v1344_v3 = vld [vmem:[#allocation11 + $0x90] sm:$0xff] }
 0x381   :  { %v7923_v9 = vcombine.low %v1344_v3, %v1348_v15 }
 0x383   :  { %6777 = vmatpush1.bf16.msra.mxu1 %v7907_v0  ;;  %7129 = vmatpush1.bf16.msra.mxu0 %v8083_v33  ;;  %v8097_v0 = vcombine.low %v3276_v52, %v3280_v60  ;;  %v7922_v33 = vcombine.high %v1344_v3, %v1348_v15  ;;  %v3273_v52 = vld [vmem:[#allocation11 + $0x830] sm:$0xff]  ;;  %v1341_v3 = vld [vmem:[#allocation11 + $0x78] sm:$0xff] }
 0x384   :  { %6779 = vmatprep.subr.bf16.mxu1 %v7908_v17  ;;  %7131 = vmatprep.subr.bf16.mxu0 %v8084_v45  ;;  %v8098_v17 = vcombine.high %v3284_v16, %v3288_v21  ;;  %v1352_v45 = vld [vmem:[#allocation11 + $0xd0] sm:$0xff] }
 0x385   :  { %v7925_v26 = vcombine.low %v1352_v45, %v1356_v18  ;;  %v3277_v15 = vld [vmem:[#allocation11 + $0x850] sm:$0xff] }
 0x387   :  { %6781 = vmatpush1.bf16.msra.mxu1 %v7909_v12  ;;  %7133 = vmatpush1.bf16.msra.mxu0 %v8085_v5  ;;  %v8099_v12 = vcombine.low %v3284_v16, %v3288_v21  ;;  %v7924_v5 = vcombine.high %v1352_v45, %v1356_v18  ;;  %v3281_v16 = vld [vmem:[#allocation11 + $0x870] sm:$0xff]  ;;  %v1349_v45 = vld [vmem:[#allocation11 + $0xb8] sm:$0xff] }
 0x388   :  { %6783 = vmatprep.subr.bf16.mxu1 %v7910_v10  ;;  %7135 = vmatprep.subr.bf16.mxu0 %v8086_v37  ;;  %v8100_v10 = vcombine.high %v3292_v20, %v3296_v19  ;;  %v1360_v37 = vld [vmem:[#allocation11 + $0x110] sm:$0xff] }
 0x389   :  { %v7927_v41 = vcombine.low %v1360_v37, %v1364_v46  ;;  %v3285_v18 = vld [vmem:[#allocation11 + $0x890] sm:$0xff] }
 0x38b   :  { %6785 = vmatpush1.bf16.msra.mxu1 %v7911_v27  ;;  %7137 = vmatpush1.bf16.msra.mxu0 %v8087_v29  ;;  %v8101_v27 = vcombine.low %v3292_v20, %v3296_v19  ;;  %v7926_v29 = vcombine.high %v1360_v37, %v1364_v46  ;;  %v3289_v20 = vld [vmem:[#allocation11 + $0x8b0] sm:$0xff]  ;;  %v1357_v37 = vld [vmem:[#allocation11 + $0xf8] sm:$0xff] }
 0x38c   :  { %6787 = vmatprep.subr.bf16.mxu1 %v7912_v30  ;;  %7139 = vmatprep.subr.bf16.mxu0 %v8088_v31  ;;  %v8102_v30 = vcombine.high %v3300_v2, %v3304_v13  ;;  %v1368_v31 = vld [vmem:[#allocation11 + $0x150] sm:$0xff] }
 0x38d   :  { %v7929_v55 = vcombine.low %v1368_v31, %v1372_v32  ;;  %v3293_v46 = vld [vmem:[#allocation11 + $0x8d0] sm:$0xff] }
 0x38f   :  { %6789 = vmatpush1.bf16.msra.mxu1 %v7913_v43  ;;  %7141 = vmatpush1.bf16.msra.mxu0 %v8089_v44  ;;  %v8103_v43 = vcombine.low %v3300_v2, %v3304_v13  ;;  %v7928_v44 = vcombine.high %v1368_v31, %v1372_v32  ;;  %v3297_v2 = vld [vmem:[#allocation11 + $0x8f0] sm:$0xff]  ;;  %v1365_v31 = vld [vmem:[#allocation11 + $0x138] sm:$0xff] }
 0x390   :  { %6791 = vmatprep.subr.bf16.mxu1 %v7914_v47  ;;  %7143 = vmatprep.subr.bf16.mxu0 %v8090_v48  ;;  %v8104_v47 = vcombine.high %v3308_v35, %v3312_v39  ;;  %v1376_v48 = vld [vmem:[#allocation11 + $0x190] sm:$0xff] }
 0x391   :  { %v7931_v50 = vcombine.low %v1376_v48, %v1380_v51  ;;  %v3301_v32 = vld [vmem:[#allocation11 + $0x910] sm:$0xff] }
 0x393   :  { %6793 = vmatpush1.bf16.msra.mxu1 %v7915_v56  ;;  %7145 = vmatpush1.bf16.msra.mxu0 %v8091_v57  ;;  %v8105_v56 = vcombine.low %v3308_v35, %v3312_v39  ;;  %v7930_v57 = vcombine.high %v1376_v48, %v1380_v51  ;;  %v3305_v35 = vld [vmem:[#allocation11 + $0x930] sm:$0xff]  ;;  %v1373_v48 = vld [vmem:[#allocation11 + $0x178] sm:$0xff] }
 0x394   :  { %6795 = vmatprep.subr.bf16.mxu1 %v7916_v59  ;;  %7147 = vmatprep.subr.bf16.mxu0 %v8092_v28  ;;  %v8106_v59 = vcombine.high %v3316_v53, %v3320_v54  ;;  %v1384_v28 = vld [vmem:[#allocation11 + $0x1d0] sm:$0xff] }
 0x395   :  { %v7933_v60 = vcombine.low %v1384_v28, %v1388_v49  ;;  %v3309_v51 = vld [vmem:[#allocation11 + $0x950] sm:$0xff] }
 0x397   :  { %6797 = vmatpush1.bf16.msra.mxu1 %v7917_v61  ;;  %7149 = vmatpush1.bf16.msra.mxu0 %v8093_v62  ;;  %v8107_v61 = vcombine.low %v3316_v53, %v3320_v54  ;;  %v7932_v62 = vcombine.high %v1384_v28, %v1388_v49  ;;  %v3313_v53 = vld [vmem:[#allocation11 + $0x970] sm:$0xff]  ;;  %v1381_v28 = vld [vmem:[#allocation11 + $0x1b8] sm:$0xff] }
 0x398   :  { %6799 = vmatprep.subr.bf16.mxu1 %v7918_v63  ;;  %7151 = vmatprep.subr.bf16.mxu0 %v8094_v58  ;;  %v8108_v63 = vcombine.high %v3324_v34, %v3328_v42  ;;  %v1329_v58 = vld [vmem:[#allocation11 + $0x18] sm:$0xff]  ;;  %v3317_v49 = vld [vmem:[#allocation11 + $0x990] sm:$0xff] }
 0x399   :  { %v7935_v21 = vcombine.low %v1329_v58, %v1333_v6 }
 0x39a   :  { %2140 = vmatmul.mubr.f32.vlgmr.msra.gmra.mrb[28].mxu1 %v9013_v4  ;;  %3528 = vmatmul.mubr.f32.vlgmr.msra.gmra.mrb[8].mxu0 %v9025_v24 }
 0x39b   :  { %6801 = vmatpush1.bf16.msra.mxu1 %v7919_v7  ;;  %7153 = vmatpush1.bf16.msra.mxu0 %v8095_v22  ;;  %v8109_v7 = vcombine.low %v3324_v34, %v3328_v42  ;;  %v7934_v22 = vcombine.high %v1329_v58, %v1333_v6  ;;  %v3321_v34 = vld [vmem:[#allocation11 + $0x9b0] sm:$0xff]  ;;  %v1389_v58 = vld [vmem:[#allocation11 + $0x1f8] sm:$0xff] }
 0x39c   :  { %6803 = vmatprep.subr.bf16.mxu1 %v7920_v14  ;;  %7155 = vmatprep.subr.bf16.mxu0 %v8096_v11  ;;  %v8110_v14 = vcombine.high %v3269_v40, %v3273_v52  ;;  %v1337_v11 = vld [vmem:[#allocation11 + $0x58] sm:$0xff]  ;;  %v3325_v6 = vld [vmem:[#allocation11 + $0x9d0] sm:$0xff] }
 0x39d   :  { %2210 = vmatprep.mubr.f32.mxu1 %v8553_v1  ;;  %3598 = vmatprep.mubr.f32.mxu0 %v8553_v1  ;;  %v7937_v19 = vcombine.low %v1337_v11, %v1341_v3 }
 0x39f   :  { %6805 = vmatpush1.bf16.msra.mxu1 %v7921_v8  ;;  %7157 = vmatpush1.bf16.msra.mxu0 %v8097_v0  ;;  %v8111_v8 = vcombine.low %v3269_v40, %v3273_v52  ;;  %v7936_v0 = vcombine.high %v1337_v11, %v1341_v3  ;;  %v3329_v40 = vld [vmem:[#allocation11 + $0x9f0] sm:$0xff]  ;;  %v2293_v11 = vld [vmem:[#allocation11 + $0x420] sm:$0xff]  ;;  %v3270_v3 = vld [vmem:[#allocation11 + $0x818] sm:$0xff] }
 0x3a0   :  { %6807 = vmatprep.subr.bf16.mxu1 %v7922_v33  ;;  %7159 = vmatprep.subr.bf16.mxu0 %v8098_v17  ;;  %v8112_v33 = vcombine.high %v3277_v15, %v3281_v16  ;;  %v1345_v17 = vld [vmem:[#allocation11 + $0x98] sm:$0xff] }
 0x3a1   :  { %v7939_v13 = vcombine.low %v1345_v17, %v1349_v45 }
 0x3a3   :  { %6809 = vmatpush1.bf16.msra.mxu1 %v7923_v9  ;;  %7161 = vmatpush1.bf16.msra.mxu0 %v8099_v12  ;;  %v8113_v9 = vcombine.low %v3277_v15, %v3281_v16  ;;  %v7938_v12 = vcombine.high %v1345_v17, %v1349_v45  ;;  %v3274_v15 = vld [vmem:[#allocation11 + $0x838] sm:$0xff]  ;;  %v2301_v17 = vld [vmem:[#allocation11 + $0x460] sm:$0xff] }
 0x3a4   :  { %6811 = vmatprep.subr.bf16.mxu1 %v7924_v5  ;;  %7163 = vmatprep.subr.bf16.mxu0 %v8100_v10  ;;  %v8114_v5 = vcombine.high %v3285_v18, %v3289_v20  ;;  %v1353_v10 = vld [vmem:[#allocation11 + $0xd8] sm:$0xff] }
 0x3a5   :  { %v7941_v39 = vcombine.low %v1353_v10, %v1357_v37  ;;  %v3278_v45 = vld [vmem:[#allocation11 + $0x858] sm:$0xff] }
 0x3a7   :  { %6813 = vmatpush1.bf16.msra.mxu1 %v7925_v26  ;;  %7165 = vmatpush1.bf16.msra.mxu0 %v8101_v27  ;;  %v8115_v26 = vcombine.low %v3285_v18, %v3289_v20  ;;  %v7940_v27 = vcombine.high %v1353_v10, %v1357_v37  ;;  %v3282_v18 = vld [vmem:[#allocation11 + $0x878] sm:$0xff]  ;;  %v2309_v10 = vld [vmem:[#allocation11 + $0x4a0] sm:$0xff] }
 0x3a8   :  { %6815 = vmatprep.subr.bf16.mxu1 %v7926_v29  ;;  %7167 = vmatprep.subr.bf16.mxu0 %v8102_v30  ;;  %v8116_v29 = vcombine.high %v3293_v46, %v3297_v2  ;;  %v1361_v30 = vld [vmem:[#allocation11 + $0x118] sm:$0xff] }
 0x3a9   :  { %v7943_v54 = vcombine.low %v1361_v30, %v1365_v31  ;;  %v3286_v37 = vld [vmem:[#allocation11 + $0x898] sm:$0xff] }
 0x3ab   :  { %6817 = vmatpush1.bf16.msra.mxu1 %v7927_v41  ;;  %7169 = vmatpush1.bf16.msra.mxu0 %v8103_v43  ;;  %v8117_v41 = vcombine.low %v3293_v46, %v3297_v2  ;;  %v7942_v43 = vcombine.high %v1361_v30, %v1365_v31  ;;  %v3290_v46 = vld [vmem:[#allocation11 + $0x8b8] sm:$0xff]  ;;  %v2317_v30 = vld [vmem:[#allocation11 + $0x4e0] sm:$0xff] }
 0x3ac   :  { %6819 = vmatprep.subr.bf16.mxu1 %v7928_v44  ;;  %7171 = vmatprep.subr.bf16.mxu0 %v8104_v47  ;;  %v8118_v44 = vcombine.high %v3301_v32, %v3305_v35  ;;  %v1369_v47 = vld [vmem:[#allocation11 + $0x158] sm:$0xff] }
 0x3ad   :  { %v7945_v42 = vcombine.low %v1369_v47, %v1373_v48  ;;  %v3294_v31 = vld [vmem:[#allocation11 + $0x8d8] sm:$0xff] }
 0x3af   :  { %6821 = vmatpush1.bf16.msra.mxu1 %v7929_v55  ;;  %7173 = vmatpush1.bf16.msra.mxu0 %v8105_v56  ;;  %v8119_v55 = vcombine.low %v3301_v32, %v3305_v35  ;;  %v7944_v56 = vcombine.high %v1369_v47, %v1373_v48  ;;  %v3298_v32 = vld [vmem:[#allocation11 + $0x8f8] sm:$0xff]  ;;  %v8131_v35 = vcombine.low %v3286_v37, %v3290_v46 }
 0x3b0   :  { %6823 = vmatprep.subr.bf16.mxu1 %v7930_v57  ;;  %7175 = vmatprep.subr.bf16.mxu0 %v8106_v59  ;;  %v8120_v57 = vcombine.high %v3309_v51, %v3313_v53  ;;  %v1377_v59 = vld [vmem:[#allocation11 + $0x198] sm:$0xff] }
 0x3b1   :  { %v7947_v52 = vcombine.low %v1377_v59, %v1381_v28  ;;  %v3302_v47 = vld [vmem:[#allocation11 + $0x918] sm:$0xff] }
 0x3b2   :  { %v3306_v48 = vld [vmem:[#allocation11 + $0x938] sm:$0xff] }
 0x3b3   :  { %6825 = vmatpush1.bf16.msra.mxu1 %v7931_v50  ;;  %7177 = vmatpush1.bf16.msra.mxu0 %v8107_v61  ;;  %v8121_v50 = vcombine.low %v3309_v51, %v3313_v53  ;;  %v7946_v61 = vcombine.high %v1377_v59, %v1381_v28  ;;  %v8133_v53 = vcombine.low %v3294_v31, %v3298_v32  ;;  %v3310_v59 = vld [vmem:[#allocation11 + $0x958] sm:$0xff] }
 0x3b4   :  { %6827 = vmatprep.subr.bf16.mxu1 %v7932_v62  ;;  %7179 = vmatprep.subr.bf16.mxu0 %v8108_v63  ;;  %v8122_v62 = vcombine.high %v3317_v49, %v3321_v34  ;;  %v1385_v63 = vld [vmem:[#allocation11 + $0x1d8] sm:$0xff] }
 0x3b5   :  { %v7949_v16 = vcombine.low %v1385_v63, %v1389_v58  ;;  %v3314_v28 = vld [vmem:[#allocation11 + $0x978] sm:$0xff] }
 0x3b7   :  { %6829 = vmatpush1.bf16.msra.mxu1 %v7933_v60  ;;  %7181 = vmatpush1.bf16.msra.mxu0 %v8109_v7  ;;  %v8123_v60 = vcombine.low %v3317_v49, %v3321_v34  ;;  %v7948_v7 = vcombine.high %v1385_v63, %v1389_v58  ;;  %v8135_v34 = vcombine.low %v3302_v47, %v3306_v48  ;;  %v3318_v63 = vld [vmem:[#allocation11 + $0x998] sm:$0xff] }
 0x3b8   :  { %6831 = vmatprep.subr.bf16.mxu1 %v7934_v22  ;;  %7183 = vmatprep.subr.bf16.mxu0 %v8110_v14  ;;  %v8124_v22 = vcombine.high %v3325_v6, %v3329_v40  ;;  %v2289_v14 = vld [vmem:[#allocation11 + $0x400] sm:$0xff]  ;;  %v3322_v58 = vld [vmem:[#allocation11 + $0x9b8] sm:$0xff] }
 0x3b9   :  { %v7951_v20 = vcombine.low %v2289_v14, %v2293_v11 }
 0x3ba   :  { %2211 = vmatmul.mubr.f32.vlgmr.msra.gmra.mrb[30].mxu1 %v9013_v4  ;;  %3599 = vmatmul.mubr.f32.vlgmr.msra.gmra.mrb[10].mxu0 %v9025_v24 }
 0x3bb   :  { %6833 = vmatpush1.bf16.msra.mxu1 %v7935_v21  ;;  %7185 = vmatpush1.bf16.msra.mxu0 %v8111_v8  ;;  %v8125_v21 = vcombine.low %v3325_v6, %v3329_v40  ;;  %v7950_v8 = vcombine.high %v2289_v14, %v2293_v11  ;;  %v8137_v40 = vcombine.low %v3310_v59, %v3314_v28  ;;  %v3326_v14 = vld [vmem:[#allocation11 + $0x9d8] sm:$0xff] }
 0x3bc   :  { %6835 = vmatprep.subr.bf16.mxu1 %v7936_v0  ;;  %7187 = vmatprep.subr.bf16.mxu0 %v8112_v33  ;;  %v8126_v0 = vcombine.high %v3270_v3, %v3274_v15  ;;  %v2297_v33 = vld [vmem:[#allocation11 + $0x440] sm:$0xff]  ;;  %v3330_v11 = vld [vmem:[#allocation11 + $0x9f8] sm:$0xff] }
 0x3bd   :  { %2281 = vmatprep.mubr.f32.mxu1 %v8553_v1  ;;  %3669 = vmatprep.mubr.f32.mxu0 %v8553_v1  ;;  %v7953_v2 = vcombine.low %v2297_v33, %v2301_v17 }
 0x3bf   :  { %6837 = vmatpush1.bf16.msra.mxu1 %v7937_v19  ;;  %7189 = vmatpush1.bf16.msra.mxu0 %v8113_v9  ;;  %v8127_v19 = vcombine.low %v3270_v3, %v3274_v15  ;;  %v7952_v9 = vcombine.high %v2297_v33, %v2301_v17  ;;  %v8139_v15 = vcombine.low %v3318_v63, %v3322_v58  ;;  %v3756_v33 = vld [vmem:[#allocation11 + $0xa00] sm:$0xff] }
 0x3c0   :  { %6839 = vmatprep.subr.bf16.mxu1 %v7938_v12  ;;  %7191 = vmatprep.subr.bf16.mxu0 %v8114_v5  ;;  %v8128_v12 = vcombine.high %v3278_v45, %v3282_v18  ;;  %v2305_v5 = vld [vmem:[#allocation11 + $0x480] sm:$0xff] }
 0x3c1   :  { %v3760_v17 = vld [vmem:[#allocation11 + $0xa20] sm:$0xff] }
 0x3c3   :  { %6841 = vmatpush1.bf16.msra.mxu1 %v7939_v13  ;;  %7193 = vmatpush1.bf16.msra.mxu0 %v8115_v26  ;;  %v8129_v13 = vcombine.low %v3278_v45, %v3282_v18  ;;  %v7954_v26 = vcombine.high %v2305_v5, %v2309_v10  ;;  %v8141_v18 = vcombine.low %v3326_v14, %v3330_v11 }
 0x3c4   :  { %6843 = vmatprep.subr.bf16.mxu1 %v7940_v27  ;;  %7195 = vmatprep.subr.bf16.mxu0 %v8116_v29  ;;  %v8130_v27 = vcombine.high %v3286_v37, %v3290_v46  ;;  %v2313_v29 = vld [vmem:[#allocation11 + $0x4c0] sm:$0xff]  ;;  %v8143_v46 = vcombine.low %v3756_v33, %v3760_v17 }
 0x3c5   :  { %v7957_v51 = vcombine.low %v2313_v29, %v2317_v30 }
 0x3c7   :  { %6845 = vmatpush1.bf16.msra.mxu1 %v7941_v39  ;;  %7197 = vmatpush1.bf16.msra.mxu0 %v8117_v41  ;;  %v7956_v39 = vcombine.high %v2313_v29, %v2317_v30  ;;  %v8132_v41 = vcombine.high %v3294_v31, %v3298_v32  ;;  %v3772_v29 = vld [vmem:[#allocation11 + $0xa80] sm:$0xff] }
 0x3c8   :  { %6847 = vmatprep.subr.bf16.mxu1 %v7942_v43  ;;  %7199 = vmatprep.subr.bf16.mxu0 %v8118_v44  ;;  %v2321_v43 = vld [vmem:[#allocation11 + $0x500] sm:$0xff] }
 0x3c9   :  { %v2325_v44 = vld [vmem:[#allocation11 + $0x520] sm:$0xff] }
 0x3ca   :  { %v7959_v49 = vcombine.low %v2321_v43, %v2325_v44  ;;  %v3776_v30 = vld [vmem:[#allocation11 + $0xaa0] sm:$0xff] }
 0x3cb   :  { %6849 = vmatpush1.bf16.msra.mxu1 %v7943_v54  ;;  %7201 = vmatpush1.bf16.msra.mxu0 %v8119_v55  ;;  %v7958_v54 = vcombine.high %v2321_v43, %v2325_v44  ;;  %v8134_v55 = vcombine.high %v3302_v47, %v3306_v48  ;;  %v3780_v43 = vld [vmem:[#allocation11 + $0xac0] sm:$0xff] }
 0x3cc   :  { %6851 = vmatprep.subr.bf16.mxu1 %v7944_v56  ;;  %7203 = vmatprep.subr.bf16.mxu0 %v8120_v57  ;;  %v2329_v56 = vld [vmem:[#allocation11 + $0x540] sm:$0xff] }
 0x3cd   :  { %v2333_v57 = vld [vmem:[#allocation11 + $0x560] sm:$0xff] }
 0x3ce   :  { %v7961_v6 = vcombine.low %v2329_v56, %v2333_v57  ;;  %v3784_v44 = vld [vmem:[#allocation11 + $0xae0] sm:$0xff] }
 0x3cf   :  { %6853 = vmatpush1.bf16.msra.mxu1 %v7945_v42  ;;  %7205 = vmatpush1.bf16.msra.mxu0 %v8121_v50  ;;  %v7960_v42 = vcombine.high %v2329_v56, %v2333_v57  ;;  %v8136_v50 = vcombine.high %v3310_v59, %v3314_v28  ;;  %v3792_v56 = vld [vmem:[#allocation11 + $0xb20] sm:$0xff]  ;;  %v8149_v59 = vcombine.low %v3780_v43, %v3784_v44 }
 0x3d0   :  { %6855 = vmatprep.subr.bf16.mxu1 %v7946_v61  ;;  %7207 = vmatprep.subr.bf16.mxu0 %v8122_v62  ;;  %v2337_v61 = vld [vmem:[#allocation11 + $0x580] sm:$0xff] }
 0x3d1   :  { %v2341_v62 = vld [vmem:[#allocation11 + $0x5a0] sm:$0xff] }
 0x3d2   :  { %v7963_v3 = vcombine.low %v2337_v61, %v2341_v62 }
 0x3d3   :  { %6857 = vmatpush1.bf16.msra.mxu1 %v7947_v52  ;;  %7209 = vmatpush1.bf16.msra.mxu0 %v8123_v60  ;;  %v7962_v52 = vcombine.high %v2337_v61, %v2341_v62  ;;  %v8138_v60 = vcombine.high %v3318_v63, %v3322_v58  ;;  %v3800_v61 = vld [vmem:[#allocation11 + $0xb60] sm:$0xff] }
 0x3d4   :  { %6859 = vmatprep.subr.bf16.mxu1 %v7948_v7  ;;  %7211 = vmatprep.subr.bf16.mxu0 %v8124_v22  ;;  %v2345_v7 = vld [vmem:[#allocation11 + $0x5c0] sm:$0xff] }
 0x3d5   :  { %v2349_v22 = vld [vmem:[#allocation11 + $0x5e0] sm:$0xff] }
 0x3d6   :  { %v7965_v45 = vcombine.low %v2345_v7, %v2349_v22 }
 0x3d7   :  { %6861 = vmatpush1.bf16.msra.mxu1 %v7949_v16  ;;  %7213 = vmatpush1.bf16.msra.mxu0 %v8125_v21  ;;  %v7964_v16 = vcombine.high %v2345_v7, %v2349_v22  ;;  %v8140_v21 = vcombine.high %v3326_v14, %v3330_v11  ;;  %v3808_v7 = vld [vmem:[#allocation11 + $0xba0] sm:$0xff] }
 0x3d8   :  { %6863 = vmatprep.subr.bf16.mxu1 %v7950_v8  ;;  %7215 = vmatprep.subr.bf16.mxu0 %v8126_v0  ;;  %v2290_v8 = vld [vmem:[#allocation11 + $0x408] sm:$0xff] }
 0x3d9   :  { %v2294_v0 = vld [vmem:[#allocation11 + $0x428] sm:$0xff] }
 0x3da   :  { %2282 = vmatmul.mubr.f32.vlgmr.msra.gmra.mrb[32].mxu1 %v9013_v4  ;;  %3670 = vmatmul.mubr.f32.vlgmr.msra.gmra.mrb[12].mxu0 %v9025_v24  ;;  %v7955_v4 = vcombine.low %v2305_v5, %v2309_v10  ;;  %v3764_v5 = vld [vmem:[#allocation11 + $0xa40] sm:$0xff]  ;;  %v7967_v37 = vcombine.low %v2290_v8, %v2294_v0 }
 0x3db   :  { %6865 = vmatpush1.bf16.msra.mxu1 %v7951_v20  ;;  %7217 = vmatpush1.bf16.msra.mxu0 %v8127_v19  ;;  %v7966_v20 = vcombine.high %v2290_v8, %v2294_v0  ;;  %v8142_v19 = vcombine.high %v3756_v33, %v3760_v17  ;;  %v3768_v10 = vld [vmem:[#allocation11 + $0xa60] sm:$0xff] }
 0x3dc   :  { %6867 = vmatprep.subr.bf16.mxu1 %v7952_v9  ;;  %7219 = vmatprep.subr.bf16.mxu0 %v8128_v12  ;;  %v2298_v9 = vld [vmem:[#allocation11 + $0x448] sm:$0xff]  ;;  %v8145_v32 = vcombine.low %v3764_v5, %v3768_v10  ;;  %v3816_v8 = vld [vmem:[#allocation11 + $0xbe0] sm:$0xff] }
 0x3dd   :  { %2549 = vmatprep.mubr.f32.mxu1 %v8553_v1  ;;  %3740 = vmatprep.mubr.f32.mxu0 %v8553_v1  ;;  %v2302_v12 = vld [vmem:[#allocation11 + $0x468] sm:$0xff] }
 0x3de   :  { %v7969_v31 = vcombine.low %v2298_v9, %v2302_v12 }
 0x3df   :  { %6869 = vmatpush1.bf16.msra.mxu1 %v7953_v2  ;;  %7221 = vmatpush1.bf16.msra.mxu0 %v8129_v13  ;;  %v7968_v2 = vcombine.high %v2298_v9, %v2302_v12  ;;  %v8144_v13 = vcombine.high %v3764_v5, %v3768_v10  ;;  %v3761_v9 = vld [vmem:[#allocation11 + $0xa28] sm:$0xff] }
 0x3e0   :  { %6871 = vmatprep.subr.bf16.mxu1 %v7954_v26  ;;  %7223 = vmatprep.subr.bf16.mxu0 %v8130_v27  ;;  %v2306_v26 = vld [vmem:[#allocation11 + $0x488] sm:$0xff] }
 0x3e1   :  { %v2310_v27 = vld [vmem:[#allocation11 + $0x4a8] sm:$0xff] }
 0x3e2   :  { %v7971_v47 = vcombine.low %v2306_v26, %v2310_v27 }
 0x3e3   :  { %6873 = vmatpush1.bf16.msra.mxu1 %v7955_v4  ;;  %7225 = vmatpush1.bf16.msra.mxu0 %v8131_v35  ;;  %v7970_v4 = vcombine.high %v2306_v26, %v2310_v27  ;;  %v8146_v35 = vcombine.high %v3772_v29, %v3776_v30  ;;  %v3769_v26 = vld [vmem:[#allocation11 + $0xa68] sm:$0xff] }
 0x3e4   :  { %6875 = vmatprep.subr.bf16.mxu1 %v7956_v39  ;;  %7227 = vmatprep.subr.bf16.mxu0 %v8132_v41  ;;  %v2314_v39 = vld [vmem:[#allocation11 + $0x4c8] sm:$0xff] }
 0x3e5   :  { %v2318_v41 = vld [vmem:[#allocation11 + $0x4e8] sm:$0xff] }
 0x3e6   :  { %v7972_v48 = vcombine.high %v2314_v39, %v2318_v41  ;;  %v7973_v57 = vcombine.low %v2314_v39, %v2318_v41  ;;  %v3777_v39 = vld [vmem:[#allocation11 + $0xaa8] sm:$0xff] }
 0x3e7   :  { %6877 = vmatpush1.bf16.msra.mxu1 %v7957_v51  ;;  %7229 = vmatpush1.bf16.msra.mxu0 %v8133_v53  ;;  %v8148_v51 = vcombine.high %v3780_v43, %v3784_v44  ;;  %v2322_v53 = vld [vmem:[#allocation11 + $0x508] sm:$0xff] }
 0x3e8   :  { %6879 = vmatprep.subr.bf16.mxu1 %v7958_v54  ;;  %7231 = vmatprep.subr.bf16.mxu0 %v8134_v55  ;;  %v2326_v54 = vld [vmem:[#allocation11 + $0x528] sm:$0xff]  ;;  %v3788_v55 = vld [vmem:[#allocation11 + $0xb00] sm:$0xff] }
 0x3e9   :  { %v7974_v28 = vcombine.high %v2322_v53, %v2326_v54  ;;  %v7975_v62 = vcombine.low %v2322_v53, %v2326_v54  ;;  %v8151_v63 = vcombine.low %v3788_v55, %v3792_v56  ;;  %v3785_v53 = vld [vmem:[#allocation11 + $0xae8] sm:$0xff] }
 0x3eb   :  { %6881 = vmatpush1.bf16.msra.mxu1 %v7959_v49  ;;  %7233 = vmatpush1.bf16.msra.mxu0 %v8135_v34  ;;  %v8150_v49 = vcombine.high %v3788_v55, %v3792_v56  ;;  %v2330_v34 = vld [vmem:[#allocation11 + $0x548] sm:$0xff] }
 0x3ec   :  { %6883 = vmatprep.subr.bf16.mxu1 %v7960_v42  ;;  %7235 = vmatprep.subr.bf16.mxu0 %v8136_v50  ;;  %v2334_v42 = vld [vmem:[#allocation11 + $0x568] sm:$0xff]  ;;  %v3796_v50 = vld [vmem:[#allocation11 + $0xb40] sm:$0xff] }
 0x3ed   :  { %v7976_v58 = vcombine.high %v2330_v34, %v2334_v42  ;;  %v7977_v22 = vcombine.low %v2330_v34, %v2334_v42  ;;  %v8153_v14 = vcombine.low %v3796_v50, %v3800_v61  ;;  %v3793_v34 = vld [vmem:[#allocation11 + $0xb28] sm:$0xff] }
 0x3ef   :  { %6885 = vmatpush1.bf16.msra.mxu1 %v7961_v6  ;;  %7237 = vmatpush1.bf16.msra.mxu0 %v8137_v40  ;;  %v8152_v6 = vcombine.high %v3796_v50, %v3800_v61  ;;  %v2338_v40 = vld [vmem:[#allocation11 + $0x588] sm:$0xff] }
 0x3f0   :  { %6887 = vmatprep.subr.bf16.mxu1 %v7962_v52  ;;  %7239 = vmatprep.subr.bf16.mxu0 %v8138_v60  ;;  %v2342_v52 = vld [vmem:[#allocation11 + $0x5a8] sm:$0xff]  ;;  %v3804_v60 = vld [vmem:[#allocation11 + $0xb80] sm:$0xff] }
 0x3f1   :  { %v7978_v11 = vcombine.high %v2338_v40, %v2342_v52  ;;  %v7979_v0 = vcombine.low %v2338_v40, %v2342_v52  ;;  %v8155_v33 = vcombine.low %v3804_v60, %v3808_v7  ;;  %v3801_v40 = vld [vmem:[#allocation11 + $0xb68] sm:$0xff] }
 0x3f3   :  { %6889 = vmatpush1.bf16.msra.mxu1 %v7963_v3  ;;  %7241 = vmatpush1.bf16.msra.mxu0 %v8139_v15  ;;  %v8154_v3 = vcombine.high %v3804_v60, %v3808_v7  ;;  %v2346_v15 = vld [vmem:[#allocation11 + $0x5c8] sm:$0xff] }
 0x3f4   :  { %6891 = vmatprep.subr.bf16.mxu1 %v7964_v16  ;;  %7243 = vmatprep.subr.bf16.mxu0 %v8140_v21  ;;  %v2350_v16 = vld [vmem:[#allocation11 + $0x5e8] sm:$0xff]  ;;  %v3812_v21 = vld [vmem:[#allocation11 + $0xbc0] sm:$0xff] }
 0x3f5   :  { %v7980_v17 = vcombine.high %v2346_v15, %v2350_v16  ;;  %v7981_v12 = vcombine.low %v2346_v15, %v2350_v16  ;;  %v8157_v5 = vcombine.low %v3812_v21, %v3816_v8  ;;  %v3809_v15 = vld [vmem:[#allocation11 + $0xba8] sm:$0xff] }
 0x3f7   :  { %6893 = vmatpush1.bf16.msra.mxu1 %v7965_v45  ;;  %7245 = vmatpush1.bf16.msra.mxu0 %v8141_v18  ;;  %v8156_v45 = vcombine.high %v3812_v21, %v3816_v8  ;;  %v2291_v18 = vld [vmem:[#allocation11 + $0x410] sm:$0xff] }
 0x3f8   :  { %6895 = vmatprep.subr.bf16.mxu1 %v7966_v20  ;;  %7247 = vmatprep.subr.bf16.mxu0 %v8142_v19  ;;  %v2295_v20 = vld [vmem:[#allocation11 + $0x430] sm:$0xff]  ;;  %v3757_v19 = vld [vmem:[#allocation11 + $0xa08] sm:$0xff] }
 0x3f9   :  { %v7982_v10 = vcombine.high %v2291_v18, %v2295_v20  ;;  %v7983_v27 = vcombine.low %v2291_v18, %v2295_v20  ;;  %v3817_v18 = vld [vmem:[#allocation11 + $0xbe8] sm:$0xff] }
 0x3fa   :  { %2550 = vmatmul.mubr.f32.vlgmr.msra.gmra.mrb[26].mxu1 %v9019_v23  ;;  %3741 = vmatmul.mubr.f32.vlgmr.msra.gmra.mrb[6].mxu0 %v9025_v24  ;;  %v8147_v24 = vcombine.low %v3772_v29, %v3776_v30  ;;  %v8159_v29 = vcombine.low %v3757_v19, %v3761_v9 }
 0x3fb   :  { %6897 = vmatpush1.bf16.msra.mxu1 %v7967_v37  ;;  %7249 = vmatpush1.bf16.msra.mxu0 %v8143_v46  ;;  %v8158_v37 = vcombine.high %v3757_v19, %v3761_v9  ;;  %v2299_v46 = vld [vmem:[#allocation11 + $0x450] sm:$0xff] }
 0x3fc   :  { %6899 = vmatprep.subr.bf16.mxu1 %v7968_v2  ;;  %7251 = vmatprep.subr.bf16.mxu0 %v8144_v13  ;;  %v2303_v2 = vld [vmem:[#allocation11 + $0x470] sm:$0xff]  ;;  %v3765_v13 = vld [vmem:[#allocation11 + $0xa48] sm:$0xff] }
 0x3fd   :  { %2620 = vmatprep.mubr.f32.mxu1 %v8553_v1  ;;  %4016 = vmatprep.mubr.f32.mxu0 %v8553_v1  ;;  %v7984_v30 = vcombine.high %v2299_v46, %v2303_v2  ;;  %v7985_v41 = vcombine.low %v2299_v46, %v2303_v2  ;;  %v8161_v43 = vcombine.low %v3765_v13, %v3769_v26 }
 0x3ff   :  { %6901 = vmatpush1.bf16.msra.mxu1 %v7969_v31  ;;  %7253 = vmatpush1.bf16.msra.mxu0 %v8145_v32  ;;  %v8160_v31 = vcombine.high %v3765_v13, %v3769_v26  ;;  %v2307_v32 = vld [vmem:[#allocation11 + $0x490] sm:$0xff] }
 0x400   :  { %6903 = vmatprep.subr.bf16.mxu1 %v7970_v4  ;;  %7255 = vmatprep.subr.bf16.mxu0 %v8146_v35  ;;  %v2311_v4 = vld [vmem:[#allocation11 + $0x4b0] sm:$0xff]  ;;  %v3773_v35 = vld [vmem:[#allocation11 + $0xa88] sm:$0xff] }
 0x401   :  { %v7986_v44 = vcombine.high %v2307_v32, %v2311_v4  ;;  %v7987_v54 = vcombine.low %v2307_v32, %v2311_v4  ;;  %v8163_v55 = vcombine.low %v3773_v35, %v3777_v39  ;;  %v3766_v13 = vld [vmem:[#allocation11 + $0xa50] sm:$0xff] }
 0x402   :  { %v3770_v26 = vld [vmem:[#allocation11 + $0xa70] sm:$0xff] }
 0x403   :  { %6905 = vmatpush1.bf16.msra.mxu1 %v7971_v47  ;;  %7257 = vmatpush1.bf16.msra.mxu0 %v8147_v24  ;;  %v8162_v47 = vcombine.high %v3773_v35, %v3777_v39  ;;  %v2315_v24 = vld [vmem:[#allocation11 + $0x4d0] sm:$0xff]  ;;  %v8177_v32 = vcombine.low %v3766_v13, %v3770_v26 }
 0x404   :  { %6907 = vmatprep.subr.bf16.mxu1 %v7972_v48  ;;  %7259 = vmatprep.subr.bf16.mxu0 %v8148_v51  ;;  %v2319_v48 = vld [vmem:[#allocation11 + $0x4f0] sm:$0xff]  ;;  %v3781_v51 = vld [vmem:[#allocation11 + $0xac8] sm:$0xff] }
 0x405   :  { %v7988_v56 = vcombine.high %v2315_v24, %v2319_v48  ;;  %v7989_v42 = vcombine.low %v2315_v24, %v2319_v48  ;;  %v8165_v50 = vcombine.low %v3781_v51, %v3785_v53  ;;  %v3782_v35 = vld [vmem:[#allocation11 + $0xad0] sm:$0xff] }
 0x406   :  { %v3786_v39 = vld [vmem:[#allocation11 + $0xaf0] sm:$0xff] }
 0x407   :  { %6909 = vmatpush1.bf16.msra.mxu1 %v7973_v57  ;;  %7261 = vmatpush1.bf16.msra.mxu0 %v8149_v59  ;;  %v8164_v57 = vcombine.high %v3781_v51, %v3785_v53  ;;  %v2323_v59 = vld [vmem:[#allocation11 + $0x510] sm:$0xff]  ;;  %v8181_v24 = vcombine.low %v3782_v35, %v3786_v39 }
 0x408   :  { %6911 = vmatprep.subr.bf16.mxu1 %v7974_v28  ;;  %7263 = vmatprep.subr.bf16.mxu0 %v8150_v49  ;;  %v2327_v28 = vld [vmem:[#allocation11 + $0x530] sm:$0xff]  ;;  %v3789_v49 = vld [vmem:[#allocation11 + $0xb08] sm:$0xff] }
 0x409   :  { %v7990_v61 = vcombine.high %v2323_v59, %v2327_v28  ;;  %v7991_v52 = vcombine.low %v2323_v59, %v2327_v28  ;;  %v8167_v60 = vcombine.low %v3789_v49, %v3793_v34  ;;  %v3798_v48 = vld [vmem:[#allocation11 + $0xb50] sm:$0xff] }
 0x40a   :  { %v3802_v51 = vld [vmem:[#allocation11 + $0xb70] sm:$0xff] }
 0x40b   :  { %6913 = vmatpush1.bf16.msra.mxu1 %v7975_v62  ;;  %7265 = vmatpush1.bf16.msra.mxu0 %v8151_v63  ;;  %v8166_v62 = vcombine.high %v3789_v49, %v3793_v34  ;;  %v2331_v63 = vld [vmem:[#allocation11 + $0x550] sm:$0xff] }
 0x40c   :  { %6915 = vmatprep.subr.bf16.mxu1 %v7976_v58  ;;  %7267 = vmatprep.subr.bf16.mxu0 %v8152_v6  ;;  %v2335_v58 = vld [vmem:[#allocation11 + $0x570] sm:$0xff]  ;;  %v3797_v6 = vld [vmem:[#allocation11 + $0xb48] sm:$0xff] }
 0x40d   :  { %v7992_v7 = vcombine.high %v2331_v63, %v2335_v58  ;;  %v7993_v16 = vcombine.low %v2331_v63, %v2335_v58  ;;  %v8169_v21 = vcombine.low %v3797_v6, %v3801_v40  ;;  %v3814_v28 = vld [vmem:[#allocation11 + $0xbd0] sm:$0xff]  ;;  %v3767_v58 = vld [vmem:[#allocation11 + $0xa58] sm:$0xff] }
 0x40e   :  { %v3818_v49 = vld [vmem:[#allocation11 + $0xbf0] sm:$0xff] }
 0x40f   :  { %6917 = vmatpush1.bf16.msra.mxu1 %v7977_v22  ;;  %7269 = vmatpush1.bf16.msra.mxu0 %v8153_v14  ;;  %v8168_v22 = vcombine.high %v3797_v6, %v3801_v40  ;;  %v2339_v14 = vld [vmem:[#allocation11 + $0x590] sm:$0xff]  ;;  %v3771_v6 = vld [vmem:[#allocation11 + $0xa78] sm:$0xff] }
 0x410   :  { %6919 = vmatprep.subr.bf16.mxu1 %v7978_v11  ;;  %7271 = vmatprep.subr.bf16.mxu0 %v8154_v3  ;;  %v2343_v11 = vld [vmem:[#allocation11 + $0x5b0] sm:$0xff]  ;;  %v3805_v3 = vld [vmem:[#allocation11 + $0xb88] sm:$0xff] }
 0x411   :  { %v7994_v8 = vcombine.high %v2339_v14, %v2343_v11  ;;  %v7995_v20 = vcombine.low %v2339_v14, %v2343_v11  ;;  %v8171_v19 = vcombine.low %v3805_v3, %v3809_v15  ;;  %v3783_v11 = vld [vmem:[#allocation11 + $0xad8] sm:$0xff] }
 0x413   :  { %6921 = vmatpush1.bf16.msra.mxu1 %v7979_v0  ;;  %7273 = vmatpush1.bf16.msra.mxu0 %v8155_v33  ;;  %v8170_v0 = vcombine.high %v3805_v3, %v3809_v15  ;;  %v2347_v33 = vld [vmem:[#allocation11 + $0x5d0] sm:$0xff]  ;;  %v3787_v3 = vld [vmem:[#allocation11 + $0xaf8] sm:$0xff] }
 0x414   :  { %6923 = vmatprep.subr.bf16.mxu1 %v7980_v17  ;;  %7275 = vmatprep.subr.bf16.mxu0 %v8156_v45  ;;  %v2351_v17 = vld [vmem:[#allocation11 + $0x5f0] sm:$0xff]  ;;  %v3813_v45 = vld [vmem:[#allocation11 + $0xbc8] sm:$0xff] }
 0x415   :  { %v7996_v9 = vcombine.high %v2347_v33, %v2351_v17  ;;  %v8173_v46 = vcombine.low %v3813_v45, %v3817_v18 }
 0x417   :  { %6925 = vmatpush1.bf16.msra.mxu1 %v7981_v12  ;;  %7277 = vmatpush1.bf16.msra.mxu0 %v8157_v5  ;;  %v8172_v12 = vcombine.high %v3813_v45, %v3817_v18  ;;  %v3758_v5 = vld [vmem:[#allocation11 + $0xa10] sm:$0xff]  ;;  %v3803_v45 = vld [vmem:[#allocation11 + $0xb78] sm:$0xff] }
 0x418   :  { %6927 = vmatprep.subr.bf16.mxu1 %v7982_v10  ;;  %7279 = vmatprep.subr.bf16.mxu0 %v8158_v37  ;;  %v3762_v10 = vld [vmem:[#allocation11 + $0xa30] sm:$0xff]  ;;  %v7997_v37 = vcombine.low %v2347_v33, %v2351_v17  ;;  %v3799_v17 = vld [vmem:[#allocation11 + $0xb58] sm:$0xff] }
 0x419   :  { %v8174_v2 = vcombine.high %v3758_v5, %v3762_v10 }
 0x41a   :  { %2621 = vmatmul.mubr.f32.vlgmr.msra.gmra.mrb[28].mxu1 %v9019_v23  ;;  %4017 = vmatmul.mubr.f32.vlgmr.msra.gmra.mrb[8].mxu0 %v9030_v25 }
 0x41b   :  { %6929 = vmatpush1.bf16.msra.mxu1 %v7983_v27  ;;  %7281 = vmatpush1.bf16.msra.mxu0 %v8159_v29  ;;  %v8175_v27 = vcombine.low %v3758_v5, %v3762_v10  ;;  %v8176_v29 = vcombine.high %v3766_v13, %v3770_v26  ;;  %v3815_v10 = vld [vmem:[#allocation11 + $0xbd8] sm:$0xff]  ;;  %v4245_v13 = vld [vmem:[#allocation11 + $0xc00] sm:$0xff] }
 0x41c   :  { %6931 = vmatprep.subr.bf16.mxu1 %v7984_v30  ;;  %7283 = vmatprep.subr.bf16.mxu0 %v8160_v31  ;;  %v3774_v30 = vld [vmem:[#allocation11 + $0xa90] sm:$0xff]  ;;  %v4249_v26 = vld [vmem:[#allocation11 + $0xc20] sm:$0xff] }
 0x41d   :  { %2691 = vmatprep.mubr.f32.mxu1 %v8553_v1  ;;  %4087 = vmatprep.mubr.f32.mxu0 %v8553_v1  ;;  %v3778_v31 = vld [vmem:[#allocation11 + $0xab0] sm:$0xff] }
 0x41e   :  { %v8178_v4 = vcombine.high %v3774_v30, %v3778_v31 }
 0x41f   :  { %6933 = vmatpush1.bf16.msra.mxu1 %v7985_v41  ;;  %7285 = vmatpush1.bf16.msra.mxu0 %v8161_v43  ;;  %v8179_v41 = vcombine.low %v3774_v30, %v3778_v31  ;;  %v8180_v43 = vcombine.high %v3782_v35, %v3786_v39  ;;  %v4253_v30 = vld [vmem:[#allocation11 + $0xc40] sm:$0xff] }
 0x420   :  { %6935 = vmatprep.subr.bf16.mxu1 %v7986_v44  ;;  %7287 = vmatprep.subr.bf16.mxu0 %v8162_v47  ;;  %v3790_v44 = vld [vmem:[#allocation11 + $0xb10] sm:$0xff]  ;;  %v4257_v31 = vld [vmem:[#allocation11 + $0xc60] sm:$0xff] }
 0x421   :  { %v3794_v47 = vld [vmem:[#allocation11 + $0xb30] sm:$0xff]  ;;  %v4261_v35 = vld [vmem:[#allocation11 + $0xc80] sm:$0xff] }
 0x422   :  { %v8183_v53 = vcombine.low %v3790_v44, %v3794_v47  ;;  %v4265_v39 = vld [vmem:[#allocation11 + $0xca0] sm:$0xff] }
 0x423   :  { %6937 = vmatpush1.bf16.msra.mxu1 %v7987_v54  ;;  %7289 = vmatpush1.bf16.msra.mxu0 %v8163_v55  ;;  %v8184_v54 = vcombine.high %v3798_v48, %v3802_v51  ;;  %v3806_v55 = vld [vmem:[#allocation11 + $0xb90] sm:$0xff] }
 0x424   :  { %6939 = vmatprep.subr.bf16.mxu1 %v7988_v56  ;;  %7291 = vmatprep.subr.bf16.mxu0 %v8164_v57  ;;  %v3810_v56 = vld [vmem:[#allocation11 + $0xbb0] sm:$0xff]  ;;  %v8185_v57 = vcombine.low %v3798_v48, %v3802_v51  ;;  %v4277_v48 = vld [vmem:[#allocation11 + $0xd00] sm:$0xff] }
 0x425   :  { %v8186_v59 = vcombine.high %v3806_v55, %v3810_v56  ;;  %v8187_v34 = vcombine.low %v3806_v55, %v3810_v56  ;;  %v4281_v51 = vld [vmem:[#allocation11 + $0xd20] sm:$0xff] }
 0x426   :  { %v4285_v55 = vld [vmem:[#allocation11 + $0xd40] sm:$0xff]  ;;  %v8215_v56 = vcombine.low %v4277_v48, %v4281_v51 }
 0x427   :  { %6941 = vmatpush1.bf16.msra.mxu1 %v7989_v42  ;;  %7293 = vmatpush1.bf16.msra.mxu0 %v8165_v50  ;;  %v8188_v42 = vcombine.high %v3814_v28, %v3818_v49  ;;  %v3759_v50 = vld [vmem:[#allocation11 + $0xa18] sm:$0xff] }
 0x428   :  { %6943 = vmatprep.subr.bf16.mxu1 %v7990_v61  ;;  %7295 = vmatprep.subr.bf16.mxu0 %v8166_v62  ;;  %v3763_v61 = vld [vmem:[#allocation11 + $0xa38] sm:$0xff]  ;;  %v8189_v62 = vcombine.low %v3814_v28, %v3818_v49  ;;  %v4297_v28 = vld [vmem:[#allocation11 + $0xda0] sm:$0xff] }
 0x429   :  { %v8190_v63 = vcombine.high %v3759_v50, %v3763_v61  ;;  %v8191_v40 = vcombine.low %v3759_v50, %v3763_v61  ;;  %v4305_v50 = vld [vmem:[#allocation11 + $0xde0] sm:$0xff] }
 0x42b   :  { %6945 = vmatpush1.bf16.msra.mxu1 %v7991_v52  ;;  %7297 = vmatpush1.bf16.msra.mxu0 %v8167_v60  ;;  %v8192_v52 = vcombine.high %v3767_v58, %v3771_v6  ;;  %v3775_v60 = vld [vmem:[#allocation11 + $0xa98] sm:$0xff] }
 0x42c   :  { %6947 = vmatprep.subr.bf16.mxu1 %v7992_v7  ;;  %7299 = vmatprep.subr.bf16.mxu0 %v8168_v22  ;;  %v3779_v7 = vld [vmem:[#allocation11 + $0xab8] sm:$0xff]  ;;  %v8193_v22 = vcombine.low %v3767_v58, %v3771_v6  ;;  %v4250_v58 = vld [vmem:[#allocation11 + $0xc28] sm:$0xff] }
 0x42d   :  { %v8194_v14 = vcombine.high %v3775_v60, %v3779_v7  ;;  %v8195_v15 = vcombine.low %v3775_v60, %v3779_v7  ;;  %v4258_v60 = vld [vmem:[#allocation11 + $0xc68] sm:$0xff] }
 0x42f   :  { %6949 = vmatpush1.bf16.msra.mxu1 %v7993_v16  ;;  %7301 = vmatpush1.bf16.msra.mxu0 %v8169_v21  ;;  %v8196_v16 = vcombine.high %v3783_v11, %v3787_v3  ;;  %v3791_v21 = vld [vmem:[#allocation11 + $0xb18] sm:$0xff] }
 0x430   :  { %6951 = vmatprep.subr.bf16.mxu1 %v7994_v8  ;;  %7303 = vmatprep.subr.bf16.mxu0 %v8170_v0  ;;  %v3795_v8 = vld [vmem:[#allocation11 + $0xb38] sm:$0xff]  ;;  %v8197_v0 = vcombine.low %v3783_v11, %v3787_v3  ;;  %v4266_v11 = vld [vmem:[#allocation11 + $0xca8] sm:$0xff] }
 0x431   :  { %v8198_v33 = vcombine.high %v3791_v21, %v3795_v8  ;;  %v8199_v18 = vcombine.low %v3791_v21, %v3795_v8  ;;  %v4274_v21 = vld [vmem:[#allocation11 + $0xce8] sm:$0xff] }
 0x433   :  { %6953 = vmatpush1.bf16.msra.mxu1 %v7995_v20  ;;  %7305 = vmatpush1.bf16.msra.mxu0 %v8171_v19  ;;  %v8200_v20 = vcombine.high %v3799_v17, %v3803_v45  ;;  %v3807_v19 = vld [vmem:[#allocation11 + $0xb98] sm:$0xff] }
 0x434   :  { %6955 = vmatprep.subr.bf16.mxu1 %v7996_v9  ;;  %7307 = vmatprep.subr.bf16.mxu0 %v8172_v12  ;;  %v3811_v9 = vld [vmem:[#allocation11 + $0xbb8] sm:$0xff]  ;;  %v8201_v12 = vcombine.low %v3799_v17, %v3803_v45  ;;  %v4282_v17 = vld [vmem:[#allocation11 + $0xd28] sm:$0xff] }
 0x435   :  { %v8202_v5 = vcombine.high %v3807_v19, %v3811_v9 }
 0x437   :  { %6957 = vmatpush1.bf16.msra.mxu1 %v7997_v37  ;;  %7309 = vmatpush1.bf16.msra.mxu0 %v8173_v46  ;;  %v3819_v37 = vld [vmem:[#allocation11 + $0xbf8] sm:$0xff]  ;;  %v8203_v46 = vcombine.low %v3807_v19, %v3811_v9  ;;  %v4290_v19 = vld [vmem:[#allocation11 + $0xd68] sm:$0xff] }
 0x438   :  { %7311 = vmatprep.subr.bf16.mxu0 %v8174_v2  ;;  %v8204_v2 = vcombine.high %v3815_v10, %v3819_v37 }
 0x43a   :  { %2692 = vmatmul.mubr.f32.vlgmr.msra.gmra.mrb[30].mxu1 %v9019_v23  ;;  %4088 = vmatmul.mubr.f32.vlgmr.msra.gmra.mrb[10].mxu0 %v9030_v25  ;;  %v8182_v23 = vcombine.high %v3790_v44, %v3794_v47  ;;  %v4269_v44 = vld [vmem:[#allocation11 + $0xcc0] sm:$0xff] }
 0x43b   :  { %7313 = vmatpush1.bf16.msra.mxu0 %v8175_v27  ;;  %4158 = vmatprep.mubr.f32.mxu0 %v8553_v1  ;;  %v8205_v27 = vcombine.low %v3815_v10, %v3819_v37  ;;  %v4273_v47 = vld [vmem:[#allocation11 + $0xce0] sm:$0xff]  ;;  %v4298_v10 = vld [vmem:[#allocation11 + $0xda8] sm:$0xff] }
 0x43c   :  { %7315 = vmatprep.subr.bf16.mxu0 %v8176_v29  ;;  %v8206_v29 = vcombine.high %v4245_v13, %v4249_v26 }
 0x43f   :  { %7317 = vmatpush1.bf16.msra.mxu0 %v8177_v32  ;;  %v8207_v32 = vcombine.low %v4245_v13, %v4249_v26  ;;  %v4302_v13 = vld [vmem:[#allocation11 + $0xdc8] sm:$0xff] }
 0x440   :  { %7319 = vmatprep.subr.bf16.mxu0 %v8178_v4  ;;  %v8208_v4 = vcombine.high %v4253_v30, %v4257_v31  ;;  %v4306_v26 = vld [vmem:[#allocation11 + $0xde8] sm:$0xff] }
 0x443   :  { %7321 = vmatpush1.bf16.msra.mxu0 %v8179_v41  ;;  %v8209_v41 = vcombine.low %v4253_v30, %v4257_v31  ;;  %v8236_v30 = vcombine.high %v4302_v13, %v4306_v26  ;;  %v4247_v31 = vld [vmem:[#allocation11 + $0xc10] sm:$0xff] }
 0x444   :  { %7323 = vmatprep.subr.bf16.mxu0 %v8180_v43  ;;  %v8210_v43 = vcombine.high %v4261_v35, %v4265_v39 }
 0x447   :  { %7325 = vmatpush1.bf16.msra.mxu0 %v8181_v24  ;;  %v8211_v24 = vcombine.low %v4261_v35, %v4265_v39  ;;  %v4255_v39 = vld [vmem:[#allocation11 + $0xc50] sm:$0xff] }
 0x448   :  { %7327 = vmatprep.subr.bf16.mxu0 %v8182_v23  ;;  %v8212_v23 = vcombine.high %v4269_v44, %v4273_v47 }
 0x44b   :  { %7329 = vmatpush1.bf16.msra.mxu0 %v8183_v53  ;;  %v8213_v53 = vcombine.low %v4269_v44, %v4273_v47  ;;  %v4263_v47 = vld [vmem:[#allocation11 + $0xc90] sm:$0xff] }
 0x44c   :  { %7331 = vmatprep.subr.bf16.mxu0 %v8184_v54  ;;  %v8214_v54 = vcombine.high %v4277_v48, %v4281_v51  ;;  %v4271_v51 = vld [vmem:[#allocation11 + $0xcd0] sm:$0xff] }
 0x44f   :  { %7333 = vmatpush1.bf16.msra.mxu0 %v8185_v57 }
 0x450   :  { %7335 = vmatprep.subr.bf16.mxu0 %v8186_v59  ;;  %v4293_v59 = vld [vmem:[#allocation11 + $0xd80] sm:$0xff] }
 0x451   :  { %v8219_v61 = vcombine.low %v4293_v59, %v4297_v28 }
 0x453   :  { %7337 = vmatpush1.bf16.msra.mxu0 %v8187_v34  ;;  %v8218_v34 = vcombine.high %v4293_v59, %v4297_v28  ;;  %v4287_v28 = vld [vmem:[#allocation11 + $0xd50] sm:$0xff] }
 0x454   :  { %7339 = vmatprep.subr.bf16.mxu0 %v8188_v42  ;;  %v4301_v42 = vld [vmem:[#allocation11 + $0xdc0] sm:$0xff] }
 0x455   :  { %v8221_v6 = vcombine.low %v4301_v42, %v4305_v50 }
 0x457   :  { %7341 = vmatpush1.bf16.msra.mxu0 %v8189_v62  ;;  %v8220_v62 = vcombine.high %v4301_v42, %v4305_v50  ;;  %v4295_v50 = vld [vmem:[#allocation11 + $0xd90] sm:$0xff] }
 0x458   :  { %7343 = vmatprep.subr.bf16.mxu0 %v8190_v63  ;;  %v4246_v63 = vld [vmem:[#allocation11 + $0xc08] sm:$0xff] }
 0x459   :  { %v8223_v7 = vcombine.low %v4246_v63, %v4250_v58 }
 0x45a   :  { %4159 = vmatmul.mubr.f32.vlgmr.msra.gmra.mrb[12].mxu0 %v9030_v25 }
 0x45b   :  { %7345 = vmatpush1.bf16.msra.mxu0 %v8191_v40  ;;  %4229 = vmatprep.mubr.f32.mxu0 %v8553_v1  ;;  %v8222_v40 = vcombine.high %v4246_v63, %v4250_v58 }
 0x45c   :  { %7347 = vmatprep.subr.bf16.mxu0 %v8192_v52  ;;  %v4254_v52 = vld [vmem:[#allocation11 + $0xc48] sm:$0xff] }
 0x45d   :  { %v8225_v3 = vcombine.low %v4254_v52, %v4258_v60 }
 0x45f   :  { %7349 = vmatpush1.bf16.msra.mxu0 %v8193_v22  ;;  %v8224_v22 = vcombine.high %v4254_v52, %v4258_v60 }
 0x460   :  { %7351 = vmatprep.subr.bf16.mxu0 %v8194_v14  ;;  %v4262_v14 = vld [vmem:[#allocation11 + $0xc88] sm:$0xff] }
 0x461   :  { %v8227_v8 = vcombine.low %v4262_v14, %v4266_v11 }
 0x463   :  { %7353 = vmatpush1.bf16.msra.mxu0 %v8195_v15  ;;  %v8226_v15 = vcombine.high %v4262_v14, %v4266_v11  ;;  %v4252_v14 = vld [vmem:[#allocation11 + $0xc38] sm:$0xff] }
 0x464   :  { %7355 = vmatprep.subr.bf16.mxu0 %v8196_v16  ;;  %v4270_v16 = vld [vmem:[#allocation11 + $0xcc8] sm:$0xff] }
 0x465   :  { %v8229_v45 = vcombine.low %v4270_v16, %v4274_v21 }
 0x467   :  { %7357 = vmatpush1.bf16.msra.mxu0 %v8197_v0  ;;  %v8228_v0 = vcombine.high %v4270_v16, %v4274_v21  ;;  %v4260_v16 = vld [vmem:[#allocation11 + $0xc78] sm:$0xff] }
 0x468   :  { %7359 = vmatprep.subr.bf16.mxu0 %v8198_v33  ;;  %v4278_v33 = vld [vmem:[#allocation11 + $0xd08] sm:$0xff] }
 0x469   :  { %v8231_v9 = vcombine.low %v4278_v33, %v4282_v17 }
 0x46b   :  { %7361 = vmatpush1.bf16.msra.mxu0 %v8199_v18  ;;  %v8230_v18 = vcombine.high %v4278_v33, %v4282_v17  ;;  %v4268_v33 = vld [vmem:[#allocation11 + $0xcb8] sm:$0xff] }
 0x46c   :  { %7363 = vmatprep.subr.bf16.mxu0 %v8200_v20  ;;  %v4286_v20 = vld [vmem:[#allocation11 + $0xd48] sm:$0xff] }
 0x46d   :  { %v8233_v37 = vcombine.low %v4286_v20, %v4290_v19 }
 0x46f   :  { %7365 = vmatpush1.bf16.msra.mxu0 %v8201_v12  ;;  %v8232_v12 = vcombine.high %v4286_v20, %v4290_v19  ;;  %v4276_v20 = vld [vmem:[#allocation11 + $0xcf8] sm:$0xff] }
 0x470   :  { %7367 = vmatprep.subr.bf16.mxu0 %v8202_v5  ;;  %v4294_v5 = vld [vmem:[#allocation11 + $0xd88] sm:$0xff] }
 0x473   :  { %7369 = vmatpush1.bf16.msra.mxu0 %v8203_v46  ;;  %v8234_v46 = vcombine.high %v4294_v5, %v4298_v10 }
 0x474   :  { %7371 = vmatprep.subr.bf16.mxu0 %v8204_v2 }
 0x477   :  { %7373 = vmatpush1.bf16.msra.mxu0 %v8205_v27 }
 0x478   :  { %7375 = vmatprep.subr.bf16.mxu0 %v8206_v29  ;;  %v8235_v29 = vcombine.low %v4294_v5, %v4298_v10  ;;  %v4284_v5 = vld [vmem:[#allocation11 + $0xd38] sm:$0xff] }
 0x47a   :  { %4230 = vmatmul.mubr.f32.vlgmr.msra.gmra.mrb[6].mxu0 %v9030_v25  ;;  %v4289_v25 = vld [vmem:[#allocation11 + $0xd60] sm:$0xff] }
 0x47b   :  { %7377 = vmatpush1.bf16.msra.mxu0 %v8207_v32  ;;  %4505 = vmatprep.mubr.f32.mxu0 %v8553_v1  ;;  %v8216_v57 = vcombine.high %v4285_v55, %v4289_v25  ;;  %v8217_v49 = vcombine.low %v4285_v55, %v4289_v25  ;;  %v4251_v32 = vld [vmem:[#allocation11 + $0xc30] sm:$0xff] }
 0x47c   :  { %7379 = vmatprep.subr.bf16.mxu0 %v8208_v4  ;;  %v8237_v4 = vcombine.low %v4302_v13, %v4306_v26  ;;  %v8238_v35 = vcombine.high %v4247_v31, %v4251_v32  ;;  %v4279_v25 = vld [vmem:[#allocation11 + $0xd10] sm:$0xff]  ;;  %v4292_v13 = vld [vmem:[#allocation11 + $0xd78] sm:$0xff] }
 0x47f   :  { %7381 = vmatpush1.bf16.msra.mxu0 %v8209_v41  ;;  %v4259_v41 = vld [vmem:[#allocation11 + $0xc70] sm:$0xff] }
 0x480   :  { %7383 = vmatprep.subr.bf16.mxu0 %v8210_v43  ;;  %v8239_v43 = vcombine.low %v4247_v31, %v4251_v32  ;;  %v8240_v44 = vcombine.high %v4255_v39, %v4259_v41  ;;  %v4300_v31 = vld [vmem:[#allocation11 + $0xdb8] sm:$0xff] }
 0x483   :  { %7385 = vmatpush1.bf16.msra.mxu0 %v8211_v24  ;;  %v4267_v24 = vld [vmem:[#allocation11 + $0xcb0] sm:$0xff] }
 0x484   :  { %7387 = vmatprep.subr.bf16.mxu0 %v8212_v23  ;;  %v8241_v23 = vcombine.low %v4255_v39, %v4259_v41  ;;  %v8242_v48 = vcombine.high %v4263_v47, %v4267_v24  ;;  %v4304_v39 = vld [vmem:[#allocation11 + $0xdd8] sm:$0xff] }
 0x485   :  { %v4308_v41 = vld [vmem:[#allocation11 + $0xdf8] sm:$0xff] }
 0x487   :  { %7389 = vmatpush1.bf16.msra.mxu0 %v8213_v53  ;;  %v4275_v53 = vld [vmem:[#allocation11 + $0xcf0] sm:$0xff] }
 0x488   :  { %7391 = vmatprep.subr.bf16.mxu0 %v8214_v54  ;;  %v8243_v54 = vcombine.low %v4263_v47, %v4267_v24  ;;  %v8244_v55 = vcombine.high %v4271_v51, %v4275_v53  ;;  %v8268_v47 = vcombine.high %v4304_v39, %v4308_v41  ;;  %v4734_v24 = vld [vmem:[#allocation11 + $0xe00] sm:$0xff] }
 0x48b   :  { %7393 = vmatpush1.bf16.msra.mxu0 %v8215_v56  ;;  %v4283_v56 = vld [vmem:[#allocation11 + $0xd30] sm:$0xff] }
 0x48c   :  { %7395 = vmatprep.subr.bf16.mxu0 %v8216_v57  ;;  %v8245_v57 = vcombine.low %v4271_v51, %v4275_v53  ;;  %v8246_v59 = vcombine.high %v4279_v25, %v4283_v56  ;;  %v4742_v53 = vld [vmem:[#allocation11 + $0xe40] sm:$0xff] }
 0x48f   :  { %7397 = vmatpush1.bf16.msra.mxu0 %v8217_v49  ;;  %v4291_v49 = vld [vmem:[#allocation11 + $0xd70] sm:$0xff] }
 0x490   :  { %7399 = vmatprep.subr.bf16.mxu0 %v8218_v34  ;;  %v8247_v34 = vcombine.low %v4279_v25, %v4283_v56  ;;  %v8248_v42 = vcombine.high %v4287_v28, %v4291_v49  ;;  %v4750_v56 = vld [vmem:[#allocation11 + $0xe80] sm:$0xff] }
 0x493   :  { %7401 = vmatpush1.bf16.msra.mxu0 %v8219_v61  ;;  %v4299_v61 = vld [vmem:[#allocation11 + $0xdb0] sm:$0xff] }
 0x494   :  { %7403 = vmatprep.subr.bf16.mxu0 %v8220_v62  ;;  %v8249_v62 = vcombine.low %v4287_v28, %v4291_v49  ;;  %v8250_v63 = vcombine.high %v4295_v50, %v4299_v61  ;;  %v8251_v60 = vcombine.low %v4295_v50, %v4299_v61  ;;  %v5297_v28 = vld [vmem:[%s9545_s7 + $0x88] sm:$0xff]  ;;  %v5280_v49 = vld [vmem:[%s9545_s7] sm:$0xff]  ;;  %v5298_v50 = vld [vmem:[%s9545_s7 + $0x90] sm:$0xff] }
 0x495   :  { %v5299_v61 = vld [vmem:[%s9545_s7 + $0x98] sm:$0xff] }
 0x497   :  { %7405 = vmatpush1.bf16.msra.mxu0 %v8221_v6  ;;  %v4303_v6 = vld [vmem:[#allocation11 + $0xdd0] sm:$0xff] }
 0x498   :  { %7407 = vmatprep.subr.bf16.mxu0 %v8222_v40  ;;  %v4307_v40 = vld [vmem:[#allocation11 + $0xdf0] sm:$0xff] }
 0x499   :  { %v8253_v11 = vcombine.low %v4303_v6, %v4307_v40 }
 0x49a   :  { %4506 = vmatmul.mubr.f32.vlgmr.msra.gmra.mrb[8].mxu0 %v9035_v36 }
 0x49b   :  { %7409 = vmatpush1.bf16.msra.mxu0 %v8223_v7  ;;  %4576 = vmatprep.mubr.f32.mxu0 %v8553_v1  ;;  %v8252_v7 = vcombine.high %v4303_v6, %v4307_v40  ;;  %v7634_v6 = vpack.c.bf16 %v5299_v61, %v5298_v50  ;;  %v5282_v40 = vld [vmem:[%s9545_s7 + $0x10] sm:$0xff] }
 0x49c   :  { %7411 = vmatprep.subr.bf16.mxu0 %v8224_v22  ;;  %v4248_v22 = vld [vmem:[#allocation11 + $0xc18] sm:$0xff] }
 0x49d   :  { %v8255_v21 = vcombine.low %v4248_v22, %v4252_v14 }
 0x49f   :  { %7413 = vmatpush1.bf16.msra.mxu0 %v8225_v3  ;;  %v8254_v3 = vcombine.high %v4248_v22, %v4252_v14  ;;  %v4758_v22 = vld [vmem:[#allocation11 + $0xec0] sm:$0xff] }
 0x4a0   :  { %7415 = vmatprep.subr.bf16.mxu0 %v8226_v15  ;;  %v4256_v15 = vld [vmem:[#allocation11 + $0xc58] sm:$0xff]  ;;  %v4762_v14 = vld [vmem:[#allocation11 + $0xee0] sm:$0xff] }
 0x4a1   :  { %v8257_v17 = vcombine.low %v4256_v15, %v4260_v16 }
 0x4a3   :  { %7417 = vmatpush1.bf16.msra.mxu0 %v8227_v8  ;;  %v8256_v8 = vcombine.high %v4256_v15, %v4260_v16 }
 0x4a4   :  { %7419 = vmatprep.subr.bf16.mxu0 %v8228_v0  ;;  %v4264_v0 = vld [vmem:[#allocation11 + $0xc98] sm:$0xff] }
 0x4a5   :  { %v8259_v19 = vcombine.low %v4264_v0, %v4268_v33 }
 0x4a7   :  { %7421 = vmatpush1.bf16.msra.mxu0 %v8229_v45  ;;  %v8258_v45 = vcombine.high %v4264_v0, %v4268_v33  ;;  %v8276_v0 = vcombine.high %v4758_v22, %v4762_v14  ;;  %v5302_v33 = vld [vmem:[%s9545_s7 + $0xb0] sm:$0xff] }
 0x4a8   :  { %7423 = vmatprep.subr.bf16.mxu0 %v8230_v18  ;;  %v4272_v18 = vld [vmem:[#allocation11 + $0xcd8] sm:$0xff] }
 0x4a9   :  { %v8261_v10 = vcombine.low %v4272_v18, %v4276_v20 }
 0x4ab   :  { %7425 = vmatpush1.bf16.msra.mxu0 %v8231_v9  ;;  %v8260_v9 = vcombine.high %v4272_v18, %v4276_v20  ;;  %v4770_v18 = vld [vmem:[#allocation11 + $0xf20] sm:$0xff] }
 0x4ac   :  { %7427 = vmatprep.subr.bf16.mxu0 %v8232_v12  ;;  %v4280_v12 = vld [vmem:[#allocation11 + $0xd18] sm:$0xff] }
 0x4ad   :  { %v9085_v2 = vpop.f32.mrb[32].mxu1  ;;  %v8263_v26 = vcombine.low %v4280_v12, %v4284_v5 }
 0x4ae   :  { %v9087_v27 = vpop.f32.mrb[33].mxu1 }
 0x4af   :  { %7429 = vmatpush1.bf16.msra.mxu0 %v8233_v37  ;;  %v8262_v37 = vcombine.high %v4280_v12, %v4284_v5  ;;  %v5286_v12 = vld [vmem:[%s9545_s7 + $0x30] sm:$0xff]  ;;  %v5287_v5 = vld [vmem:[%s9545_s7 + $0x38] sm:$0xff] }
 0x4b0   :  { %7431 = vmatprep.subr.bf16.mxu0 %v8234_v46  ;;  %v4288_v46 = vld [vmem:[#allocation11 + $0xd58] sm:$0xff] }
 0x4b1   :  { %v8265_v32 = vcombine.low %v4288_v46, %v4292_v13 }
 0x4b3   :  { %7433 = vmatpush1.bf16.msra.mxu0 %v8235_v29  ;;  %v8264_v29 = vcombine.high %v4288_v46, %v4292_v13  ;;  %v5305_v46 = vld [vmem:[%s9545_s7 + $0xc8] sm:$0xff]  ;;  %v4774_v13 = vld [vmem:[#allocation11 + $0xf40] sm:$0xff] }
 0x4b4   :  { %7435 = vmatprep.subr.bf16.mxu0 %v8236_v30  ;;  %v4296_v30 = vld [vmem:[#allocation11 + $0xd98] sm:$0xff] }
 0x4b7   :  { %7437 = vmatpush1.bf16.msra.mxu0 %v8237_v4  ;;  %v8266_v4 = vcombine.high %v4296_v30, %v4300_v31 }
 0x4b8   :  { %7439 = vmatprep.subr.bf16.mxu0 %v8238_v35 }
 0x4ba   :  { %4577 = vmatmul.mubr.f32.vlgmr.msra.gmra.mrb[10].mxu0 %v9035_v36 }
 0x4bb   :  { %7441 = vmatpush1.bf16.msra.mxu0 %v8239_v43  ;;  %4647 = vmatprep.mubr.f32.mxu0 %v8553_v1 }
 0x4bc   :  { %7443 = vmatprep.subr.bf16.mxu0 %v8240_v44  ;;  %v8267_v44 = vcombine.low %v4296_v30, %v4300_v31 }
 0x4bf   :  { %7445 = vmatpush1.bf16.msra.mxu0 %v8241_v23  ;;  %v4738_v23 = vld [vmem:[#allocation11 + $0xe20] sm:$0xff] }
 0x4c0   :  { %7447 = vmatprep.subr.bf16.mxu0 %v8242_v48  ;;  %v8269_v48 = vcombine.low %v4304_v39, %v4308_v41  ;;  %v8270_v51 = vcombine.high %v4734_v24, %v4738_v23  ;;  %v5306_v41 = vld [vmem:[%s9545_s7 + $0xd0] sm:$0xff] }
 0x4c3   :  { %7449 = vmatpush1.bf16.msra.mxu0 %v8243_v54  ;;  %v4746_v54 = vld [vmem:[#allocation11 + $0xe60] sm:$0xff] }
 0x4c4   :  { %7451 = vmatprep.subr.bf16.mxu0 %v8244_v55  ;;  %v8271_v55 = vcombine.low %v4734_v24, %v4738_v23  ;;  %v8272_v25 = vcombine.high %v4742_v53, %v4746_v54  ;;  %v4786_v24 = vld [vmem:[#allocation11 + $0xfa0] sm:$0xff] }
 0x4c7   :  { %7453 = vmatpush1.bf16.msra.mxu0 %v8245_v57  ;;  %v4754_v57 = vld [vmem:[#allocation11 + $0xea0] sm:$0xff] }
 0x4c8   :  { %7455 = vmatprep.subr.bf16.mxu0 %v8246_v59  ;;  %v5296_v59 = vld [vmem:[%s9545_s7 + $0x80] sm:$0xff]  ;;  %v8275_v15 = vcombine.low %v4750_v56, %v4754_v57 }
 0x4cb   :  { %7457 = vmatpush1.bf16.msra.mxu0 %v8247_v34  ;;  %v8273_v34 = vcombine.low %v4742_v53, %v4746_v54  ;;  %v5290_v53 = vld [vmem:[%s9545_s7 + $0x50] sm:$0xff]  ;;  %v5291_v54 = vld [vmem:[%s9545_s7 + $0x58] sm:$0xff] }
 0x4cc   :  { %7459 = vmatprep.subr.bf16.mxu0 %v8248_v42  ;;  %v7630_v42 = vpack.c.bf16 %v5297_v28, %v5296_v59  ;;  %v7652_v28 = vpack.c.bf16 %v5291_v54, %v5290_v53 }
 0x4cd   :  { %v9091_v58 = vpop.f32.mrb[26].mxu1 }
 0x4ce   :  { %v9093_v52 = vpop.f32.mrb[27].mxu1  ;;  %7631 = vmatprep.subr.bf16.mxu1 %v7630_v42  ;;  %v4735_v42 = vld [vmem:[#allocation11 + $0xe08] sm:$0xff] }
 0x4cf   :  { %7461 = vmatpush1.bf16.msra.mxu0 %v8249_v62  ;;  %v8274_v62 = vcombine.high %v4750_v56, %v4754_v57  ;;  %v4790_v56 = vld [vmem:[#allocation11 + $0xfc0] sm:$0xff] }
 0x4d0   :  { %7463 = vmatprep.subr.bf16.mxu0 %v8250_v63  ;;  %v4794_v57 = vld [vmem:[#allocation11 + $0xfe0] sm:$0xff] }
 0x4d1   :  { %v8285_v50 = vcombine.low %v4790_v56, %v4794_v57 }
 0x4d3   :  { %7465 = vmatpush1.bf16.msra.mxu0 %v8251_v60  ;;  %v5283_v60 = vld [vmem:[%s9545_s7 + $0x18] sm:$0xff] }
 0x4d4   :  { %7467 = vmatprep.subr.bf16.mxu0 %v8252_v7  ;;  %v5300_v7 = vld [vmem:[%s9545_s7 + $0xa0] sm:$0xff] }
 0x4d7   :  { %7469 = vmatpush1.bf16.msra.mxu0 %v8253_v11  ;;  %v5301_v11 = vld [vmem:[%s9545_s7 + $0xa8] sm:$0xff] }
 0x4d8   :  { %7471 = vmatprep.subr.bf16.mxu0 %v8254_v3  ;;  %v7636_v3 = vpack.c.bf16 %v5283_v60, %v5282_v40  ;;  %v7638_v16 = vpack.c.bf16 %v5301_v11, %v5300_v7  ;;  %v4751_v60 = vld [vmem:[#allocation11 + $0xe88] sm:$0xff] }
 0x4d9   :  { %v4755_v7 = vld [vmem:[#allocation11 + $0xea8] sm:$0xff] }
 0x4da   :  { %4648 = vmatmul.mubr.f32.vlgmr.msra.gmra.mrb[12].mxu0 %v9035_v36  ;;  %v4759_v11 = vld [vmem:[#allocation11 + $0xec8] sm:$0xff] }
 0x4db   :  { %7473 = vmatpush1.bf16.msra.mxu0 %v8255_v21  ;;  %4718 = vmatprep.mubr.f32.mxu0 %v8553_v1  ;;  %v5284_v21 = vld [vmem:[%s9545_s7 + $0x20] sm:$0xff] }
 0x4dc   :  { %7475 = vmatprep.subr.bf16.mxu0 %v8256_v8  ;;  %v5285_v8 = vld [vmem:[%s9545_s7 + $0x28] sm:$0xff] }
 0x4dd   :  { %v7640_v20 = vpack.c.bf16 %v5285_v8, %v5284_v21  ;;  %v4767_v21 = vld [vmem:[#allocation11 + $0xf08] sm:$0xff] }
 0x4de   :  { %v4771_v8 = vld [vmem:[#allocation11 + $0xf28] sm:$0xff] }
 0x4df   :  { %7477 = vmatpush1.bf16.msra.mxu0 %v8257_v17  ;;  %v5303_v17 = vld [vmem:[%s9545_s7 + $0xb8] sm:$0xff] }
 0x4e0   :  { %7479 = vmatprep.subr.bf16.mxu0 %v8258_v45  ;;  %v4766_v45 = vld [vmem:[#allocation11 + $0xf00] sm:$0xff] }
 0x4e1   :  { %v8279_v30 = vcombine.low %v4766_v45, %v4770_v18 }
 0x4e3   :  { %7481 = vmatpush1.bf16.msra.mxu0 %v8259_v19  ;;  %v8277_v19 = vcombine.low %v4758_v22, %v4762_v14  ;;  %v8290_v14 = vcombine.high %v4751_v60, %v4755_v7 }
 0x4e4   :  { %7483 = vmatprep.subr.bf16.mxu0 %v8260_v9  ;;  %v7642_v9 = vpack.c.bf16 %v5303_v17, %v5302_v33  ;;  %v8294_v33 = vcombine.high %v4767_v21, %v4771_v8  ;;  %v4775_v17 = vld [vmem:[#allocation11 + $0xf48] sm:$0xff] }
 0x4e7   :  { %7485 = vmatpush1.bf16.msra.mxu0 %v8261_v10  ;;  %v8278_v10 = vcombine.high %v4766_v45, %v4770_v18  ;;  %v4779_v45 = vld [vmem:[#allocation11 + $0xf68] sm:$0xff]  ;;  %v8295_v18 = vcombine.low %v4767_v21, %v4771_v8 }
 0x4e8   :  { %7487 = vmatprep.subr.bf16.mxu0 %v8262_v37  ;;  %v5304_v37 = vld [vmem:[%s9545_s7 + $0xc0] sm:$0xff] }
 0x4e9   :  { %v7646_v31 = vpack.c.bf16 %v5305_v46, %v5304_v37  ;;  %v4795_v37 = vld [vmem:[#allocation11 + $0xfe8] sm:$0xff] }
 0x4eb   :  { %7489 = vmatpush1.bf16.msra.mxu0 %v8263_v26  ;;  %v4778_v26 = vld [vmem:[#allocation11 + $0xf60] sm:$0xff] }
 0x4ec   :  { %7491 = vmatprep.subr.bf16.mxu0 %v8264_v29  ;;  %v7644_v29 = vpack.c.bf16 %v5287_v5, %v5286_v12  ;;  %v8280_v39 = vcombine.high %v4774_v13, %v4778_v26  ;;  %v8297_v12 = vcombine.low %v4775_v17, %v4779_v45 }
 0x4ed   :  { %v9097_v35 = vpop.f32.mrb[28].mxu1 }
 0x4ee   :  { %v9099_v43 = vpop.f32.mrb[29].mxu1 }
 0x4ef   :  { %7493 = vmatpush1.bf16.msra.mxu0 %v8265_v32  ;;  %v5288_v32 = vld [vmem:[%s9545_s7 + $0x40] sm:$0xff] }
 0x4f0   :  { %7495 = vmatprep.subr.bf16.mxu0 %v8266_v4  ;;  %v5289_v4 = vld [vmem:[%s9545_s7 + $0x48] sm:$0xff] }
 0x4f1   :  { %v7648_v23 = vpack.c.bf16 %v5289_v4, %v5288_v32  ;;  %v4744_v32 = vld [vmem:[#allocation11 + $0xe50] sm:$0xff] }
 0x4f2   :  { %v4748_v4 = vld [vmem:[#allocation11 + $0xe70] sm:$0xff] }
 0x4f3   :  { %7497 = vmatpush1.bf16.msra.mxu0 %v8267_v44  ;;  %v5307_v44 = vld [vmem:[%s9545_s7 + $0xd8] sm:$0xff] }
 0x4f4   :  { %7499 = vmatprep.subr.bf16.mxu0 %v8268_v47  ;;  %v4782_v47 = vld [vmem:[#allocation11 + $0xf80] sm:$0xff] }
 0x4f7   :  { %7501 = vmatpush1.bf16.msra.mxu0 %v8269_v48  ;;  %v8281_v48 = vcombine.low %v4774_v13, %v4778_v26  ;;  %v4736_v26 = vld [vmem:[#allocation11 + $0xe10] sm:$0xff] }
 0x4f8   :  { %7503 = vmatprep.subr.bf16.mxu0 %v8270_v51  ;;  %v7650_v51 = vpack.c.bf16 %v5307_v44, %v5306_v41  ;;  %v8304_v41 = vcombine.high %v4744_v32, %v4748_v4  ;;  %v4752_v44 = vld [vmem:[#allocation11 + $0xe90] sm:$0xff] }
 0x4fa   :  { %4719 = vmatmul.mubr.f32.vlgmr.msra.gmra.mrb[6].mxu0 %v9035_v36  ;;  %v5281_v36 = vld [vmem:[%s9545_s7 + $0x8] sm:$0xff] }
 0x4fb   :  { %7505 = vmatpush1.bf16.msra.mxu0 %v8271_v55  ;;  %4994 = vmatprep.mubr.f32.mxu0 %v8553_v1  ;;  %v7632_v63 = vpack.c.bf16 %v5281_v36, %v5280_v49  ;;  %v8282_v55 = vcombine.high %v4782_v47, %v4786_v24  ;;  %v8283_v49 = vcombine.low %v4782_v47, %v4786_v24  ;;  %v4739_v36 = vld [vmem:[#allocation11 + $0xe28] sm:$0xff]  ;;  %v4756_v47 = vld [vmem:[#allocation11 + $0xeb0] sm:$0xff] }
 0x4fc   :  { %7507 = vmatprep.subr.bf16.mxu0 %v8272_v25  ;;  %v8286_v61 = vcombine.high %v4735_v42, %v4739_v36  ;;  %v8305_v24 = vcombine.low %v4744_v32, %v4748_v4  ;;  %v8307_v53 = vcombine.low %v4752_v44, %v4756_v47  ;;  %v4793_v4 = vld [vmem:[#allocation11 + $0xfd8] sm:$0xff] }
 0x4fd   :  { %7633 = vmatpush3.bf16.msra.mxu1 %v7632_v63  ;;  %v4747_v63 = vld [vmem:[#allocation11 + $0xe68] sm:$0xff] }
 0x4fe   :  { %7635 = vmatprep.subr.bf16.mxu1 %v7634_v6  ;;  %v8287_v6 = vcombine.low %v4735_v42, %v4739_v36 }
 0x4ff   :  { %7509 = vmatpush1.bf16.msra.mxu0 %v8273_v34  ;;  %v8284_v34 = vcombine.high %v4790_v56, %v4794_v57  ;;  %v4772_v56 = vld [vmem:[#allocation11 + $0xf30] sm:$0xff] }
 0x500   :  { %7511 = vmatprep.subr.bf16.mxu0 %v8274_v62  ;;  %v4743_v62 = vld [vmem:[#allocation11 + $0xe48] sm:$0xff] }
 0x501   :  { %7637 = vmatpush3.bf16.msra.mxu1 %v7636_v3  ;;  %v8288_v40 = vcombine.high %v4743_v62, %v4747_v63  ;;  %v8289_v22 = vcombine.low %v4743_v62, %v4747_v63  ;;  %v4763_v3 = vld [vmem:[#allocation11 + $0xee8] sm:$0xff] }
 0x502   :  { %7639 = vmatprep.subr.bf16.mxu1 %v7638_v16  ;;  %v8292_v16 = vcombine.high %v4759_v11, %v4763_v3 }
 0x503   :  { %7513 = vmatpush1.bf16.msra.mxu0 %v8275_v15  ;;  %v8291_v15 = vcombine.low %v4751_v60, %v4755_v7 }
 0x504   :  { %7515 = vmatprep.subr.bf16.mxu0 %v8276_v0  ;;  %v8293_v0 = vcombine.low %v4759_v11, %v4763_v3 }
 0x505   :  { %7641 = vmatpush3.bf16.msra.mxu1 %v7640_v20  ;;  %v8296_v20 = vcombine.high %v4775_v17, %v4779_v45 }
 0x506   :  { %7643 = vmatprep.subr.bf16.mxu1 %v7642_v9  ;;  %v4787_v9 = vld [vmem:[#allocation11 + $0xfa8] sm:$0xff] }
 0x507   :  { %7517 = vmatpush1.bf16.msra.mxu0 %v8277_v19  ;;  %v4783_v19 = vld [vmem:[#allocation11 + $0xf88] sm:$0xff] }
 0x508   :  { %7519 = vmatprep.subr.bf16.mxu0 %v8278_v10  ;;  %v8298_v5 = vcombine.high %v4783_v19, %v4787_v9  ;;  %v4791_v10 = vld [vmem:[#allocation11 + $0xfc8] sm:$0xff]  ;;  %v8299_v46 = vcombine.low %v4783_v19, %v4787_v9 }
 0x509   :  { %7645 = vmatpush3.bf16.msra.mxu1 %v7644_v29  ;;  %v8300_v13 = vcombine.high %v4791_v10, %v4795_v37  ;;  %v4740_v29 = vld [vmem:[#allocation11 + $0xe30] sm:$0xff] }
 0x50a   :  { %7647 = vmatprep.subr.bf16.mxu1 %v7646_v31  ;;  %v8302_v31 = vcombine.high %v4736_v26, %v4740_v29 }
 0x50b   :  { %7521 = vmatpush1.bf16.msra.mxu0 %v8279_v30  ;;  %v8301_v30 = vcombine.low %v4791_v10, %v4795_v37 }
 0x50c   :  { %7523 = vmatprep.subr.bf16.mxu0 %v8280_v39  ;;  %v8303_v39 = vcombine.low %v4736_v26, %v4740_v29  ;;  %v4785_v29 = vld [vmem:[#allocation11 + $0xf98] sm:$0xff] }
 0x50d   :  { %v9175_v25 = vpop.f32.mrb[30].mxu1  ;;  %7649 = vmatpush3.bf16.msra.mxu1 %v7648_v23  ;;  %v8306_v23 = vcombine.high %v4752_v44, %v4756_v47  ;;  %v5308_v47 = vld [vmem:[%s9545_s7 + $0xe0] sm:$0xff] }
 0x50e   :  { %v9177_v59 = vpop.f32.mrb[31].mxu1  ;;  %7651 = vmatprep.subr.bf16.mxu1 %v7650_v51  ;;  %v4764_v51 = vld [vmem:[#allocation11 + $0xef0] sm:$0xff] }
 0x50f   :  { %7525 = vmatpush1.bf16.msra.mxu0 %v8281_v48  ;;  %v4760_v48 = vld [vmem:[#allocation11 + $0xed0] sm:$0xff] }
 0x510   :  { %7527 = vmatprep.subr.bf16.mxu0 %v8282_v55  ;;  %v8308_v54 = vcombine.high %v4760_v48, %v4764_v51  ;;  %v4768_v55 = vld [vmem:[#allocation11 + $0xf10] sm:$0xff]  ;;  %v8309_v57 = vcombine.low %v4760_v48, %v4764_v51  ;;  %v5292_v48 = vld [vmem:[%s9545_s7 + $0x60] sm:$0xff] }
 0x511   :  { %7653 = vmatpush3.bf16.msra.mxu1 %v7652_v28  ;;  %v8310_v28 = vcombine.high %v4768_v55, %v4772_v56  ;;  %v8311_v42 = vcombine.low %v4768_v55, %v4772_v56  ;;  %v5293_v51 = vld [vmem:[%s9545_s7 + $0x68] sm:$0xff]  ;;  %v5310_v55 = vld [vmem:[%s9545_s7 + $0xf0] sm:$0xff]  ;;  %v5311_v56 = vld [vmem:[%s9545_s7 + $0xf8] sm:$0xff] }
 0x513   :  { %7529 = vmatpush1.bf16.msra.mxu0 %v8283_v49  ;;  %v4776_v49 = vld [vmem:[#allocation11 + $0xf50] sm:$0xff] }
 0x514   :  { %7531 = vmatprep.subr.bf16.mxu0 %v8284_v34  ;;  %v4780_v34 = vld [vmem:[#allocation11 + $0xf70] sm:$0xff] }
 0x515   :  { %v8312_v36 = vcombine.high %v4776_v49, %v4780_v34  ;;  %v8313_v62 = vcombine.low %v4776_v49, %v4780_v34  ;;  %v5295_v49 = vld [vmem:[%s9545_s7 + $0x78] sm:$0xff] }
 0x517   :  { %7533 = vmatpush1.bf16.msra.mxu0 %v8285_v50  ;;  %v4784_v50 = vld [vmem:[#allocation11 + $0xf90] sm:$0xff] }
 0x518   :  { %7535 = vmatprep.subr.bf16.mxu0 %v8286_v61  ;;  %v4788_v61 = vld [vmem:[#allocation11 + $0xfb0] sm:$0xff] }
 0x519   :  { %v8314_v63 = vcombine.high %v4784_v50, %v4788_v61  ;;  %v8315_v60 = vcombine.low %v4784_v50, %v4788_v61  ;;  %v5224_v61 = vlaneseq }
 0x51a   :  { %4995 = vmatmul.mubr.f32.vlgmr.msra.gmra.mrb[8].mxu0 %v9038_v38 }
 0x51b   :  { %7537 = vmatpush1.bf16.msra.mxu0 %v8287_v6  ;;  %5065 = vmatprep.mubr.f32.mxu0 %v8553_v1  ;;  %v4792_v6 = vld [vmem:[#allocation11 + $0xfd0] sm:$0xff] }
 0x51c   :  { %7539 = vmatprep.subr.bf16.mxu0 %v8288_v40  ;;  %v4796_v40 = vld [vmem:[#allocation11 + $0xff0] sm:$0xff] }
 0x51d   :  { %v8316_v7 = vcombine.high %v4792_v6, %v4796_v40  ;;  %v8317_v11 = vcombine.low %v4792_v6, %v4796_v40  ;;  %v9219_v6 = vld [vmem:[#allocation12] sm:$0xff] }
 0x51f   :  { %7541 = vmatpush1.bf16.msra.mxu0 %v8289_v22  ;;  %v4737_v22 = vld [vmem:[#allocation11 + $0xe18] sm:$0xff] }
 0x520   :  { %7543 = vmatprep.subr.bf16.mxu0 %v8290_v14  ;;  %v4741_v14 = vld [vmem:[#allocation11 + $0xe38] sm:$0xff] }
 0x521   :  { %v8318_v3 = vcombine.high %v4737_v22, %v4741_v14  ;;  %v8319_v21 = vcombine.low %v4737_v22, %v4741_v14 }
 0x523   :  { %7545 = vmatpush1.bf16.msra.mxu0 %v8291_v15  ;;  %v4745_v15 = vld [vmem:[#allocation11 + $0xe58] sm:$0xff] }
 0x524   :  { %7547 = vmatprep.subr.bf16.mxu0 %v8292_v16  ;;  %v4749_v16 = vld [vmem:[#allocation11 + $0xe78] sm:$0xff] }
 0x525   :  { %v8320_v8 = vcombine.high %v4745_v15, %v4749_v16  ;;  %v8321_v17 = vcombine.low %v4745_v15, %v4749_v16  ;;  %v5312_v15 = vld [vmem:[%s9545_s7 + $0x100] sm:$0xff]  ;;  %v5313_v16 = vld [vmem:[%s9545_s7 + $0x108] sm:$0xff] }
 0x527   :  { %7549 = vmatpush1.bf16.msra.mxu0 %v8293_v0  ;;  %v4753_v0 = vld [vmem:[#allocation11 + $0xe98] sm:$0xff] }
 0x528   :  { %7551 = vmatprep.subr.bf16.mxu0 %v8294_v33  ;;  %v4757_v33 = vld [vmem:[#allocation11 + $0xeb8] sm:$0xff] }
 0x529   :  { %v8322_v45 = vcombine.high %v4753_v0, %v4757_v33  ;;  %v8323_v19 = vcombine.low %v4753_v0, %v4757_v33 }
 0x52b   :  { %7553 = vmatpush1.bf16.msra.mxu0 %v8295_v18  ;;  %v4761_v18 = vld [vmem:[#allocation11 + $0xed8] sm:$0xff] }
 0x52c   :  { %7555 = vmatprep.subr.bf16.mxu0 %v8296_v20  ;;  %v4765_v20 = vld [vmem:[#allocation11 + $0xef8] sm:$0xff] }
 0x52d   :  { %v8324_v9 = vcombine.high %v4761_v18, %v4765_v20  ;;  %v8325_v10 = vcombine.low %v4761_v18, %v4765_v20  ;;  %v5315_v18 = vld [vmem:[%s9545_s7 + $0x118] sm:$0xff]  ;;  %v5332_v20 = vld [vmem:[%s9545_s7 + $0x1a0] sm:$0xff] }
 0x52f   :  { %7557 = vmatpush1.bf16.msra.mxu0 %v8297_v12  ;;  %v4769_v12 = vld [vmem:[#allocation11 + $0xf18] sm:$0xff] }
 0x530   :  { %7559 = vmatprep.subr.bf16.mxu0 %v8298_v5  ;;  %v4773_v5 = vld [vmem:[#allocation11 + $0xf38] sm:$0xff] }
 0x531   :  { %v8326_v37 = vcombine.high %v4769_v12, %v4773_v5  ;;  %v8327_v26 = vcombine.low %v4769_v12, %v4773_v5  ;;  %v5316_v5 = vld [vmem:[%s9545_s7 + $0x120] sm:$0xff] }
 0x533   :  { %7561 = vmatpush1.bf16.msra.mxu0 %v8299_v46  ;;  %v4777_v46 = vld [vmem:[#allocation11 + $0xf58] sm:$0xff] }
 0x534   :  { %7563 = vmatprep.subr.bf16.mxu0 %v8300_v13  ;;  %v4781_v13 = vld [vmem:[#allocation11 + $0xf78] sm:$0xff] }
 0x537   :  { %7565 = vmatpush1.bf16.msra.mxu0 %v8301_v30  ;;  %v4789_v30 = vld [vmem:[#allocation11 + $0xfb8] sm:$0xff] }
 0x538   :  { %7567 = vmatprep.subr.bf16.mxu0 %v8302_v31  ;;  %v8329_v31 = vcombine.low %v4777_v46, %v4781_v13  ;;  %v8330_v32 = vcombine.high %v4785_v29, %v4789_v30 }
 0x53a   :  { %5066 = vmatmul.mubr.f32.vlgmr.msra.gmra.mrb[10].mxu0 %v9038_v38 }
 0x53b   :  { %7569 = vmatpush1.bf16.msra.mxu0 %v8303_v39  ;;  %5136 = vmatprep.mubr.f32.mxu0 %v8553_v1  ;;  %v4797_v39 = vld [vmem:[#allocation11 + $0xff8] sm:$0xff] }
 0x53c   :  { %7571 = vmatprep.subr.bf16.mxu0 %v8304_v41  ;;  %v8331_v41 = vcombine.low %v4785_v29, %v4789_v30  ;;  %v8332_v44 = vcombine.high %v4793_v4, %v4797_v39  ;;  %v5319_v29 = vld [vmem:[%s9545_s7 + $0x138] sm:$0xff]  ;;  %v5336_v30 = vld [vmem:[%s9545_s7 + $0x1c0] sm:$0xff] }
 0x53f   :  { %7573 = vmatpush1.bf16.msra.mxu0 %v8305_v24  ;;  %v5309_v24 = vld [vmem:[%s9545_s7 + $0xe8] sm:$0xff] }
 0x540   :  { %7575 = vmatprep.subr.bf16.mxu0 %v8306_v23  ;;  %v7654_v23 = vpack.c.bf16 %v5309_v24, %v5308_v47  ;;  %v5339_v47 = vld [vmem:[%s9545_s7 + $0x1d8] sm:$0xff] }
 0x542   :  { %7655 = vmatprep.subr.bf16.mxu1 %v7654_v23 }
 0x543   :  { %7577 = vmatpush1.bf16.msra.mxu0 %v8307_v53  ;;  %v8333_v53 = vcombine.low %v4793_v4, %v4797_v39  ;;  %v5320_v39 = vld [vmem:[%s9545_s7 + $0x140] sm:$0xff] }
 0x544   :  { %7579 = vmatprep.subr.bf16.mxu0 %v8308_v54  ;;  %v7656_v54 = vpack.c.bf16 %v5293_v51, %v5292_v48  ;;  %v5322_v48 = vld [vmem:[%s9545_s7 + $0x150] sm:$0xff]  ;;  %v5323_v51 = vld [vmem:[%s9545_s7 + $0x158] sm:$0xff] }
 0x546   :  { %7657 = vmatpush3.bf16.msra.mxu1 %v7656_v54  ;;  %v5341_v54 = vld [vmem:[%s9545_s7 + $0x1e8] sm:$0xff] }
 0x547   :  { %7581 = vmatpush1.bf16.msra.mxu0 %v8309_v57  ;;  %v5294_v57 = vld [vmem:[%s9545_s7 + $0x70] sm:$0xff] }
 0x548   :  { %7583 = vmatprep.subr.bf16.mxu0 %v8310_v28  ;;  %v7658_v28 = vpack.c.bf16 %v5311_v56, %v5310_v55  ;;  %v7660_v34 = vpack.c.bf16 %v5295_v49, %v5294_v57  ;;  %v7684_v55 = vpack.c.bf16 %v5323_v51, %v5322_v48  ;;  %v5325_v49 = vld [vmem:[%s9545_s7 + $0x168] sm:$0xff] }
 0x54a   :  { %7659 = vmatprep.subr.bf16.mxu1 %v7658_v28  ;;  %v5324_v28 = vld [vmem:[%s9545_s7 + $0x160] sm:$0xff] }
 0x54b   :  { %7585 = vmatpush1.bf16.msra.mxu0 %v8311_v42  ;;  %v5328_v42 = vld [vmem:[%s9545_s7 + $0x180] sm:$0xff]  ;;  %7661 = vmatpush3.bf16.msra.mxu1 %v7660_v34 }
 0x54c   :  { %7587 = vmatprep.subr.bf16.mxu0 %v8312_v36  ;;  %v5329_v36 = vld [vmem:[%s9545_s7 + $0x188] sm:$0xff] }
 0x54d   :  { %v7662_v50 = vpack.c.bf16 %v5329_v36, %v5328_v42  ;;  %v5342_v42 = vld [vmem:[%s9545_s7 + $0x1f0] sm:$0xff]  ;;  %v5343_v36 = vld [vmem:[%s9545_s7 + $0x1f8] sm:$0xff] }
 0x54f   :  { %7589 = vmatpush1.bf16.msra.mxu0 %v8313_v62  ;;  %7663 = vmatprep.subr.bf16.mxu1 %v7662_v50  ;;  %v9216_v62 = vshrl.u32 %v5224_v61, 7  ;;  %v7688_v50 = vpack.c.bf16 %v5325_v49, %v5324_v28 }
 0x550   :  { %7591 = vmatprep.subr.bf16.mxu0 %v8314_v63 }
 0x551   :  { %v5226_v63 = vsub.s32 0, %v9216_v62  ;;  %v5230_v40 = vsub.s32 1, %v9216_v62  ;;  %v5234_v56 = vsub.s32 2, %v9216_v62  ;;  %v5238_v34 = vsub.s32 3, %v9216_v62 }
 0x552   :  { %v5242_v28 = vsub.s32 4, %v9216_v62 }
 0x553   :  { %7593 = vmatpush1.bf16.msra.mxu0 %v8315_v60  ;;  %v5227_v60 = vrot.slane %v9219_v6, %v5226_v63  ;;  %v5231_v22 = vrot.slane %v9219_v6, %v5230_v40  ;;  %v5235_v61 = vrot.slane %v9219_v6, %v5234_v56  ;;  %v7690_v63 = vpack.c.bf16 %v5343_v36, %v5342_v42  ;;  %v5326_v40 = vld [vmem:[%s9545_s7 + $0x170] sm:$0xff]  ;;  %v5520_v56 = vld [vmem:[%s9547_s9 + $0xe8] sm:$0xff] }
 0x554   :  { %7595 = vmatprep.subr.bf16.mxu0 %v8316_v7  ;;  %v5504_v42 = vld [vmem:[%s9547_s9 + $0x68] sm:$0xff]  ;;  %v5246_v36 = vsub.s32 5, %v9216_v62 }
 0x557   :  { %7597 = vmatpush1.bf16.msra.mxu0 %v8317_v11 }
 0x558   :  { %7599 = vmatprep.subr.bf16.mxu0 %v8318_v3 }
 0x55a   :  { %5137 = vmatmul.mubr.f32.vlgmr.msra.gmra.mrb[12].mxu0 %v9038_v38 }
 0x55b   :  { %7601 = vmatpush1.bf16.msra.mxu0 %v8319_v21  ;;  %5207 = vmatprep.mubr.f32.mxu0 %v8553_v1  ;;  %v8328_v1 = vcombine.high %v4777_v46, %v4781_v13  ;;  %v5335_v46 = vld [vmem:[%s9545_s7 + $0x1b8] sm:$0xff] }
 0x55c   :  { %7603 = vmatprep.subr.bf16.mxu0 %v8320_v8  ;;  %v5330_v8 = vld [vmem:[%s9545_s7 + $0x190] sm:$0xff] }
 0x55f   :  { %7605 = vmatpush1.bf16.msra.mxu0 %v8321_v17 }
 0x560   :  { %7607 = vmatprep.subr.bf16.mxu0 %v8322_v45  ;;  %v5314_v45 = vld [vmem:[%s9545_s7 + $0x110] sm:$0xff] }
 0x563   :  { %7609 = vmatpush1.bf16.msra.mxu0 %v8323_v19  ;;  %v5333_v19 = vld [vmem:[%s9545_s7 + $0x1a8] sm:$0xff] }
 0x564   :  { %7611 = vmatprep.subr.bf16.mxu0 %v8324_v9  ;;  %v7668_v9 = vpack.c.bf16 %v5315_v18, %v5314_v45  ;;  %v7670_v12 = vpack.c.bf16 %v5333_v19, %v5332_v20  ;;  %v5493_v20 = vld [vmem:[%s9547_s9 + $0x10] sm:$0xff]  ;;  %v5494_v19 = vld [vmem:[%s9547_s9 + $0x18] sm:$0xff] }
 0x567   :  { %7613 = vmatpush1.bf16.msra.mxu0 %v8325_v10  ;;  %v5317_v10 = vld [vmem:[%s9545_s7 + $0x128] sm:$0xff] }
 0x568   :  { %7615 = vmatprep.subr.bf16.mxu0 %v8326_v37  ;;  %v5334_v37 = vld [vmem:[%s9545_s7 + $0x1b0] sm:$0xff]  ;;  %v7672_v13 = vpack.c.bf16 %v5317_v10, %v5316_v5  ;;  %v7700_v5 = vpack.c.bf16 %v5494_v19, %v5493_v20  ;;  %v5526_v19 = vld [vmem:[%s9547_s9 + $0x118] sm:$0xff] }
 0x569   :  { %v5525_v20 = vld [vmem:[%s9547_s9 + $0x110] sm:$0xff] }
 0x56b   :  { %7617 = vmatpush1.bf16.msra.mxu0 %v8327_v26  ;;  %v7674_v26 = vpack.c.bf16 %v5335_v46, %v5334_v37  ;;  %v5495_v37 = vld [vmem:[%s9547_s9 + $0x20] sm:$0xff]  ;;  %v5496_v46 = vld [vmem:[%s9547_s9 + $0x28] sm:$0xff] }
 0x56c   :  { %7619 = vmatprep.subr.bf16.mxu0 %v8328_v1  ;;  %v5318_v1 = vld [vmem:[%s9545_s7 + $0x130] sm:$0xff] }
 0x56f   :  { %7621 = vmatpush1.bf16.msra.mxu0 %v8329_v31  ;;  %v5337_v31 = vld [vmem:[%s9545_s7 + $0x1c8] sm:$0xff] }
 0x570   :  { %7623 = vmatprep.subr.bf16.mxu0 %v8330_v32  ;;  %v7676_v32 = vpack.c.bf16 %v5319_v29, %v5318_v1  ;;  %v7678_v4 = vpack.c.bf16 %v5337_v31, %v5336_v30  ;;  %v7704_v1 = vpack.c.bf16 %v5496_v46, %v5495_v37  ;;  %v5497_v30 = vld [vmem:[%s9547_s9 + $0x30] sm:$0xff]  ;;  %v5498_v31 = vld [vmem:[%s9547_s9 + $0x38] sm:$0xff]  ;;  %v5527_v37 = vld [vmem:[%s9547_s9 + $0x120] sm:$0xff] }
 0x571   :  { %v5528_v46 = vld [vmem:[%s9547_s9 + $0x128] sm:$0xff] }
 0x573   :  { %7625 = vmatpush1.bf16.msra.mxu0 %v8331_v41  ;;  %v5321_v41 = vld [vmem:[%s9545_s7 + $0x148] sm:$0xff] }
 0x574   :  { %7627 = vmatprep.subr.bf16.mxu0 %v8332_v44  ;;  %v5338_v44 = vld [vmem:[%s9545_s7 + $0x1d0] sm:$0xff]  ;;  %v7680_v24 = vpack.c.bf16 %v5321_v41, %v5320_v39  ;;  %v7708_v39 = vpack.c.bf16 %v5498_v31, %v5497_v30  ;;  %v5530_v31 = vld [vmem:[%s9547_s9 + $0x138] sm:$0xff] }
 0x575   :  { %v7682_v23 = vpack.c.bf16 %v5339_v47, %v5338_v44  ;;  %v5499_v44 = vld [vmem:[%s9547_s9 + $0x40] sm:$0xff]  ;;  %v5500_v47 = vld [vmem:[%s9547_s9 + $0x48] sm:$0xff]  ;;  %v5529_v30 = vld [vmem:[%s9547_s9 + $0x130] sm:$0xff] }
 0x576   :  { %v7712_v48 = vpack.c.bf16 %v5500_v47, %v5499_v44  ;;  %v5531_v44 = vld [vmem:[%s9547_s9 + $0x140] sm:$0xff]  ;;  %v5532_v47 = vld [vmem:[%s9547_s9 + $0x148] sm:$0xff] }
 0x577   :  { %7629 = vmatpush1.bf16.msra.mxu0 %v8333_v53  ;;  %v5340_v53 = vld [vmem:[%s9545_s7 + $0x1e0] sm:$0xff] }
 0x578   :  { %v7686_v57 = vpack.c.bf16 %v5341_v54, %v5340_v53  ;;  %v5501_v53 = vld [vmem:[%s9547_s9 + $0x50] sm:$0xff]  ;;  %v5502_v54 = vld [vmem:[%s9547_s9 + $0x58] sm:$0xff] }
 0x57a   :  { %5208 = vmatmul.mubr.f32.vlgmr.msra.gmra.mrb[6].mxu0 %v9038_v38 }
 0x5ed   :  { %v4996_v7 = vpop.f32.mrb[8].mxu0 }
 0x5ee   :  { %v7758_v14 = vadd.f32 %v4996_v7, %v9091_v58  ;;  %v4998_v11 = vpop.f32.mrb[9].mxu0  ;;  %v5331_v58 = vld [vmem:[%s9545_s7 + $0x198] sm:$0xff] }
 0x5ef   :  { %v7759_v38 = vadd.f32 %v4998_v11, %v9093_v52  ;;  %v7664_v52 = vpack.c.bf16 %v5313_v16, %v5312_v15  ;;  %v7666_v17 = vpack.c.bf16 %v5331_v58, %v5330_v8  ;;  %v5508_v11 = vld [vmem:[%s9547_s9 + $0x88] sm:$0xff]  ;;  %v5491_v58 = vld [vmem:[%s9547_s9] sm:$0xff] }
 0x5f0   :  { %v5264_v3 = vadd.f32 %v7758_v14, %v5227_v60  ;;  %v5327_v60 = vld [vmem:[%s9545_s7 + $0x178] sm:$0xff]  ;;  %v5507_v14 = vld [vmem:[%s9547_s9 + $0x80] sm:$0xff] }
 0x5f1   :  { %v5265_v21 = vadd.f32 %v7759_v38, %v5231_v22  ;;  %v5239_v22 = vrot.slane %v9219_v6, %v5238_v34  ;;  %v7692_v16 = vpack.c.bf16 %v5327_v60, %v5326_v40  ;;  %v7694_v8 = vpack.c.bf16 %v5508_v11, %v5507_v14  ;;  %v5503_v34 = vld [vmem:[%s9547_s9 + $0x60] sm:$0xff] }
 0x5f2   :  { %v5272_v33 = vmax.f32 %v5264_v3, 0.0  ;;  %v5243_v40 = vrot.slane %v9219_v6, %v5242_v28  ;;  %v5247_v11 = vrot.slane %v9219_v6, %v5246_v36  ;;  %v5250_v28 = vsub.s32 6, %v9216_v62 }
 0x5f3   :  { %v5273_v0 = vmax.f32 %v5265_v21, 0.0  ;;  %v5254_v36 = vsub.s32 7, %v9216_v62  ;;  %v5538_v62 = vld [vmem:[%s9547_s9 + $0x178] sm:$0xff] }
 0x5f5   :  { %5415 = vmatprep.mubr.f32.mxu1 %v5273_v0  ;;  %v5492_v0 = vld [vmem:[%s9547_s9 + $0x8] sm:$0xff] }
 0x5f6   :  { %5416 = vmatmul.mubr.f32.vlgmr.msra.gmra.mrb[34].mxu1 %v5272_v33 }
 0x5f7   :  { %7665 = vmatpush3.bf16.msra.mxu1 %v7664_v52 }
 0x5f8   :  { %7667 = vmatprep.subr.bf16.mxu1 %v7666_v17  ;;  %v7696_v17 = vpack.c.bf16 %v5492_v0, %v5491_v58 }
 0x5fb   :  { %7669 = vmatpush3.bf16.msra.mxu1 %v7668_v9  ;;  %v5511_v9 = vld [vmem:[%s9547_s9 + $0xa0] sm:$0xff] }
 0x5fc   :  { %7671 = vmatprep.subr.bf16.mxu1 %v7670_v12  ;;  %v5512_v12 = vld [vmem:[%s9547_s9 + $0xa8] sm:$0xff] }
 0x5fd   :  { %v7702_v10 = vpack.c.bf16 %v5512_v12, %v5511_v9  ;;  %v5543_v9 = vld [vmem:[%s9547_s9 + $0x1a0] sm:$0xff]  ;;  %v5544_v12 = vld [vmem:[%s9547_s9 + $0x1a8] sm:$0xff] }
 0x5ff   :  { %7673 = vmatpush3.bf16.msra.mxu1 %v7672_v13  ;;  %v5513_v13 = vld [vmem:[%s9547_s9 + $0xb0] sm:$0xff] }
 0x600   :  { %7675 = vmatprep.subr.bf16.mxu1 %v7674_v26  ;;  %v5514_v26 = vld [vmem:[%s9547_s9 + $0xb8] sm:$0xff] }
 0x601   :  { %v7706_v29 = vpack.c.bf16 %v5514_v26, %v5513_v13  ;;  %v5545_v13 = vld [vmem:[%s9547_s9 + $0x1b0] sm:$0xff]  ;;  %v5546_v26 = vld [vmem:[%s9547_s9 + $0x1b8] sm:$0xff] }
 0x603   :  { %7677 = vmatpush3.bf16.msra.mxu1 %v7676_v32  ;;  %v5515_v32 = vld [vmem:[%s9547_s9 + $0xc0] sm:$0xff] }
 0x604   :  { %7679 = vmatprep.subr.bf16.mxu1 %v7678_v4  ;;  %v5516_v4 = vld [vmem:[%s9547_s9 + $0xc8] sm:$0xff] }
 0x605   :  { %v7710_v41 = vpack.c.bf16 %v5516_v4, %v5515_v32  ;;  %v5547_v32 = vld [vmem:[%s9547_s9 + $0x1c0] sm:$0xff]  ;;  %v5548_v4 = vld [vmem:[%s9547_s9 + $0x1c8] sm:$0xff] }
 0x607   :  { %7681 = vmatpush3.bf16.msra.mxu1 %v7680_v24  ;;  %v5517_v24 = vld [vmem:[%s9547_s9 + $0xd0] sm:$0xff] }
 0x608   :  { %7683 = vmatprep.subr.bf16.mxu1 %v7682_v23  ;;  %v5518_v23 = vld [vmem:[%s9547_s9 + $0xd8] sm:$0xff] }
 0x609   :  { %v7714_v51 = vpack.c.bf16 %v5518_v23, %v5517_v24  ;;  %v5549_v24 = vld [vmem:[%s9547_s9 + $0x1d0] sm:$0xff]  ;;  %v5550_v23 = vld [vmem:[%s9547_s9 + $0x1d8] sm:$0xff] }
 0x60b   :  { %7685 = vmatpush3.bf16.msra.mxu1 %v7684_v55  ;;  %v5519_v55 = vld [vmem:[%s9547_s9 + $0xe0] sm:$0xff] }
 0x60c   :  { %7687 = vmatprep.subr.bf16.mxu1 %v7686_v57  ;;  %v7716_v57 = vpack.c.bf16 %v5502_v54, %v5501_v53  ;;  %v7718_v49 = vpack.c.bf16 %v5520_v56, %v5519_v55  ;;  %v5533_v53 = vld [vmem:[%s9547_s9 + $0x150] sm:$0xff]  ;;  %v5534_v54 = vld [vmem:[%s9547_s9 + $0x158] sm:$0xff]  ;;  %v5551_v55 = vld [vmem:[%s9547_s9 + $0x1e0] sm:$0xff] }
 0x60d   :  { %v5067_v7 = vpop.f32.mrb[10].mxu0  ;;  %v5552_v56 = vld [vmem:[%s9547_s9 + $0x1e8] sm:$0xff] }
 0x60e   :  { %v7760_v38 = vadd.f32 %v5067_v7, %v9097_v35  ;;  %v5069_v3 = vpop.f32.mrb[11].mxu0  ;;  %v5509_v35 = vld [vmem:[%s9547_s9 + $0x90] sm:$0xff] }
 0x60f   :  { %v7761_v15 = vadd.f32 %v5069_v3, %v9099_v43  ;;  %7689 = vmatpush3.bf16.msra.mxu1 %v7688_v50  ;;  %v5510_v43 = vld [vmem:[%s9547_s9 + $0x98] sm:$0xff]  ;;  %v5521_v50 = vld [vmem:[%s9547_s9 + $0xf0] sm:$0xff]  ;;  %v5540_v3 = vld [vmem:[%s9547_s9 + $0x188] sm:$0xff] }
 0x610   :  { %v5266_v21 = vadd.f32 %v7760_v38, %v5235_v61  ;;  %7691 = vmatprep.subr.bf16.mxu1 %v7690_v63  ;;  %v7698_v18 = vpack.c.bf16 %v5510_v43, %v5509_v35  ;;  %v5522_v61 = vld [vmem:[%s9547_s9 + $0xf8] sm:$0xff]  ;;  %v7720_v63 = vpack.c.bf16 %v5504_v42, %v5503_v34  ;;  %v5505_v7 = vld [vmem:[%s9547_s9 + $0x70] sm:$0xff]  ;;  %v5539_v38 = vld [vmem:[%s9547_s9 + $0x180] sm:$0xff] }
 0x611   :  { %v5267_v52 = vadd.f32 %v7761_v15, %v5239_v22  ;;  %v7722_v60 = vpack.c.bf16 %v5522_v61, %v5521_v50  ;;  %v5506_v22 = vld [vmem:[%s9547_s9 + $0x78] sm:$0xff]  ;;  %v7726_v0 = vpack.c.bf16 %v5540_v3, %v5539_v38  ;;  %v5524_v35 = vld [vmem:[%s9547_s9 + $0x108] sm:$0xff]  ;;  %v5535_v34 = vld [vmem:[%s9547_s9 + $0x160] sm:$0xff] }
 0x612   :  { %v5274_v45 = vmax.f32 %v5266_v21, 0.0  ;;  %v5536_v42 = vld [vmem:[%s9547_s9 + $0x168] sm:$0xff]  ;;  %v5553_v50 = vld [vmem:[%s9547_s9 + $0x1f0] sm:$0xff]  ;;  %v5554_v61 = vld [vmem:[%s9547_s9 + $0x1f8] sm:$0xff] }
 0x613   :  { %v5275_v33 = vmax.f32 %v5267_v52, 0.0  ;;  %7693 = vmatpush3.bf16.msra.mxu1 %v7692_v16  ;;  %v5523_v52 = vld [vmem:[%s9547_s9 + $0x100] sm:$0xff] }
 0x614   :  { %7695 = vmatprep.subr.bf16.mxu1 %v7694_v8  ;;  %v7724_v8 = vpack.c.bf16 %v5506_v22, %v5505_v7  ;;  %v5537_v7 = vld [vmem:[%s9547_s9 + $0x170] sm:$0xff] }
 0x615   :  { %5485 = vmatprep.mubr.f32.mxu1 %v5275_v33 }
 0x616   :  { %5486 = vmatmul.mubr.f32.vlgmr.msra.gmra.mrb[36].mxu1 %v5274_v45 }
 0x617   :  { %7697 = vmatpush3.bf16.msra.mxu1 %v7696_v17  ;;  %v7728_v17 = vpack.c.bf16 %v5524_v35, %v5523_v52 }
 0x618   :  { %7699 = vmatprep.subr.bf16.mxu1 %v7698_v18 }
 0x61b   :  { %7701 = vmatpush3.bf16.msra.mxu1 %v7700_v5  ;;  %v7732_v5 = vpack.c.bf16 %v5526_v19, %v5525_v20  ;;  %v5770_v20 = vld [vmem:[#allocation14] ss:$0 sm:$0xff] }
 0x61c   :  { %7703 = vmatprep.subr.bf16.mxu1 %v7702_v10  ;;  %v7734_v10 = vpack.c.bf16 %v5544_v12, %v5543_v9 }
 0x61f   :  { %7705 = vmatpush3.bf16.msra.mxu1 %v7704_v1  ;;  %v7736_v1 = vpack.c.bf16 %v5528_v46, %v5527_v37 }
 0x620   :  { %7707 = vmatprep.subr.bf16.mxu1 %v7706_v29  ;;  %v7738_v29 = vpack.c.bf16 %v5546_v26, %v5545_v13 }
 0x623   :  { %7709 = vmatpush3.bf16.msra.mxu1 %v7708_v39  ;;  %v7740_v39 = vpack.c.bf16 %v5530_v31, %v5529_v30 }
 0x624   :  { %7711 = vmatprep.subr.bf16.mxu1 %v7710_v41  ;;  %v7742_v41 = vpack.c.bf16 %v5548_v4, %v5547_v32 }
 0x627   :  { %7713 = vmatpush3.bf16.msra.mxu1 %v7712_v48  ;;  %v7744_v48 = vpack.c.bf16 %v5532_v47, %v5531_v44 }
 0x628   :  { %7715 = vmatprep.subr.bf16.mxu1 %v7714_v51  ;;  %v7746_v51 = vpack.c.bf16 %v5550_v23, %v5549_v24 }
 0x62b   :  { %7717 = vmatpush3.bf16.msra.mxu1 %v7716_v57  ;;  %v7748_v57 = vpack.c.bf16 %v5534_v54, %v5533_v53 }
 0x62c   :  { %7719 = vmatprep.subr.bf16.mxu1 %v7718_v49  ;;  %v7750_v49 = vpack.c.bf16 %v5552_v56, %v5551_v55 }
 0x62d   :  { %v5138_v14 = vpop.f32.mrb[12].mxu0 }
 0x62e   :  { %v7762_v15 = vadd.f32 %v5138_v14, %v9175_v25  ;;  %v5140_v16 = vpop.f32.mrb[13].mxu0  ;;  %v5541_v25 = vld [vmem:[%s9547_s9 + $0x190] sm:$0xff]  ;;  %v5255_v14 = vrot.slane %v9219_v6, %v5254_v36 }
 0x62f   :  { %v7763_v21 = vadd.f32 %v5140_v16, %v9177_v59  ;;  %7721 = vmatpush3.bf16.msra.mxu1 %v7720_v63  ;;  %v5542_v59 = vld [vmem:[%s9547_s9 + $0x198] sm:$0xff]  ;;  %v7752_v63 = vpack.c.bf16 %v5536_v42, %v5535_v34  ;;  %s8556_s9 = smov [#allocation15]  }
 0x630   :  { %v5268_v58 = vadd.f32 %v7762_v15, %v5243_v40  ;;  %7723 = vmatprep.subr.bf16.mxu1 %v7722_v60  ;;  %v7730_v18 = vpack.c.bf16 %v5542_v59, %v5541_v25  ;;  %v5251_v40 = vrot.slane %v9219_v6, %v5250_v28  ;;  %v7754_v60 = vpack.c.bf16 %v5554_v61, %v5553_v50  ;;  %s5722_s20 = sshll.u32 %s8556_s9, 4  ;;  %s5723_s20 = int_to_ptr.vmem [resolvable:$true] %s5722_s20 }
 0x631   :  { %v5269_v43 = vadd.f32 %v7763_v21, %v5247_v11  ;;  %v7756_v15 = vpack.c.bf16 %v5538_v62, %v5537_v7  ;;  %s8510_s0 = scalar_lea.vmem %s5723_s20, 32  ;;  %p8515_p1 = scmp.lt.s32.totalorder %s5723_s20, %s5723_s20 }
 0x632   :  { %v5276_v45 = vmax.f32 %v5268_v58, 0.0  ;;  %p8511_p0 = scmp.ne.s32.totalorder %s5723_s20, %s8510_s0  ;;  %p8516_p2 = scmp.lt.s32.totalorder %s8510_s0, %s8510_s0 }
 0x633   :  { %v5277_v33 = vmax.f32 %v5269_v43, 0.0  ;;  %7725 = vmatpush3.bf16.msra.mxu1 %v7724_v8  ;;  %v5769_v43 = vld [vmem:[#allocation2] ss:$0 sm:$0xff] }
 0x634   :  { %7727 = vmatprep.subr.bf16.mxu1 %v7726_v0  ;;  %v8555_v0 = vmov 0   ;;  %p8517_p3 = por %p8516_p2, %p8515_p1 }
 0x635   :  { %5626 = vmatprep.mubr.f32.mxu1 %v5277_v33  ;;  %8349 = vset.pattern.permute.xlu0 %v8555_v0 }
 0x636   :  { %5627 = vmatmul.mubr.f32.vlgmr.msra.gmra.mrb[38].mxu1 %v5276_v45  ;;  %p8518_p4 = pnand %p8517_p3, %p8511_p0 }
 0x637   :  { %7729 = vmatpush3.bf16.msra.mxu1 %v7728_v17 }
 0x638   :  { %7731 = vmatprep.subr.bf16.mxu1 %v7730_v18 }
 0x63b   :  { %7733 = vmatpush3.bf16.msra.mxu1 %v7732_v5 }
 0x63c   :  { %7735 = vmatprep.subr.bf16.mxu1 %v7734_v10 }
 0x63f   :  { %7737 = vmatpush3.bf16.msra.mxu1 %v7736_v1 }
 0x640   :  { %7739 = vmatprep.subr.bf16.mxu1 %v7738_v29 }
 0x643   :  { %7741 = vmatpush3.bf16.msra.mxu1 %v7740_v39 }
 0x644   :  { %7743 = vmatprep.subr.bf16.mxu1 %v7742_v41 }
 0x647   :  { %7745 = vmatpush3.bf16.msra.mxu1 %v7744_v48 }
 0x648   :  { %7747 = vmatprep.subr.bf16.mxu1 %v7746_v51 }
 0x64b   :  { %7749 = vmatpush3.bf16.msra.mxu1 %v7748_v57 }
 0x64c   :  { %7751 = vmatprep.subr.bf16.mxu1 %v7750_v49 }
 0x64d   :  { %v5209_v22 = vpop.f32.mrb[6].mxu0 }
 0x64e   :  { %v7764_v11 = vadd.f32 %v5209_v22, %v9085_v2  ;;  %v5211_v38 = vpop.f32.mrb[7].mxu0 }
 0x64f   :  { %v7765_v3 = vadd.f32 %v5211_v38, %v9087_v27  ;;  %7753 = vmatpush3.bf16.msra.mxu1 %v7752_v63 }
 0x650   :  { %v5270_v16 = vadd.f32 %v7764_v11, %v5251_v40  ;;  %7755 = vmatprep.subr.bf16.mxu1 %v7754_v60 }
 0x651   :  { %v5271_v21 = vadd.f32 %v7765_v3, %v5255_v14 }
 0x652   :  { %v5278_v58 = vmax.f32 %v5270_v16, 0.0 }
 0x653   :  { %v5279_v8 = vmax.f32 %v5271_v21, 0.0  ;;  %7757 = vmatpush3.bf16.msra.mxu1 %v7756_v15 }
 0x655   :  { %5696 = vmatprep.mubr.f32.mxu1 %v5279_v8 }
 0x656   :  { %5697 = vmatmul.mubr.f32.vlgmr.msra.gmra.mrb[40].mxu1 %v5278_v58 }
 0x6c9   :  { %v6108_v52 = vpop.f32.mrb[34].mxu1 }
 0x6ca   :  { %v6109_v35 = vpop.f32.mrb[35].mxu1 }
 0x6cb   :  { %v6110_v6 = vadd.f32 %v6109_v35, %v6108_v52 }
 0x6cd   :  { %v5418_v59 = vadd.f32 %v6110_v6, %v5769_v43 }
 0x6e9   :  { %v6143_v2 = vpop.f32.mrb[36].mxu1 }
 0x6ea   :  { %v6144_v25 = vpop.f32.mrb[37].mxu1 }
 0x6eb   :  { %v6145_v27 = vadd.f32 %v6144_v25, %v6143_v2 }
 0x6ed   :  { %v5488_v33 = vadd.f32 %v6145_v27, %v5418_v59 }
 0x709   :  { %v6178_v17 = vpop.f32.mrb[38].mxu1 }
 0x70a   :  { %v6179_v45 = vpop.f32.mrb[39].mxu1 }
 0x70b   :  { %v6180_v18 = vadd.f32 %v6179_v45, %v6178_v17 }
 0x70d   :  { %v5629_v12 = vadd.f32 %v6180_v18, %v5770_v20 }
 0x729   :  { %v6213_v19 = vpop.f32.mrb[40].mxu1 }
 0x72a   :  { %v6214_v9 = vpop.f32.mrb[41].mxu1 }
 0x72b   :  { %v6215_v5 = vadd.f32 %v6214_v9, %v6213_v19 }
 0x72d   :  { %v5699_v10 = vadd.f32 %v6215_v5, %v5629_v12 }
 0x72f   :  { %v5709_v37 = vsel %vm5708_vm13, %v5699_v10, 0.0 }
 0x730   :  { %5710 = vadd.xlane.f32.xlu0 %v5709_v37 }
 0x746   :  { %5704 = vperm.xlu0 %8349, %v5488_v33  }
 0x7bd   :  { %v5711_v46 = vpop.xlane.xlu0 %5710 }
 0x7be   :  { %v5713_v26 = vmul.f32 0.125, %v5711_v46 }
 0x7c5   :  { %v5705_v13 = vpop.permute.xlu0 %5704 }
 0x7c6   :  { %v5707_v1 = vadd.f32 %v5705_v13, %v5699_v10 }
 0x7c8   :  { %v5714_v29 = vsub.f32 %v5707_v1, %v5713_v26 }
 0x7ca   :  { %5715 = vst.msk [vmem:[#allocation15] sm:$0x3] %vm5708_vm13, %v5714_v29 }
 0x7cb   :  { %8521 = shalt.err (!%p8518_p4)
}
 0x7cc   :  { %s8522_s3 = scalar_lea.hbm %s9549_s11, 32 }
 0x7cd   :  { %p8523_p5 = scmp.ne.s32.totalorder %s9549_s11, %s8522_s3  ;;  %p8526_p6 = scmp.lt.u32.totalorder %s8522_s3, %s9549_s11 }
 0x7cf   :  { %p8528_p7 = pnand %p8526_p6, %p8523_p5 }
 0x7d1   :  { %8531 = shalt.err (!%p8528_p7)
}
 0x7d2   :  { %5725 = dma.vmem_to_hbm [thread:$0]  %s5723_s20, 32, %s9549_s11, [#allocation5]  }
 0x7d3   :  { %8540 = dma.done.wait [#allocation5], 32  }
 0x7d4   :  { %8541 = vsyncadd [#allocation5], 4294967264 }
 0x7d5   :  { %5729 = vsyncpa [#allocation4], 1 }
 0x7d6   :  { %5730 = vsyncpa [#allocation7], 1 }
 0x7d7   :  { %5731 = vsyncpa [#allocation10], 1 }
 0x7d8   :  { %5732 = vsyncpa [#allocation13], 1 }
 0x7d9   :  { %5733 = vsyncpa [#allocation5], 1 }

</bundles_post_ra>
